<compile_context>
chip_gen: v6e
topology: v6e:2x2x1
jax: 0.10.0
libtpu: 0.0.40
codegen_flags: <defaults>
</compile_context>

<pallas_src>
import math

import jax
import jax.numpy as jnp
from jax.experimental import pallas as pl

# ---------------- mini-BERT config (small, synthetic) ----------------
VOCAB = 100
HIDDEN = 32
N_LAYERS = 2
N_HEADS = 4
HEAD_DIM = HIDDEN // N_HEADS
INTERMEDIATE = 64
MAX_POS = 16
TYPE_VOCAB = 2
NUM_CLASSES = 3
OUT_PAD = 128            # lane-dense logits slab width (sliced back to NUM_CLASSES)
LN_EPS = 1e-12

BATCH = 2
SEQ = 8
BS = BATCH * SEQ


# ---------------- in-kernel helpers (f32 elementwise math) ----------------
def _layernorm(x, gamma, beta):
    mean = jnp.mean(x, axis=-1, keepdims=True)
    var = jnp.mean(jnp.square(x - mean), axis=-1, keepdims=True)
    return (x - mean) * jax.lax.rsqrt(var + LN_EPS) * gamma + beta


def _gelu(x):
    c = math.sqrt(2.0 / math.pi)
    return 0.5 * x * (1.0 + jnp.tanh(c * (x + 0.044715 * x * x * x)))


# ---------------- single fused Pallas kernel (whole batch, one step) ----------------
def fused_bert_kernel(ids_ref, bias_ref,
                      word_emb_ref, pos_type_ref,
                      emb_g_ref, emb_b_ref,
                      wqkv_ref, bqkv_ref, wo_ref, bo_ref,
                      ln1g_ref, ln1b_ref,
                      w1_ref, b1_ref, w2_ref, b2_ref,
                      ln2g_ref, ln2b_ref,
                      cls_w_ref, cls_b_ref,
                      out_ref):
    # --- embeddings: word-id gather expressed as a one-hot bf16 MXU matmul ---
    ids = ids_ref[...]                                              # (BS, 1) int32
    vocab_iota = jax.lax.broadcasted_iota(jnp.int32, (BS, VOCAB), 1)
    onehot = (ids == vocab_iota).astype(jnp.bfloat16)               # (BS, VOCAB)
    we = jnp.dot(onehot, word_emb_ref[...],
                 preferred_element_type=jnp.float32)                # (BS, H)
    x = we + pos_type_ref[...]                                      # pos + token_type(=0) rows
    x = _layernorm(x, emb_g_ref[...], emb_b_ref[...])               # (BS, H) f32

    # --- additive attention bias rows, one per batch element (hoisted) ---
    bias = bias_ref[...]                                            # (B, S) f32
    bias_rows = [bias[b:b + 1, :] for b in range(BATCH)]            # each (1, S)

    scale = 1.0 / math.sqrt(HEAD_DIM)

    for l in range(N_LAYERS):                                       # unrolled (L = 2)
        # Fused QKV: one 2-D bf16 matmul, q/k/v are static lane slices of one tile.
        qkv = jnp.dot(x.astype(jnp.bfloat16), wqkv_ref[l],
                      preferred_element_type=jnp.float32) + bqkv_ref[l]   # (BS, 3H)
        q = qkv[:, 0:HIDDEN]
        k = qkv[:, HIDDEN:2 * HIDDEN]
        v = qkv[:, 2 * HIDDEN:3 * HIDDEN]

        # Attention per batch row / head (tiny S=8, dh=8 tiles are unavoidable
        # here; the slices stay inside a single (8,128) tile).
        ctx_rows = []
        for b in range(BATCH):
            r0 = b * SEQ
            qb = q[r0:r0 + SEQ]                                     # (S, H)
            kb = k[r0:r0 + SEQ]
            vb = v[r0:r0 + SEQ].astype(jnp.bfloat16)
            head_ctx = []
            for h in range(N_HEADS):
                c0 = h * HEAD_DIM
                qh = qb[:, c0:c0 + HEAD_DIM].astype(jnp.bfloat16)   # (S, dh)
                kh = kb[:, c0:c0 + HEAD_DIM].astype(jnp.bfloat16)
                s = jnp.einsum('qd,kd->qk', qh, kh,
                               preferred_element_type=jnp.float32) * scale
                s = s + bias_rows[b]
                s = s - jnp.max(s, axis=-1, keepdims=True)
                p = jnp.exp(s)
                p = p * pl.reciprocal(jnp.sum(p, axis=-1, keepdims=True),
                                      approx=True)
                head_ctx.append(jnp.dot(p.astype(jnp.bfloat16),
                                        vb[:, c0:c0 + HEAD_DIM],
                                        preferred_element_type=jnp.float32))
            ctx_rows.append(jnp.concatenate(head_ctx, axis=-1))     # (S, H)
        ctx = jnp.concatenate(ctx_rows, axis=0)                     # (BS, H)

        # Output projection: one (BS,H) @ (H,H) matmul.
        attn_out = jnp.dot(ctx.astype(jnp.bfloat16), wo_ref[l],
                           preferred_element_type=jnp.float32) + bo_ref[l]
        h1 = _layernorm(x + attn_out, ln1g_ref[l], ln1b_ref[l])

        inter = _gelu(jnp.dot(h1.astype(jnp.bfloat16), w1_ref[l],
                              preferred_element_type=jnp.float32) + b1_ref[l])
        ffn = jnp.dot(inter.astype(jnp.bfloat16), w2_ref[l],
                      preferred_element_type=jnp.float32) + b2_ref[l]
        x = _layernorm(h1 + ffn, ln2g_ref[l], ln2b_ref[l])

    # --- classifier on the [CLS] rows (row b*S of each batch element) ---
    cls = jnp.concatenate([x[b * SEQ:b * SEQ + 1, :] for b in range(BATCH)],
                          axis=0)                                   # (B, H)
    # Lane-dense (B, 128) store; sliced to (B, NUM_CLASSES) in the wrapper.
    out_ref[...] = jnp.dot(cls.astype(jnp.bfloat16), cls_w_ref[...],
                           preferred_element_type=jnp.float32) + cls_b_ref[...]


# ---------------- wrapper: one pallas_call for the whole forward ----------------
@jax.jit
def text_only_model(packed, input_ids, attention_mask):
    B, S = input_ids.shape

    ids = input_ids.astype(jnp.int32).reshape(B * S, 1)
    attn_bias = (1.0 - attention_mask.astype(jnp.float32)) * (-1e9)      # (B, S)

    weight_args = [
        packed['word_emb'], packed['pos_type'],
        packed['emb_ln_g'], packed['emb_ln_b'],
        packed['wqkv'], packed['bqkv'], packed['wo'], packed['bo'],
        packed['ln1_g'], packed['ln1_b'],
        packed['w1'], packed['b1'], packed['w2'], packed['b2'],
        packed['ln2_g'], packed['ln2_b'],
        packed['cls_w'], packed['cls_b'],
    ]

    # No grid: single kernel step; every operand is a full-array VMEM block.
    out = pl.pallas_call(
        fused_bert_kernel,
        out_shape=jax.ShapeDtypeStruct((B, OUT_PAD), jnp.float32),
    )(ids, attn_bias, *weight_args)

    return out[:, :NUM_CLASSES]


# ---------------- parameters (deterministic synthetic init, BERT layout) ----------------
def init_params(key):
    def nrm(k, shape):
        return (0.02 * jax.random.normal(k, shape)).astype(jnp.float32)

    ks = iter(jax.random.split(key, 32))
    params = {
        'word_emb': nrm(next(ks), (VOCAB, HIDDEN)),
        'pos_emb': nrm(next(ks), (MAX_POS, HIDDEN)),
        'type_emb': nrm(next(ks), (TYPE_VOCAB, HIDDEN)),
        'emb_ln_g': jnp.ones((1, HIDDEN), jnp.float32),
        'emb_ln_b': jnp.zeros((1, HIDDEN), jnp.float32),
        'cls_w': nrm(next(ks), (HIDDEN, NUM_CLASSES)),
        'cls_b': jnp.zeros((1, NUM_CLASSES), jnp.float32),
        'layers': [],
    }
    for _ in range(N_LAYERS):
        layer = dict(
            wq=nrm(next(ks), (HIDDEN, HIDDEN)), bq=jnp.zeros((1, HIDDEN), jnp.float32),
            wk=nrm(next(ks), (HIDDEN, HIDDEN)), bk=jnp.zeros((1, HIDDEN), jnp.float32),
            wv=nrm(next(ks), (HIDDEN, HIDDEN)), bv=jnp.zeros((1, HIDDEN), jnp.float32),
            wo=nrm(next(ks), (HIDDEN, HIDDEN)), bo=jnp.zeros((1, HIDDEN), jnp.float32),
            ln1_g=jnp.ones((1, HIDDEN), jnp.float32), ln1_b=jnp.zeros((1, HIDDEN), jnp.float32),
            w1=nrm(next(ks), (HIDDEN, INTERMEDIATE)), b1=jnp.zeros((1, INTERMEDIATE), jnp.float32),
            w2=nrm(next(ks), (INTERMEDIATE, HIDDEN)), b2=jnp.zeros((1, HIDDEN), jnp.float32),
            ln2_g=jnp.ones((1, HIDDEN), jnp.float32), ln2_b=jnp.zeros((1, HIDDEN), jnp.float32),
        )
        params['layers'].append(layer)
    return params


def pack_params(raw, seq_len, batch):
    """Repack raw BERT-style params into the fused-kernel layout:
    fused (H, 3H) QKV, per-layer weights stacked on a leading layer dim,
    matmul weights in bf16, classifier padded to a 128-wide lane-dense slab.
    Pure-JAX glue, done once outside the kernel."""
    def stack(name, dtype=jnp.float32):
        return jnp.stack([lyr[name] for lyr in raw['layers']], axis=0).astype(dtype)

    wqkv = jnp.stack(
        [jnp.concatenate([lyr['wq'], lyr['wk'], lyr['wv']], axis=1)
         for lyr in raw['layers']], axis=0).astype(jnp.bfloat16)        # (L, H, 3H)
    bqkv = jnp.stack(
        [jnp.concatenate([lyr['bq'], lyr['bk'], lyr['bv']], axis=1)
         for lyr in raw['layers']], axis=0)                             # (L, 1, 3H) f32

    # position + token_type(=0) embedding rows, tiled over the folded batch
    pos_type = jnp.tile(raw['pos_emb'][:seq_len] + raw['type_emb'][0:1],
                        (batch, 1))                                     # (B*S, H) f32

    cls_w_pad = jnp.zeros((HIDDEN, OUT_PAD), jnp.float32)
    cls_w_pad = cls_w_pad.at[:, :NUM_CLASSES].set(raw['cls_w'])
    cls_b_pad = jnp.zeros((1, OUT_PAD), jnp.float32)
    cls_b_pad = cls_b_pad.at[:, :NUM_CLASSES].set(raw['cls_b'])

    return {
        'word_emb': raw['word_emb'].astype(jnp.bfloat16),               # (V, H)
        'pos_type': pos_type,
        'emb_ln_g': raw['emb_ln_g'], 'emb_ln_b': raw['emb_ln_b'],
        'wqkv': wqkv, 'bqkv': bqkv,
        'wo': stack('wo', jnp.bfloat16), 'bo': stack('bo'),             # (L, H, H)
        'ln1_g': stack('ln1_g'), 'ln1_b': stack('ln1_b'),
        'w1': stack('w1', jnp.bfloat16), 'b1': stack('b1'),             # (L, H, I)
        'w2': stack('w2', jnp.bfloat16), 'b2': stack('b2'),             # (L, I, H)
        'ln2_g': stack('ln2_g'), 'ln2_b': stack('ln2_b'),
        'cls_w': cls_w_pad.astype(jnp.bfloat16),                        # (H, 128)
        'cls_b': cls_b_pad,                                             # (1, 128)
    }


if __name__ == "__main__":
    key = jax.random.PRNGKey(0)
    k_param, k_ids = jax.random.split(key)

    raw_params = init_params(k_param)
    packed_params = pack_params(raw_params, SEQ, BATCH)

    input_ids = jax.random.randint(k_ids, (BATCH, SEQ), 0, VOCAB, dtype=jnp.int32)
    attention_mask = jnp.array(
        [[1, 1, 1, 1, 1, 1, 1, 1],
         [1, 1, 1, 1, 1, 0, 0, 0]], dtype=jnp.int32)

    logits = text_only_model(packed_params, input_ids, attention_mask)
    jax.block_until_ready(logits)

    assert logits.shape == (BATCH, NUM_CLASSES)
    assert logits.dtype == jnp.float32
    print("KERNEL_OK")
</pallas_src>

<mosaic_0001>
module attributes {stable_mosaic.version = 11 : i64} {
  func.func @fused_bert_kernel(%arg0: memref<16x1xi32, #tpu.memory_space<vmem>>, %arg1: memref<2x8xf32, #tpu.memory_space<vmem>>, %arg2: memref<100x32xbf16, #tpu.memory_space<vmem>>, %arg3: memref<16x32xf32, #tpu.memory_space<vmem>>, %arg4: memref<1x32xf32, #tpu.memory_space<vmem>>, %arg5: memref<1x32xf32, #tpu.memory_space<vmem>>, %arg6: memref<2x32x96xbf16, #tpu.memory_space<vmem>>, %arg7: memref<2x1x96xf32, #tpu.memory_space<vmem>>, %arg8: memref<2x32x32xbf16, #tpu.memory_space<vmem>>, %arg9: memref<2x1x32xf32, #tpu.memory_space<vmem>>, %arg10: memref<2x1x32xf32, #tpu.memory_space<vmem>>, %arg11: memref<2x1x32xf32, #tpu.memory_space<vmem>>, %arg12: memref<2x32x64xbf16, #tpu.memory_space<vmem>>, %arg13: memref<2x1x64xf32, #tpu.memory_space<vmem>>, %arg14: memref<2x64x32xbf16, #tpu.memory_space<vmem>>, %arg15: memref<2x1x32xf32, #tpu.memory_space<vmem>>, %arg16: memref<2x1x32xf32, #tpu.memory_space<vmem>>, %arg17: memref<2x1x32xf32, #tpu.memory_space<vmem>>, %arg18: memref<32x128xbf16, #tpu.memory_space<vmem>>, %arg19: memref<1x128xf32, #tpu.memory_space<vmem>>, %arg20: memref<2x128xf32, #tpu.memory_space<vmem>>) attributes {dimension_semantics = [], scalar_prefetch = 0 : i64, scratch_operands = 0 : i64, tpu.core_type = #tpu.core_type<tc>} {
    %c0 = arith.constant 0 : index
    %c0_0 = arith.constant 0 : index
    %0 = vector.load %arg0[%c0, %c0_0] : memref<16x1xi32, #tpu.memory_space<vmem>>, vector<16x1xi32>
    %1 = tpu.iota {dimensions = array<i32: 1>} : vector<16x100xi32>
    %2 = vector.broadcast %0 : vector<16x1xi32> to vector<16x100xi32>
    %3 = arith.cmpi eq, %2, %1 : vector<16x100xi32>
    %4 = arith.extui %3 : vector<16x100xi1> to vector<16x100xi32>
    %5 = arith.sitofp %4 : vector<16x100xi32> to vector<16x100xf32>
    %6 = arith.truncf %5 : vector<16x100xf32> to vector<16x100xbf16>
    %c0_1 = arith.constant 0 : index
    %c0_2 = arith.constant 0 : index
    %7 = vector.load %arg2[%c0_1, %c0_2] : memref<100x32xbf16, #tpu.memory_space<vmem>>, vector<100x32xbf16>
    %cst = arith.constant dense<0.000000e+00> : vector<16x32xf32>
    %8 = tpu.matmul %6, %7, %cst {dimension_numbers = #tpu.dot_dimension_numbers<[1], [0], [0], [1], [0, 0, 1, 1], [], []>} : vector<16x100xbf16>, vector<100x32xbf16>, vector<16x32xf32> -> vector<16x32xf32>
    %c0_3 = arith.constant 0 : index
    %c0_4 = arith.constant 0 : index
    %9 = vector.load %arg3[%c0_3, %c0_4] : memref<16x32xf32, #tpu.memory_space<vmem>>, vector<16x32xf32>
    %10 = arith.addf %8, %9 : vector<16x32xf32>
    %c0_5 = arith.constant 0 : index
    %c0_6 = arith.constant 0 : index
    %11 = vector.load %arg4[%c0_5, %c0_6] : memref<1x32xf32, #tpu.memory_space<vmem>>, vector<1x32xf32>
    %c0_7 = arith.constant 0 : index
    %c0_8 = arith.constant 0 : index
    %12 = vector.load %arg5[%c0_7, %c0_8] : memref<1x32xf32, #tpu.memory_space<vmem>>, vector<1x32xf32>
    %cst_9 = arith.constant dense<0.000000e+00> : vector<16xf32>
    %13 = vector.multi_reduction <add>, %10, %cst_9 [1] : vector<16x32xf32> to vector<16xf32>
    %14 = vector.shape_cast %13 : vector<16xf32> to vector<16x1xf32>
    %cst_10 = arith.constant 3.200000e+01 : f32
    %15 = vector.broadcast %cst_10 : f32 to vector<16x1xf32>
    %16 = arith.divf %14, %15 : vector<16x1xf32>
    %17 = vector.broadcast %16 : vector<16x1xf32> to vector<16x32xf32>
    %18 = arith.subf %10, %17 : vector<16x32xf32>
    %19 = arith.mulf %18, %18 : vector<16x32xf32>
    %cst_11 = arith.constant dense<0.000000e+00> : vector<16xf32>
    %20 = vector.multi_reduction <add>, %19, %cst_11 [1] : vector<16x32xf32> to vector<16xf32>
    %21 = vector.shape_cast %20 : vector<16xf32> to vector<16x1xf32>
    %cst_12 = arith.constant 3.200000e+01 : f32
    %22 = vector.broadcast %cst_12 : f32 to vector<16x1xf32>
    %23 = arith.divf %21, %22 : vector<16x1xf32>
    %24 = vector.broadcast %16 : vector<16x1xf32> to vector<16x32xf32>
    %25 = arith.subf %10, %24 : vector<16x32xf32>
    %cst_13 = arith.constant 9.99999996E-13 : f32
    %26 = vector.broadcast %cst_13 : f32 to vector<16x1xf32>
    %27 = arith.addf %23, %26 : vector<16x1xf32>
    %28 = math.rsqrt %27 : vector<16x1xf32>
    %29 = vector.broadcast %28 : vector<16x1xf32> to vector<16x32xf32>
    %30 = arith.mulf %25, %29 : vector<16x32xf32>
    %31 = vector.broadcast %11 : vector<1x32xf32> to vector<16x32xf32>
    %32 = arith.mulf %30, %31 : vector<16x32xf32>
    %33 = vector.broadcast %12 : vector<1x32xf32> to vector<16x32xf32>
    %34 = arith.addf %32, %33 : vector<16x32xf32>
    %c0_14 = arith.constant 0 : index
    %c0_15 = arith.constant 0 : index
    %35 = vector.load %arg1[%c0_14, %c0_15] : memref<2x8xf32, #tpu.memory_space<vmem>>, vector<2x8xf32>
    %36 = vector.extract_strided_slice %35 {offsets = [0, 0], sizes = [1, 8], strides = [1, 1]} : vector<2x8xf32> to vector<1x8xf32>
    %37 = vector.extract_strided_slice %35 {offsets = [1, 0], sizes = [1, 8], strides = [1, 1]} : vector<2x8xf32> to vector<1x8xf32>
    %38 = arith.truncf %34 : vector<16x32xf32> to vector<16x32xbf16>
    %c0_16 = arith.constant 0 : index
    %c0_17 = arith.constant 0 : index
    %c0_18 = arith.constant 0 : index
    %39 = vector.load %arg6[%c0_16, %c0_17, %c0_18] : memref<2x32x96xbf16, #tpu.memory_space<vmem>>, vector<1x32x96xbf16>
    %40 = vector.shape_cast %39 : vector<1x32x96xbf16> to vector<32x96xbf16>
    %cst_19 = arith.constant dense<0.000000e+00> : vector<16x96xf32>
    %41 = tpu.matmul %38, %40, %cst_19 {dimension_numbers = #tpu.dot_dimension_numbers<[1], [0], [0], [1], [0, 0, 1, 1], [], []>} : vector<16x32xbf16>, vector<32x96xbf16>, vector<16x96xf32> -> vector<16x96xf32>
    %c0_20 = arith.constant 0 : index
    %c0_21 = arith.constant 0 : index
    %c0_22 = arith.constant 0 : index
    %42 = vector.load %arg7[%c0_20, %c0_21, %c0_22] : memref<2x1x96xf32, #tpu.memory_space<vmem>>, vector<1x1x96xf32>
    %43 = vector.shape_cast %42 : vector<1x1x96xf32> to vector<1x96xf32>
    %44 = vector.broadcast %43 : vector<1x96xf32> to vector<16x96xf32>
    %45 = arith.addf %41, %44 : vector<16x96xf32>
    %46 = vector.extract_strided_slice %45 {offsets = [0, 0], sizes = [16, 32], strides = [1, 1]} : vector<16x96xf32> to vector<16x32xf32>
    %47 = vector.extract_strided_slice %45 {offsets = [0, 32], sizes = [16, 32], strides = [1, 1]} : vector<16x96xf32> to vector<16x32xf32>
    %48 = vector.extract_strided_slice %45 {offsets = [0, 64], sizes = [16, 32], strides = [1, 1]} : vector<16x96xf32> to vector<16x32xf32>
    %49 = vector.extract_strided_slice %46 {offsets = [0, 0], sizes = [8, 32], strides = [1, 1]} : vector<16x32xf32> to vector<8x32xf32>
    %50 = vector.extract_strided_slice %47 {offsets = [0, 0], sizes = [8, 32], strides = [1, 1]} : vector<16x32xf32> to vector<8x32xf32>
    %51 = vector.extract_strided_slice %48 {offsets = [0, 0], sizes = [8, 32], strides = [1, 1]} : vector<16x32xf32> to vector<8x32xf32>
    %52 = arith.truncf %51 : vector<8x32xf32> to vector<8x32xbf16>
    %53 = vector.extract_strided_slice %49 {offsets = [0, 0], sizes = [8, 8], strides = [1, 1]} : vector<8x32xf32> to vector<8x8xf32>
    %54 = arith.truncf %53 : vector<8x8xf32> to vector<8x8xbf16>
    %55 = vector.extract_strided_slice %50 {offsets = [0, 0], sizes = [8, 8], strides = [1, 1]} : vector<8x32xf32> to vector<8x8xf32>
    %56 = arith.truncf %55 : vector<8x8xf32> to vector<8x8xbf16>
    "tpu.trace_start"() <{level = 10 : i32, message = "qd,kd->qk"}> : () -> ()
    %cst_23 = arith.constant dense<0.000000e+00> : vector<8x8xf32>
    %57 = tpu.matmul %54, %56, %cst_23 {dimension_numbers = #tpu.dot_dimension_numbers<[1], [1], [0], [0], [0, 0, 1, 0], [], []>} : vector<8x8xbf16>, vector<8x8xbf16>, vector<8x8xf32> -> vector<8x8xf32>
    "tpu.trace_stop"() : () -> ()
    %cst_24 = arith.constant 0.353553385 : f32
    %58 = vector.broadcast %cst_24 : f32 to vector<8x8xf32>
    %59 = arith.mulf %57, %58 : vector<8x8xf32>
    %60 = vector.broadcast %36 : vector<1x8xf32> to vector<8x8xf32>
    %61 = arith.addf %59, %60 : vector<8x8xf32>
    %cst_25 = arith.constant dense<0xFF800000> : vector<8xf32>
    %62 = vector.multi_reduction <maximumf>, %61, %cst_25 [1] : vector<8x8xf32> to vector<8xf32>
    %63 = vector.shape_cast %62 : vector<8xf32> to vector<8x1xf32>
    %64 = vector.broadcast %63 : vector<8x1xf32> to vector<8x8xf32>
    %65 = arith.subf %61, %64 : vector<8x8xf32>
    %66 = math.exp %65 : vector<8x8xf32>
    %cst_26 = arith.constant dense<0.000000e+00> : vector<8xf32>
    %67 = vector.multi_reduction <add>, %66, %cst_26 [1] : vector<8x8xf32> to vector<8xf32>
    %68 = vector.shape_cast %67 : vector<8xf32> to vector<8x1xf32>
    %69 = tpu.reciprocal %68 {approx = true} : vector<8x1xf32> -> vector<8x1xf32>
    %70 = vector.broadcast %69 : vector<8x1xf32> to vector<8x8xf32>
    %71 = arith.mulf %66, %70 : vector<8x8xf32>
    %72 = arith.truncf %71 : vector<8x8xf32> to vector<8x8xbf16>
    %73 = vector.extract_strided_slice %52 {offsets = [0, 0], sizes = [8, 8], strides = [1, 1]} : vector<8x32xbf16> to vector<8x8xbf16>
    %cst_27 = arith.constant dense<0.000000e+00> : vector<8x8xf32>
    %74 = tpu.matmul %72, %73, %cst_27 {dimension_numbers = #tpu.dot_dimension_numbers<[1], [0], [0], [1], [0, 0, 1, 1], [], []>} : vector<8x8xbf16>, vector<8x8xbf16>, vector<8x8xf32> -> vector<8x8xf32>
    %75 = vector.extract_strided_slice %49 {offsets = [0, 8], sizes = [8, 8], strides = [1, 1]} : vector<8x32xf32> to vector<8x8xf32>
    %76 = arith.truncf %75 : vector<8x8xf32> to vector<8x8xbf16>
    %77 = vector.extract_strided_slice %50 {offsets = [0, 8], sizes = [8, 8], strides = [1, 1]} : vector<8x32xf32> to vector<8x8xf32>
    %78 = arith.truncf %77 : vector<8x8xf32> to vector<8x8xbf16>
    "tpu.trace_start"() <{level = 10 : i32, message = "qd,kd->qk"}> : () -> ()
    %cst_28 = arith.constant dense<0.000000e+00> : vector<8x8xf32>
    %79 = tpu.matmul %76, %78, %cst_28 {dimension_numbers = #tpu.dot_dimension_numbers<[1], [1], [0], [0], [0, 0, 1, 0], [], []>} : vector<8x8xbf16>, vector<8x8xbf16>, vector<8x8xf32> -> vector<8x8xf32>
    "tpu.trace_stop"() : () -> ()
    %cst_29 = arith.constant 0.353553385 : f32
    %80 = vector.broadcast %cst_29 : f32 to vector<8x8xf32>
    %81 = arith.mulf %79, %80 : vector<8x8xf32>
    %82 = vector.broadcast %36 : vector<1x8xf32> to vector<8x8xf32>
    %83 = arith.addf %81, %82 : vector<8x8xf32>
    %cst_30 = arith.constant dense<0xFF800000> : vector<8xf32>
    %84 = vector.multi_reduction <maximumf>, %83, %cst_30 [1] : vector<8x8xf32> to vector<8xf32>
    %85 = vector.shape_cast %84 : vector<8xf32> to vector<8x1xf32>
    %86 = vector.broadcast %85 : vector<8x1xf32> to vector<8x8xf32>
    %87 = arith.subf %83, %86 : vector<8x8xf32>
    %88 = math.exp %87 : vector<8x8xf32>
    %cst_31 = arith.constant dense<0.000000e+00> : vector<8xf32>
    %89 = vector.multi_reduction <add>, %88, %cst_31 [1] : vector<8x8xf32> to vector<8xf32>
    %90 = vector.shape_cast %89 : vector<8xf32> to vector<8x1xf32>
    %91 = tpu.reciprocal %90 {approx = true} : vector<8x1xf32> -> vector<8x1xf32>
    %92 = vector.broadcast %91 : vector<8x1xf32> to vector<8x8xf32>
    %93 = arith.mulf %88, %92 : vector<8x8xf32>
    %94 = arith.truncf %93 : vector<8x8xf32> to vector<8x8xbf16>
    %95 = vector.extract_strided_slice %52 {offsets = [0, 8], sizes = [8, 8], strides = [1, 1]} : vector<8x32xbf16> to vector<8x8xbf16>
    %cst_32 = arith.constant dense<0.000000e+00> : vector<8x8xf32>
    %96 = tpu.matmul %94, %95, %cst_32 {dimension_numbers = #tpu.dot_dimension_numbers<[1], [0], [0], [1], [0, 0, 1, 1], [], []>} : vector<8x8xbf16>, vector<8x8xbf16>, vector<8x8xf32> -> vector<8x8xf32>
    %97 = vector.extract_strided_slice %49 {offsets = [0, 16], sizes = [8, 8], strides = [1, 1]} : vector<8x32xf32> to vector<8x8xf32>
    %98 = arith.truncf %97 : vector<8x8xf32> to vector<8x8xbf16>
    %99 = vector.extract_strided_slice %50 {offsets = [0, 16], sizes = [8, 8], strides = [1, 1]} : vector<8x32xf32> to vector<8x8xf32>
    %100 = arith.truncf %99 : vector<8x8xf32> to vector<8x8xbf16>
    "tpu.trace_start"() <{level = 10 : i32, message = "qd,kd->qk"}> : () -> ()
    %cst_33 = arith.constant dense<0.000000e+00> : vector<8x8xf32>
    %101 = tpu.matmul %98, %100, %cst_33 {dimension_numbers = #tpu.dot_dimension_numbers<[1], [1], [0], [0], [0, 0, 1, 0], [], []>} : vector<8x8xbf16>, vector<8x8xbf16>, vector<8x8xf32> -> vector<8x8xf32>
    "tpu.trace_stop"() : () -> ()
    %cst_34 = arith.constant 0.353553385 : f32
    %102 = vector.broadcast %cst_34 : f32 to vector<8x8xf32>
    %103 = arith.mulf %101, %102 : vector<8x8xf32>
    %104 = vector.broadcast %36 : vector<1x8xf32> to vector<8x8xf32>
    %105 = arith.addf %103, %104 : vector<8x8xf32>
    %cst_35 = arith.constant dense<0xFF800000> : vector<8xf32>
    %106 = vector.multi_reduction <maximumf>, %105, %cst_35 [1] : vector<8x8xf32> to vector<8xf32>
    %107 = vector.shape_cast %106 : vector<8xf32> to vector<8x1xf32>
    %108 = vector.broadcast %107 : vector<8x1xf32> to vector<8x8xf32>
    %109 = arith.subf %105, %108 : vector<8x8xf32>
    %110 = math.exp %109 : vector<8x8xf32>
    %cst_36 = arith.constant dense<0.000000e+00> : vector<8xf32>
    %111 = vector.multi_reduction <add>, %110, %cst_36 [1] : vector<8x8xf32> to vector<8xf32>
    %112 = vector.shape_cast %111 : vector<8xf32> to vector<8x1xf32>
    %113 = tpu.reciprocal %112 {approx = true} : vector<8x1xf32> -> vector<8x1xf32>
    %114 = vector.broadcast %113 : vector<8x1xf32> to vector<8x8xf32>
    %115 = arith.mulf %110, %114 : vector<8x8xf32>
    %116 = arith.truncf %115 : vector<8x8xf32> to vector<8x8xbf16>
    %117 = vector.extract_strided_slice %52 {offsets = [0, 16], sizes = [8, 8], strides = [1, 1]} : vector<8x32xbf16> to vector<8x8xbf16>
    %cst_37 = arith.constant dense<0.000000e+00> : vector<8x8xf32>
    %118 = tpu.matmul %116, %117, %cst_37 {dimension_numbers = #tpu.dot_dimension_numbers<[1], [0], [0], [1], [0, 0, 1, 1], [], []>} : vector<8x8xbf16>, vector<8x8xbf16>, vector<8x8xf32> -> vector<8x8xf32>
    %119 = vector.extract_strided_slice %49 {offsets = [0, 24], sizes = [8, 8], strides = [1, 1]} : vector<8x32xf32> to vector<8x8xf32>
    %120 = arith.truncf %119 : vector<8x8xf32> to vector<8x8xbf16>
    %121 = vector.extract_strided_slice %50 {offsets = [0, 24], sizes = [8, 8], strides = [1, 1]} : vector<8x32xf32> to vector<8x8xf32>
    %122 = arith.truncf %121 : vector<8x8xf32> to vector<8x8xbf16>
    "tpu.trace_start"() <{level = 10 : i32, message = "qd,kd->qk"}> : () -> ()
    %cst_38 = arith.constant dense<0.000000e+00> : vector<8x8xf32>
    %123 = tpu.matmul %120, %122, %cst_38 {dimension_numbers = #tpu.dot_dimension_numbers<[1], [1], [0], [0], [0, 0, 1, 0], [], []>} : vector<8x8xbf16>, vector<8x8xbf16>, vector<8x8xf32> -> vector<8x8xf32>
    "tpu.trace_stop"() : () -> ()
    %cst_39 = arith.constant 0.353553385 : f32
    %124 = vector.broadcast %cst_39 : f32 to vector<8x8xf32>
    %125 = arith.mulf %123, %124 : vector<8x8xf32>
    %126 = vector.broadcast %36 : vector<1x8xf32> to vector<8x8xf32>
    %127 = arith.addf %125, %126 : vector<8x8xf32>
    %cst_40 = arith.constant dense<0xFF800000> : vector<8xf32>
    %128 = vector.multi_reduction <maximumf>, %127, %cst_40 [1] : vector<8x8xf32> to vector<8xf32>
    %129 = vector.shape_cast %128 : vector<8xf32> to vector<8x1xf32>
    %130 = vector.broadcast %129 : vector<8x1xf32> to vector<8x8xf32>
    %131 = arith.subf %127, %130 : vector<8x8xf32>
    %132 = math.exp %131 : vector<8x8xf32>
    %cst_41 = arith.constant dense<0.000000e+00> : vector<8xf32>
    %133 = vector.multi_reduction <add>, %132, %cst_41 [1] : vector<8x8xf32> to vector<8xf32>
    %134 = vector.shape_cast %133 : vector<8xf32> to vector<8x1xf32>
    %135 = tpu.reciprocal %134 {approx = true} : vector<8x1xf32> -> vector<8x1xf32>
    %136 = vector.broadcast %135 : vector<8x1xf32> to vector<8x8xf32>
    %137 = arith.mulf %132, %136 : vector<8x8xf32>
    %138 = arith.truncf %137 : vector<8x8xf32> to vector<8x8xbf16>
    %139 = vector.extract_strided_slice %52 {offsets = [0, 24], sizes = [8, 8], strides = [1, 1]} : vector<8x32xbf16> to vector<8x8xbf16>
    %cst_42 = arith.constant dense<0.000000e+00> : vector<8x8xf32>
    %140 = tpu.matmul %138, %139, %cst_42 {dimension_numbers = #tpu.dot_dimension_numbers<[1], [0], [0], [1], [0, 0, 1, 1], [], []>} : vector<8x8xbf16>, vector<8x8xbf16>, vector<8x8xf32> -> vector<8x8xf32>
    %141 = tpu.concatenate %74, %96, %118, %140 in 1 : vector<8x8xf32>, vector<8x8xf32>, vector<8x8xf32>, vector<8x8xf32> -> vector<8x32xf32>
    %142 = vector.extract_strided_slice %46 {offsets = [8, 0], sizes = [8, 32], strides = [1, 1]} : vector<16x32xf32> to vector<8x32xf32>
    %143 = vector.extract_strided_slice %47 {offsets = [8, 0], sizes = [8, 32], strides = [1, 1]} : vector<16x32xf32> to vector<8x32xf32>
    %144 = vector.extract_strided_slice %48 {offsets = [8, 0], sizes = [8, 32], strides = [1, 1]} : vector<16x32xf32> to vector<8x32xf32>
    %145 = arith.truncf %144 : vector<8x32xf32> to vector<8x32xbf16>
    %146 = vector.extract_strided_slice %142 {offsets = [0, 0], sizes = [8, 8], strides = [1, 1]} : vector<8x32xf32> to vector<8x8xf32>
    %147 = arith.truncf %146 : vector<8x8xf32> to vector<8x8xbf16>
    %148 = vector.extract_strided_slice %143 {offsets = [0, 0], sizes = [8, 8], strides = [1, 1]} : vector<8x32xf32> to vector<8x8xf32>
    %149 = arith.truncf %148 : vector<8x8xf32> to vector<8x8xbf16>
    "tpu.trace_start"() <{level = 10 : i32, message = "qd,kd->qk"}> : () -> ()
    %cst_43 = arith.constant dense<0.000000e+00> : vector<8x8xf32>
    %150 = tpu.matmul %147, %149, %cst_43 {dimension_numbers = #tpu.dot_dimension_numbers<[1], [1], [0], [0], [0, 0, 1, 0], [], []>} : vector<8x8xbf16>, vector<8x8xbf16>, vector<8x8xf32> -> vector<8x8xf32>
    "tpu.trace_stop"() : () -> ()
    %cst_44 = arith.constant 0.353553385 : f32
    %151 = vector.broadcast %cst_44 : f32 to vector<8x8xf32>
    %152 = arith.mulf %150, %151 : vector<8x8xf32>
    %153 = vector.broadcast %37 : vector<1x8xf32> to vector<8x8xf32>
    %154 = arith.addf %152, %153 : vector<8x8xf32>
    %cst_45 = arith.constant dense<0xFF800000> : vector<8xf32>
    %155 = vector.multi_reduction <maximumf>, %154, %cst_45 [1] : vector<8x8xf32> to vector<8xf32>
    %156 = vector.shape_cast %155 : vector<8xf32> to vector<8x1xf32>
    %157 = vector.broadcast %156 : vector<8x1xf32> to vector<8x8xf32>
    %158 = arith.subf %154, %157 : vector<8x8xf32>
    %159 = math.exp %158 : vector<8x8xf32>
    %cst_46 = arith.constant dense<0.000000e+00> : vector<8xf32>
    %160 = vector.multi_reduction <add>, %159, %cst_46 [1] : vector<8x8xf32> to vector<8xf32>
    %161 = vector.shape_cast %160 : vector<8xf32> to vector<8x1xf32>
    %162 = tpu.reciprocal %161 {approx = true} : vector<8x1xf32> -> vector<8x1xf32>
    %163 = vector.broadcast %162 : vector<8x1xf32> to vector<8x8xf32>
    %164 = arith.mulf %159, %163 : vector<8x8xf32>
    %165 = arith.truncf %164 : vector<8x8xf32> to vector<8x8xbf16>
    %166 = vector.extract_strided_slice %145 {offsets = [0, 0], sizes = [8, 8], strides = [1, 1]} : vector<8x32xbf16> to vector<8x8xbf16>
    %cst_47 = arith.constant dense<0.000000e+00> : vector<8x8xf32>
    %167 = tpu.matmul %165, %166, %cst_47 {dimension_numbers = #tpu.dot_dimension_numbers<[1], [0], [0], [1], [0, 0, 1, 1], [], []>} : vector<8x8xbf16>, vector<8x8xbf16>, vector<8x8xf32> -> vector<8x8xf32>
    %168 = vector.extract_strided_slice %142 {offsets = [0, 8], sizes = [8, 8], strides = [1, 1]} : vector<8x32xf32> to vector<8x8xf32>
    %169 = arith.truncf %168 : vector<8x8xf32> to vector<8x8xbf16>
    %170 = vector.extract_strided_slice %143 {offsets = [0, 8], sizes = [8, 8], strides = [1, 1]} : vector<8x32xf32> to vector<8x8xf32>
    %171 = arith.truncf %170 : vector<8x8xf32> to vector<8x8xbf16>
    "tpu.trace_start"() <{level = 10 : i32, message = "qd,kd->qk"}> : () -> ()
    %cst_48 = arith.constant dense<0.000000e+00> : vector<8x8xf32>
    %172 = tpu.matmul %169, %171, %cst_48 {dimension_numbers = #tpu.dot_dimension_numbers<[1], [1], [0], [0], [0, 0, 1, 0], [], []>} : vector<8x8xbf16>, vector<8x8xbf16>, vector<8x8xf32> -> vector<8x8xf32>
    "tpu.trace_stop"() : () -> ()
    %cst_49 = arith.constant 0.353553385 : f32
    %173 = vector.broadcast %cst_49 : f32 to vector<8x8xf32>
    %174 = arith.mulf %172, %173 : vector<8x8xf32>
    %175 = vector.broadcast %37 : vector<1x8xf32> to vector<8x8xf32>
    %176 = arith.addf %174, %175 : vector<8x8xf32>
    %cst_50 = arith.constant dense<0xFF800000> : vector<8xf32>
    %177 = vector.multi_reduction <maximumf>, %176, %cst_50 [1] : vector<8x8xf32> to vector<8xf32>
    %178 = vector.shape_cast %177 : vector<8xf32> to vector<8x1xf32>
    %179 = vector.broadcast %178 : vector<8x1xf32> to vector<8x8xf32>
    %180 = arith.subf %176, %179 : vector<8x8xf32>
    %181 = math.exp %180 : vector<8x8xf32>
    %cst_51 = arith.constant dense<0.000000e+00> : vector<8xf32>
    %182 = vector.multi_reduction <add>, %181, %cst_51 [1] : vector<8x8xf32> to vector<8xf32>
    %183 = vector.shape_cast %182 : vector<8xf32> to vector<8x1xf32>
    %184 = tpu.reciprocal %183 {approx = true} : vector<8x1xf32> -> vector<8x1xf32>
    %185 = vector.broadcast %184 : vector<8x1xf32> to vector<8x8xf32>
    %186 = arith.mulf %181, %185 : vector<8x8xf32>
    %187 = arith.truncf %186 : vector<8x8xf32> to vector<8x8xbf16>
    %188 = vector.extract_strided_slice %145 {offsets = [0, 8], sizes = [8, 8], strides = [1, 1]} : vector<8x32xbf16> to vector<8x8xbf16>
    %cst_52 = arith.constant dense<0.000000e+00> : vector<8x8xf32>
    %189 = tpu.matmul %187, %188, %cst_52 {dimension_numbers = #tpu.dot_dimension_numbers<[1], [0], [0], [1], [0, 0, 1, 1], [], []>} : vector<8x8xbf16>, vector<8x8xbf16>, vector<8x8xf32> -> vector<8x8xf32>
    %190 = vector.extract_strided_slice %142 {offsets = [0, 16], sizes = [8, 8], strides = [1, 1]} : vector<8x32xf32> to vector<8x8xf32>
    %191 = arith.truncf %190 : vector<8x8xf32> to vector<8x8xbf16>
    %192 = vector.extract_strided_slice %143 {offsets = [0, 16], sizes = [8, 8], strides = [1, 1]} : vector<8x32xf32> to vector<8x8xf32>
    %193 = arith.truncf %192 : vector<8x8xf32> to vector<8x8xbf16>
    "tpu.trace_start"() <{level = 10 : i32, message = "qd,kd->qk"}> : () -> ()
    %cst_53 = arith.constant dense<0.000000e+00> : vector<8x8xf32>
    %194 = tpu.matmul %191, %193, %cst_53 {dimension_numbers = #tpu.dot_dimension_numbers<[1], [1], [0], [0], [0, 0, 1, 0], [], []>} : vector<8x8xbf16>, vector<8x8xbf16>, vector<8x8xf32> -> vector<8x8xf32>
    "tpu.trace_stop"() : () -> ()
    %cst_54 = arith.constant 0.353553385 : f32
    %195 = vector.broadcast %cst_54 : f32 to vector<8x8xf32>
    %196 = arith.mulf %194, %195 : vector<8x8xf32>
    %197 = vector.broadcast %37 : vector<1x8xf32> to vector<8x8xf32>
    %198 = arith.addf %196, %197 : vector<8x8xf32>
    %cst_55 = arith.constant dense<0xFF800000> : vector<8xf32>
    %199 = vector.multi_reduction <maximumf>, %198, %cst_55 [1] : vector<8x8xf32> to vector<8xf32>
    %200 = vector.shape_cast %199 : vector<8xf32> to vector<8x1xf32>
    %201 = vector.broadcast %200 : vector<8x1xf32> to vector<8x8xf32>
    %202 = arith.subf %198, %201 : vector<8x8xf32>
    %203 = math.exp %202 : vector<8x8xf32>
    %cst_56 = arith.constant dense<0.000000e+00> : vector<8xf32>
    %204 = vector.multi_reduction <add>, %203, %cst_56 [1] : vector<8x8xf32> to vector<8xf32>
    %205 = vector.shape_cast %204 : vector<8xf32> to vector<8x1xf32>
    %206 = tpu.reciprocal %205 {approx = true} : vector<8x1xf32> -> vector<8x1xf32>
    %207 = vector.broadcast %206 : vector<8x1xf32> to vector<8x8xf32>
    %208 = arith.mulf %203, %207 : vector<8x8xf32>
    %209 = arith.truncf %208 : vector<8x8xf32> to vector<8x8xbf16>
    %210 = vector.extract_strided_slice %145 {offsets = [0, 16], sizes = [8, 8], strides = [1, 1]} : vector<8x32xbf16> to vector<8x8xbf16>
    %cst_57 = arith.constant dense<0.000000e+00> : vector<8x8xf32>
    %211 = tpu.matmul %209, %210, %cst_57 {dimension_numbers = #tpu.dot_dimension_numbers<[1], [0], [0], [1], [0, 0, 1, 1], [], []>} : vector<8x8xbf16>, vector<8x8xbf16>, vector<8x8xf32> -> vector<8x8xf32>
    %212 = vector.extract_strided_slice %142 {offsets = [0, 24], sizes = [8, 8], strides = [1, 1]} : vector<8x32xf32> to vector<8x8xf32>
    %213 = arith.truncf %212 : vector<8x8xf32> to vector<8x8xbf16>
    %214 = vector.extract_strided_slice %143 {offsets = [0, 24], sizes = [8, 8], strides = [1, 1]} : vector<8x32xf32> to vector<8x8xf32>
    %215 = arith.truncf %214 : vector<8x8xf32> to vector<8x8xbf16>
    "tpu.trace_start"() <{level = 10 : i32, message = "qd,kd->qk"}> : () -> ()
    %cst_58 = arith.constant dense<0.000000e+00> : vector<8x8xf32>
    %216 = tpu.matmul %213, %215, %cst_58 {dimension_numbers = #tpu.dot_dimension_numbers<[1], [1], [0], [0], [0, 0, 1, 0], [], []>} : vector<8x8xbf16>, vector<8x8xbf16>, vector<8x8xf32> -> vector<8x8xf32>
    "tpu.trace_stop"() : () -> ()
    %cst_59 = arith.constant 0.353553385 : f32
    %217 = vector.broadcast %cst_59 : f32 to vector<8x8xf32>
    %218 = arith.mulf %216, %217 : vector<8x8xf32>
    %219 = vector.broadcast %37 : vector<1x8xf32> to vector<8x8xf32>
    %220 = arith.addf %218, %219 : vector<8x8xf32>
    %cst_60 = arith.constant dense<0xFF800000> : vector<8xf32>
    %221 = vector.multi_reduction <maximumf>, %220, %cst_60 [1] : vector<8x8xf32> to vector<8xf32>
    %222 = vector.shape_cast %221 : vector<8xf32> to vector<8x1xf32>
    %223 = vector.broadcast %222 : vector<8x1xf32> to vector<8x8xf32>
    %224 = arith.subf %220, %223 : vector<8x8xf32>
    %225 = math.exp %224 : vector<8x8xf32>
    %cst_61 = arith.constant dense<0.000000e+00> : vector<8xf32>
    %226 = vector.multi_reduction <add>, %225, %cst_61 [1] : vector<8x8xf32> to vector<8xf32>
    %227 = vector.shape_cast %226 : vector<8xf32> to vector<8x1xf32>
    %228 = tpu.reciprocal %227 {approx = true} : vector<8x1xf32> -> vector<8x1xf32>
    %229 = vector.broadcast %228 : vector<8x1xf32> to vector<8x8xf32>
    %230 = arith.mulf %225, %229 : vector<8x8xf32>
    %231 = arith.truncf %230 : vector<8x8xf32> to vector<8x8xbf16>
    %232 = vector.extract_strided_slice %145 {offsets = [0, 24], sizes = [8, 8], strides = [1, 1]} : vector<8x32xbf16> to vector<8x8xbf16>
    %cst_62 = arith.constant dense<0.000000e+00> : vector<8x8xf32>
    %233 = tpu.matmul %231, %232, %cst_62 {dimension_numbers = #tpu.dot_dimension_numbers<[1], [0], [0], [1], [0, 0, 1, 1], [], []>} : vector<8x8xbf16>, vector<8x8xbf16>, vector<8x8xf32> -> vector<8x8xf32>
    %234 = tpu.concatenate %167, %189, %211, %233 in 1 : vector<8x8xf32>, vector<8x8xf32>, vector<8x8xf32>, vector<8x8xf32> -> vector<8x32xf32>
    %235 = tpu.concatenate %141, %234 in 0 : vector<8x32xf32>, vector<8x32xf32> -> vector<16x32xf32>
    %236 = arith.truncf %235 : vector<16x32xf32> to vector<16x32xbf16>
    %c0_63 = arith.constant 0 : index
    %c0_64 = arith.constant 0 : index
    %c0_65 = arith.constant 0 : index
    %237 = vector.load %arg8[%c0_63, %c0_64, %c0_65] : memref<2x32x32xbf16, #tpu.memory_space<vmem>>, vector<1x32x32xbf16>
    %238 = vector.shape_cast %237 : vector<1x32x32xbf16> to vector<32x32xbf16>
    %cst_66 = arith.constant dense<0.000000e+00> : vector<16x32xf32>
    %239 = tpu.matmul %236, %238, %cst_66 {dimension_numbers = #tpu.dot_dimension_numbers<[1], [0], [0], [1], [0, 0, 1, 1], [], []>} : vector<16x32xbf16>, vector<32x32xbf16>, vector<16x32xf32> -> vector<16x32xf32>
    %c0_67 = arith.constant 0 : index
    %c0_68 = arith.constant 0 : index
    %c0_69 = arith.constant 0 : index
    %240 = vector.load %arg9[%c0_67, %c0_68, %c0_69] : memref<2x1x32xf32, #tpu.memory_space<vmem>>, vector<1x1x32xf32>
    %241 = vector.shape_cast %240 : vector<1x1x32xf32> to vector<1x32xf32>
    %242 = vector.broadcast %241 : vector<1x32xf32> to vector<16x32xf32>
    %243 = arith.addf %239, %242 : vector<16x32xf32>
    %244 = arith.addf %34, %243 : vector<16x32xf32>
    %c0_70 = arith.constant 0 : index
    %c0_71 = arith.constant 0 : index
    %c0_72 = arith.constant 0 : index
    %245 = vector.load %arg10[%c0_70, %c0_71, %c0_72] : memref<2x1x32xf32, #tpu.memory_space<vmem>>, vector<1x1x32xf32>
    %246 = vector.shape_cast %245 : vector<1x1x32xf32> to vector<1x32xf32>
    %c0_73 = arith.constant 0 : index
    %c0_74 = arith.constant 0 : index
    %c0_75 = arith.constant 0 : index
    %247 = vector.load %arg11[%c0_73, %c0_74, %c0_75] : memref<2x1x32xf32, #tpu.memory_space<vmem>>, vector<1x1x32xf32>
    %248 = vector.shape_cast %247 : vector<1x1x32xf32> to vector<1x32xf32>
    %cst_76 = arith.constant dense<0.000000e+00> : vector<16xf32>
    %249 = vector.multi_reduction <add>, %244, %cst_76 [1] : vector<16x32xf32> to vector<16xf32>
    %250 = vector.shape_cast %249 : vector<16xf32> to vector<16x1xf32>
    %cst_77 = arith.constant 3.200000e+01 : f32
    %251 = vector.broadcast %cst_77 : f32 to vector<16x1xf32>
    %252 = arith.divf %250, %251 : vector<16x1xf32>
    %253 = vector.broadcast %252 : vector<16x1xf32> to vector<16x32xf32>
    %254 = arith.subf %244, %253 : vector<16x32xf32>
    %255 = arith.mulf %254, %254 : vector<16x32xf32>
    %cst_78 = arith.constant dense<0.000000e+00> : vector<16xf32>
    %256 = vector.multi_reduction <add>, %255, %cst_78 [1] : vector<16x32xf32> to vector<16xf32>
    %257 = vector.shape_cast %256 : vector<16xf32> to vector<16x1xf32>
    %cst_79 = arith.constant 3.200000e+01 : f32
    %258 = vector.broadcast %cst_79 : f32 to vector<16x1xf32>
    %259 = arith.divf %257, %258 : vector<16x1xf32>
    %260 = vector.broadcast %252 : vector<16x1xf32> to vector<16x32xf32>
    %261 = arith.subf %244, %260 : vector<16x32xf32>
    %cst_80 = arith.constant 9.99999996E-13 : f32
    %262 = vector.broadcast %cst_80 : f32 to vector<16x1xf32>
    %263 = arith.addf %259, %262 : vector<16x1xf32>
    %264 = math.rsqrt %263 : vector<16x1xf32>
    %265 = vector.broadcast %264 : vector<16x1xf32> to vector<16x32xf32>
    %266 = arith.mulf %261, %265 : vector<16x32xf32>
    %267 = vector.broadcast %246 : vector<1x32xf32> to vector<16x32xf32>
    %268 = arith.mulf %266, %267 : vector<16x32xf32>
    %269 = vector.broadcast %248 : vector<1x32xf32> to vector<16x32xf32>
    %270 = arith.addf %268, %269 : vector<16x32xf32>
    %271 = arith.truncf %270 : vector<16x32xf32> to vector<16x32xbf16>
    %c0_81 = arith.constant 0 : index
    %c0_82 = arith.constant 0 : index
    %c0_83 = arith.constant 0 : index
    %272 = vector.load %arg12[%c0_81, %c0_82, %c0_83] : memref<2x32x64xbf16, #tpu.memory_space<vmem>>, vector<1x32x64xbf16>
    %273 = vector.shape_cast %272 : vector<1x32x64xbf16> to vector<32x64xbf16>
    %cst_84 = arith.constant dense<0.000000e+00> : vector<16x64xf32>
    %274 = tpu.matmul %271, %273, %cst_84 {dimension_numbers = #tpu.dot_dimension_numbers<[1], [0], [0], [1], [0, 0, 1, 1], [], []>} : vector<16x32xbf16>, vector<32x64xbf16>, vector<16x64xf32> -> vector<16x64xf32>
    %c0_85 = arith.constant 0 : index
    %c0_86 = arith.constant 0 : index
    %c0_87 = arith.constant 0 : index
    %275 = vector.load %arg13[%c0_85, %c0_86, %c0_87] : memref<2x1x64xf32, #tpu.memory_space<vmem>>, vector<1x1x64xf32>
    %276 = vector.shape_cast %275 : vector<1x1x64xf32> to vector<1x64xf32>
    %277 = vector.broadcast %276 : vector<1x64xf32> to vector<16x64xf32>
    %278 = arith.addf %274, %277 : vector<16x64xf32>
    %cst_88 = arith.constant 5.000000e-01 : f32
    %279 = vector.broadcast %cst_88 : f32 to vector<16x64xf32>
    %280 = arith.mulf %279, %278 : vector<16x64xf32>
    %cst_89 = arith.constant 4.471500e-02 : f32
    %281 = vector.broadcast %cst_89 : f32 to vector<16x64xf32>
    %282 = arith.mulf %281, %278 : vector<16x64xf32>
    %283 = arith.mulf %282, %278 : vector<16x64xf32>
    %284 = arith.mulf %283, %278 : vector<16x64xf32>
    %285 = arith.addf %278, %284 : vector<16x64xf32>
    %cst_90 = arith.constant 0.797884583 : f32
    %286 = vector.broadcast %cst_90 : f32 to vector<16x64xf32>
    %287 = arith.mulf %286, %285 : vector<16x64xf32>
    %288 = math.tanh %287 : vector<16x64xf32>
    %cst_91 = arith.constant 1.000000e+00 : f32
    %289 = vector.broadcast %cst_91 : f32 to vector<16x64xf32>
    %290 = arith.addf %289, %288 : vector<16x64xf32>
    %291 = arith.mulf %280, %290 : vector<16x64xf32>
    %292 = arith.truncf %291 : vector<16x64xf32> to vector<16x64xbf16>
    %c0_92 = arith.constant 0 : index
    %c0_93 = arith.constant 0 : index
    %c0_94 = arith.constant 0 : index
    %293 = vector.load %arg14[%c0_92, %c0_93, %c0_94] : memref<2x64x32xbf16, #tpu.memory_space<vmem>>, vector<1x64x32xbf16>
    %294 = vector.shape_cast %293 : vector<1x64x32xbf16> to vector<64x32xbf16>
    %cst_95 = arith.constant dense<0.000000e+00> : vector<16x32xf32>
    %295 = tpu.matmul %292, %294, %cst_95 {dimension_numbers = #tpu.dot_dimension_numbers<[1], [0], [0], [1], [0, 0, 1, 1], [], []>} : vector<16x64xbf16>, vector<64x32xbf16>, vector<16x32xf32> -> vector<16x32xf32>
    %c0_96 = arith.constant 0 : index
    %c0_97 = arith.constant 0 : index
    %c0_98 = arith.constant 0 : index
    %296 = vector.load %arg15[%c0_96, %c0_97, %c0_98] : memref<2x1x32xf32, #tpu.memory_space<vmem>>, vector<1x1x32xf32>
    %297 = vector.shape_cast %296 : vector<1x1x32xf32> to vector<1x32xf32>
    %298 = vector.broadcast %297 : vector<1x32xf32> to vector<16x32xf32>
    %299 = arith.addf %295, %298 : vector<16x32xf32>
    %300 = arith.addf %270, %299 : vector<16x32xf32>
    %c0_99 = arith.constant 0 : index
    %c0_100 = arith.constant 0 : index
    %c0_101 = arith.constant 0 : index
    %301 = vector.load %arg16[%c0_99, %c0_100, %c0_101] : memref<2x1x32xf32, #tpu.memory_space<vmem>>, vector<1x1x32xf32>
    %302 = vector.shape_cast %301 : vector<1x1x32xf32> to vector<1x32xf32>
    %c0_102 = arith.constant 0 : index
    %c0_103 = arith.constant 0 : index
    %c0_104 = arith.constant 0 : index
    %303 = vector.load %arg17[%c0_102, %c0_103, %c0_104] : memref<2x1x32xf32, #tpu.memory_space<vmem>>, vector<1x1x32xf32>
    %304 = vector.shape_cast %303 : vector<1x1x32xf32> to vector<1x32xf32>
    %cst_105 = arith.constant dense<0.000000e+00> : vector<16xf32>
    %305 = vector.multi_reduction <add>, %300, %cst_105 [1] : vector<16x32xf32> to vector<16xf32>
    %306 = vector.shape_cast %305 : vector<16xf32> to vector<16x1xf32>
    %cst_106 = arith.constant 3.200000e+01 : f32
    %307 = vector.broadcast %cst_106 : f32 to vector<16x1xf32>
    %308 = arith.divf %306, %307 : vector<16x1xf32>
    %309 = vector.broadcast %308 : vector<16x1xf32> to vector<16x32xf32>
    %310 = arith.subf %300, %309 : vector<16x32xf32>
    %311 = arith.mulf %310, %310 : vector<16x32xf32>
    %cst_107 = arith.constant dense<0.000000e+00> : vector<16xf32>
    %312 = vector.multi_reduction <add>, %311, %cst_107 [1] : vector<16x32xf32> to vector<16xf32>
    %313 = vector.shape_cast %312 : vector<16xf32> to vector<16x1xf32>
    %cst_108 = arith.constant 3.200000e+01 : f32
    %314 = vector.broadcast %cst_108 : f32 to vector<16x1xf32>
    %315 = arith.divf %313, %314 : vector<16x1xf32>
    %316 = vector.broadcast %308 : vector<16x1xf32> to vector<16x32xf32>
    %317 = arith.subf %300, %316 : vector<16x32xf32>
    %cst_109 = arith.constant 9.99999996E-13 : f32
    %318 = vector.broadcast %cst_109 : f32 to vector<16x1xf32>
    %319 = arith.addf %315, %318 : vector<16x1xf32>
    %320 = math.rsqrt %319 : vector<16x1xf32>
    %321 = vector.broadcast %320 : vector<16x1xf32> to vector<16x32xf32>
    %322 = arith.mulf %317, %321 : vector<16x32xf32>
    %323 = vector.broadcast %302 : vector<1x32xf32> to vector<16x32xf32>
    %324 = arith.mulf %322, %323 : vector<16x32xf32>
    %325 = vector.broadcast %304 : vector<1x32xf32> to vector<16x32xf32>
    %326 = arith.addf %324, %325 : vector<16x32xf32>
    %327 = arith.truncf %326 : vector<16x32xf32> to vector<16x32xbf16>
    %c1 = arith.constant 1 : index
    %c0_110 = arith.constant 0 : index
    %c0_111 = arith.constant 0 : index
    %328 = vector.load %arg6[%c1, %c0_110, %c0_111] : memref<2x32x96xbf16, #tpu.memory_space<vmem>>, vector<1x32x96xbf16>
    %329 = vector.shape_cast %328 : vector<1x32x96xbf16> to vector<32x96xbf16>
    %cst_112 = arith.constant dense<0.000000e+00> : vector<16x96xf32>
    %330 = tpu.matmul %327, %329, %cst_112 {dimension_numbers = #tpu.dot_dimension_numbers<[1], [0], [0], [1], [0, 0, 1, 1], [], []>} : vector<16x32xbf16>, vector<32x96xbf16>, vector<16x96xf32> -> vector<16x96xf32>
    %c1_113 = arith.constant 1 : index
    %c0_114 = arith.constant 0 : index
    %c0_115 = arith.constant 0 : index
    %331 = vector.load %arg7[%c1_113, %c0_114, %c0_115] : memref<2x1x96xf32, #tpu.memory_space<vmem>>, vector<1x1x96xf32>
    %332 = vector.shape_cast %331 : vector<1x1x96xf32> to vector<1x96xf32>
    %333 = vector.broadcast %332 : vector<1x96xf32> to vector<16x96xf32>
    %334 = arith.addf %330, %333 : vector<16x96xf32>
    %335 = vector.extract_strided_slice %334 {offsets = [0, 0], sizes = [16, 32], strides = [1, 1]} : vector<16x96xf32> to vector<16x32xf32>
    %336 = vector.extract_strided_slice %334 {offsets = [0, 32], sizes = [16, 32], strides = [1, 1]} : vector<16x96xf32> to vector<16x32xf32>
    %337 = vector.extract_strided_slice %334 {offsets = [0, 64], sizes = [16, 32], strides = [1, 1]} : vector<16x96xf32> to vector<16x32xf32>
    %338 = vector.extract_strided_slice %335 {offsets = [0, 0], sizes = [8, 32], strides = [1, 1]} : vector<16x32xf32> to vector<8x32xf32>
    %339 = vector.extract_strided_slice %336 {offsets = [0, 0], sizes = [8, 32], strides = [1, 1]} : vector<16x32xf32> to vector<8x32xf32>
    %340 = vector.extract_strided_slice %337 {offsets = [0, 0], sizes = [8, 32], strides = [1, 1]} : vector<16x32xf32> to vector<8x32xf32>
    %341 = arith.truncf %340 : vector<8x32xf32> to vector<8x32xbf16>
    %342 = vector.extract_strided_slice %338 {offsets = [0, 0], sizes = [8, 8], strides = [1, 1]} : vector<8x32xf32> to vector<8x8xf32>
    %343 = arith.truncf %342 : vector<8x8xf32> to vector<8x8xbf16>
    %344 = vector.extract_strided_slice %339 {offsets = [0, 0], sizes = [8, 8], strides = [1, 1]} : vector<8x32xf32> to vector<8x8xf32>
    %345 = arith.truncf %344 : vector<8x8xf32> to vector<8x8xbf16>
    "tpu.trace_start"() <{level = 10 : i32, message = "qd,kd->qk"}> : () -> ()
    %cst_116 = arith.constant dense<0.000000e+00> : vector<8x8xf32>
    %346 = tpu.matmul %343, %345, %cst_116 {dimension_numbers = #tpu.dot_dimension_numbers<[1], [1], [0], [0], [0, 0, 1, 0], [], []>} : vector<8x8xbf16>, vector<8x8xbf16>, vector<8x8xf32> -> vector<8x8xf32>
    "tpu.trace_stop"() : () -> ()
    %cst_117 = arith.constant 0.353553385 : f32
    %347 = vector.broadcast %cst_117 : f32 to vector<8x8xf32>
    %348 = arith.mulf %346, %347 : vector<8x8xf32>
    %349 = vector.broadcast %36 : vector<1x8xf32> to vector<8x8xf32>
    %350 = arith.addf %348, %349 : vector<8x8xf32>
    %cst_118 = arith.constant dense<0xFF800000> : vector<8xf32>
    %351 = vector.multi_reduction <maximumf>, %350, %cst_118 [1] : vector<8x8xf32> to vector<8xf32>
    %352 = vector.shape_cast %351 : vector<8xf32> to vector<8x1xf32>
    %353 = vector.broadcast %352 : vector<8x1xf32> to vector<8x8xf32>
    %354 = arith.subf %350, %353 : vector<8x8xf32>
    %355 = math.exp %354 : vector<8x8xf32>
    %cst_119 = arith.constant dense<0.000000e+00> : vector<8xf32>
    %356 = vector.multi_reduction <add>, %355, %cst_119 [1] : vector<8x8xf32> to vector<8xf32>
    %357 = vector.shape_cast %356 : vector<8xf32> to vector<8x1xf32>
    %358 = tpu.reciprocal %357 {approx = true} : vector<8x1xf32> -> vector<8x1xf32>
    %359 = vector.broadcast %358 : vector<8x1xf32> to vector<8x8xf32>
    %360 = arith.mulf %355, %359 : vector<8x8xf32>
    %361 = arith.truncf %360 : vector<8x8xf32> to vector<8x8xbf16>
    %362 = vector.extract_strided_slice %341 {offsets = [0, 0], sizes = [8, 8], strides = [1, 1]} : vector<8x32xbf16> to vector<8x8xbf16>
    %cst_120 = arith.constant dense<0.000000e+00> : vector<8x8xf32>
    %363 = tpu.matmul %361, %362, %cst_120 {dimension_numbers = #tpu.dot_dimension_numbers<[1], [0], [0], [1], [0, 0, 1, 1], [], []>} : vector<8x8xbf16>, vector<8x8xbf16>, vector<8x8xf32> -> vector<8x8xf32>
    %364 = vector.extract_strided_slice %338 {offsets = [0, 8], sizes = [8, 8], strides = [1, 1]} : vector<8x32xf32> to vector<8x8xf32>
    %365 = arith.truncf %364 : vector<8x8xf32> to vector<8x8xbf16>
    %366 = vector.extract_strided_slice %339 {offsets = [0, 8], sizes = [8, 8], strides = [1, 1]} : vector<8x32xf32> to vector<8x8xf32>
    %367 = arith.truncf %366 : vector<8x8xf32> to vector<8x8xbf16>
    "tpu.trace_start"() <{level = 10 : i32, message = "qd,kd->qk"}> : () -> ()
    %cst_121 = arith.constant dense<0.000000e+00> : vector<8x8xf32>
    %368 = tpu.matmul %365, %367, %cst_121 {dimension_numbers = #tpu.dot_dimension_numbers<[1], [1], [0], [0], [0, 0, 1, 0], [], []>} : vector<8x8xbf16>, vector<8x8xbf16>, vector<8x8xf32> -> vector<8x8xf32>
    "tpu.trace_stop"() : () -> ()
    %cst_122 = arith.constant 0.353553385 : f32
    %369 = vector.broadcast %cst_122 : f32 to vector<8x8xf32>
    %370 = arith.mulf %368, %369 : vector<8x8xf32>
    %371 = vector.broadcast %36 : vector<1x8xf32> to vector<8x8xf32>
    %372 = arith.addf %370, %371 : vector<8x8xf32>
    %cst_123 = arith.constant dense<0xFF800000> : vector<8xf32>
    %373 = vector.multi_reduction <maximumf>, %372, %cst_123 [1] : vector<8x8xf32> to vector<8xf32>
    %374 = vector.shape_cast %373 : vector<8xf32> to vector<8x1xf32>
    %375 = vector.broadcast %374 : vector<8x1xf32> to vector<8x8xf32>
    %376 = arith.subf %372, %375 : vector<8x8xf32>
    %377 = math.exp %376 : vector<8x8xf32>
    %cst_124 = arith.constant dense<0.000000e+00> : vector<8xf32>
    %378 = vector.multi_reduction <add>, %377, %cst_124 [1] : vector<8x8xf32> to vector<8xf32>
    %379 = vector.shape_cast %378 : vector<8xf32> to vector<8x1xf32>
    %380 = tpu.reciprocal %379 {approx = true} : vector<8x1xf32> -> vector<8x1xf32>
    %381 = vector.broadcast %380 : vector<8x1xf32> to vector<8x8xf32>
    %382 = arith.mulf %377, %381 : vector<8x8xf32>
    %383 = arith.truncf %382 : vector<8x8xf32> to vector<8x8xbf16>
    %384 = vector.extract_strided_slice %341 {offsets = [0, 8], sizes = [8, 8], strides = [1, 1]} : vector<8x32xbf16> to vector<8x8xbf16>
    %cst_125 = arith.constant dense<0.000000e+00> : vector<8x8xf32>
    %385 = tpu.matmul %383, %384, %cst_125 {dimension_numbers = #tpu.dot_dimension_numbers<[1], [0], [0], [1], [0, 0, 1, 1], [], []>} : vector<8x8xbf16>, vector<8x8xbf16>, vector<8x8xf32> -> vector<8x8xf32>
    %386 = vector.extract_strided_slice %338 {offsets = [0, 16], sizes = [8, 8], strides = [1, 1]} : vector<8x32xf32> to vector<8x8xf32>
    %387 = arith.truncf %386 : vector<8x8xf32> to vector<8x8xbf16>
    %388 = vector.extract_strided_slice %339 {offsets = [0, 16], sizes = [8, 8], strides = [1, 1]} : vector<8x32xf32> to vector<8x8xf32>
    %389 = arith.truncf %388 : vector<8x8xf32> to vector<8x8xbf16>
    "tpu.trace_start"() <{level = 10 : i32, message = "qd,kd->qk"}> : () -> ()
    %cst_126 = arith.constant dense<0.000000e+00> : vector<8x8xf32>
    %390 = tpu.matmul %387, %389, %cst_126 {dimension_numbers = #tpu.dot_dimension_numbers<[1], [1], [0], [0], [0, 0, 1, 0], [], []>} : vector<8x8xbf16>, vector<8x8xbf16>, vector<8x8xf32> -> vector<8x8xf32>
    "tpu.trace_stop"() : () -> ()
    %cst_127 = arith.constant 0.353553385 : f32
    %391 = vector.broadcast %cst_127 : f32 to vector<8x8xf32>
    %392 = arith.mulf %390, %391 : vector<8x8xf32>
    %393 = vector.broadcast %36 : vector<1x8xf32> to vector<8x8xf32>
    %394 = arith.addf %392, %393 : vector<8x8xf32>
    %cst_128 = arith.constant dense<0xFF800000> : vector<8xf32>
    %395 = vector.multi_reduction <maximumf>, %394, %cst_128 [1] : vector<8x8xf32> to vector<8xf32>
    %396 = vector.shape_cast %395 : vector<8xf32> to vector<8x1xf32>
    %397 = vector.broadcast %396 : vector<8x1xf32> to vector<8x8xf32>
    %398 = arith.subf %394, %397 : vector<8x8xf32>
    %399 = math.exp %398 : vector<8x8xf32>
    %cst_129 = arith.constant dense<0.000000e+00> : vector<8xf32>
    %400 = vector.multi_reduction <add>, %399, %cst_129 [1] : vector<8x8xf32> to vector<8xf32>
    %401 = vector.shape_cast %400 : vector<8xf32> to vector<8x1xf32>
    %402 = tpu.reciprocal %401 {approx = true} : vector<8x1xf32> -> vector<8x1xf32>
    %403 = vector.broadcast %402 : vector<8x1xf32> to vector<8x8xf32>
    %404 = arith.mulf %399, %403 : vector<8x8xf32>
    %405 = arith.truncf %404 : vector<8x8xf32> to vector<8x8xbf16>
    %406 = vector.extract_strided_slice %341 {offsets = [0, 16], sizes = [8, 8], strides = [1, 1]} : vector<8x32xbf16> to vector<8x8xbf16>
    %cst_130 = arith.constant dense<0.000000e+00> : vector<8x8xf32>
    %407 = tpu.matmul %405, %406, %cst_130 {dimension_numbers = #tpu.dot_dimension_numbers<[1], [0], [0], [1], [0, 0, 1, 1], [], []>} : vector<8x8xbf16>, vector<8x8xbf16>, vector<8x8xf32> -> vector<8x8xf32>
    %408 = vector.extract_strided_slice %338 {offsets = [0, 24], sizes = [8, 8], strides = [1, 1]} : vector<8x32xf32> to vector<8x8xf32>
    %409 = arith.truncf %408 : vector<8x8xf32> to vector<8x8xbf16>
    %410 = vector.extract_strided_slice %339 {offsets = [0, 24], sizes = [8, 8], strides = [1, 1]} : vector<8x32xf32> to vector<8x8xf32>
    %411 = arith.truncf %410 : vector<8x8xf32> to vector<8x8xbf16>
    "tpu.trace_start"() <{level = 10 : i32, message = "qd,kd->qk"}> : () -> ()
    %cst_131 = arith.constant dense<0.000000e+00> : vector<8x8xf32>
    %412 = tpu.matmul %409, %411, %cst_131 {dimension_numbers = #tpu.dot_dimension_numbers<[1], [1], [0], [0], [0, 0, 1, 0], [], []>} : vector<8x8xbf16>, vector<8x8xbf16>, vector<8x8xf32> -> vector<8x8xf32>
    "tpu.trace_stop"() : () -> ()
    %cst_132 = arith.constant 0.353553385 : f32
    %413 = vector.broadcast %cst_132 : f32 to vector<8x8xf32>
    %414 = arith.mulf %412, %413 : vector<8x8xf32>
    %415 = vector.broadcast %36 : vector<1x8xf32> to vector<8x8xf32>
    %416 = arith.addf %414, %415 : vector<8x8xf32>
    %cst_133 = arith.constant dense<0xFF800000> : vector<8xf32>
    %417 = vector.multi_reduction <maximumf>, %416, %cst_133 [1] : vector<8x8xf32> to vector<8xf32>
    %418 = vector.shape_cast %417 : vector<8xf32> to vector<8x1xf32>
    %419 = vector.broadcast %418 : vector<8x1xf32> to vector<8x8xf32>
    %420 = arith.subf %416, %419 : vector<8x8xf32>
    %421 = math.exp %420 : vector<8x8xf32>
    %cst_134 = arith.constant dense<0.000000e+00> : vector<8xf32>
    %422 = vector.multi_reduction <add>, %421, %cst_134 [1] : vector<8x8xf32> to vector<8xf32>
    %423 = vector.shape_cast %422 : vector<8xf32> to vector<8x1xf32>
    %424 = tpu.reciprocal %423 {approx = true} : vector<8x1xf32> -> vector<8x1xf32>
    %425 = vector.broadcast %424 : vector<8x1xf32> to vector<8x8xf32>
    %426 = arith.mulf %421, %425 : vector<8x8xf32>
    %427 = arith.truncf %426 : vector<8x8xf32> to vector<8x8xbf16>
    %428 = vector.extract_strided_slice %341 {offsets = [0, 24], sizes = [8, 8], strides = [1, 1]} : vector<8x32xbf16> to vector<8x8xbf16>
    %cst_135 = arith.constant dense<0.000000e+00> : vector<8x8xf32>
    %429 = tpu.matmul %427, %428, %cst_135 {dimension_numbers = #tpu.dot_dimension_numbers<[1], [0], [0], [1], [0, 0, 1, 1], [], []>} : vector<8x8xbf16>, vector<8x8xbf16>, vector<8x8xf32> -> vector<8x8xf32>
    %430 = tpu.concatenate %363, %385, %407, %429 in 1 : vector<8x8xf32>, vector<8x8xf32>, vector<8x8xf32>, vector<8x8xf32> -> vector<8x32xf32>
    %431 = vector.extract_strided_slice %335 {offsets = [8, 0], sizes = [8, 32], strides = [1, 1]} : vector<16x32xf32> to vector<8x32xf32>
    %432 = vector.extract_strided_slice %336 {offsets = [8, 0], sizes = [8, 32], strides = [1, 1]} : vector<16x32xf32> to vector<8x32xf32>
    %433 = vector.extract_strided_slice %337 {offsets = [8, 0], sizes = [8, 32], strides = [1, 1]} : vector<16x32xf32> to vector<8x32xf32>
    %434 = arith.truncf %433 : vector<8x32xf32> to vector<8x32xbf16>
    %435 = vector.extract_strided_slice %431 {offsets = [0, 0], sizes = [8, 8], strides = [1, 1]} : vector<8x32xf32> to vector<8x8xf32>
    %436 = arith.truncf %435 : vector<8x8xf32> to vector<8x8xbf16>
    %437 = vector.extract_strided_slice %432 {offsets = [0, 0], sizes = [8, 8], strides = [1, 1]} : vector<8x32xf32> to vector<8x8xf32>
    %438 = arith.truncf %437 : vector<8x8xf32> to vector<8x8xbf16>
    "tpu.trace_start"() <{level = 10 : i32, message = "qd,kd->qk"}> : () -> ()
    %cst_136 = arith.constant dense<0.000000e+00> : vector<8x8xf32>
    %439 = tpu.matmul %436, %438, %cst_136 {dimension_numbers = #tpu.dot_dimension_numbers<[1], [1], [0], [0], [0, 0, 1, 0], [], []>} : vector<8x8xbf16>, vector<8x8xbf16>, vector<8x8xf32> -> vector<8x8xf32>
    "tpu.trace_stop"() : () -> ()
    %cst_137 = arith.constant 0.353553385 : f32
    %440 = vector.broadcast %cst_137 : f32 to vector<8x8xf32>
    %441 = arith.mulf %439, %440 : vector<8x8xf32>
    %442 = vector.broadcast %37 : vector<1x8xf32> to vector<8x8xf32>
    %443 = arith.addf %441, %442 : vector<8x8xf32>
    %cst_138 = arith.constant dense<0xFF800000> : vector<8xf32>
    %444 = vector.multi_reduction <maximumf>, %443, %cst_138 [1] : vector<8x8xf32> to vector<8xf32>
    %445 = vector.shape_cast %444 : vector<8xf32> to vector<8x1xf32>
    %446 = vector.broadcast %445 : vector<8x1xf32> to vector<8x8xf32>
    %447 = arith.subf %443, %446 : vector<8x8xf32>
    %448 = math.exp %447 : vector<8x8xf32>
    %cst_139 = arith.constant dense<0.000000e+00> : vector<8xf32>
    %449 = vector.multi_reduction <add>, %448, %cst_139 [1] : vector<8x8xf32> to vector<8xf32>
    %450 = vector.shape_cast %449 : vector<8xf32> to vector<8x1xf32>
    %451 = tpu.reciprocal %450 {approx = true} : vector<8x1xf32> -> vector<8x1xf32>
    %452 = vector.broadcast %451 : vector<8x1xf32> to vector<8x8xf32>
    %453 = arith.mulf %448, %452 : vector<8x8xf32>
    %454 = arith.truncf %453 : vector<8x8xf32> to vector<8x8xbf16>
    %455 = vector.extract_strided_slice %434 {offsets = [0, 0], sizes = [8, 8], strides = [1, 1]} : vector<8x32xbf16> to vector<8x8xbf16>
    %cst_140 = arith.constant dense<0.000000e+00> : vector<8x8xf32>
    %456 = tpu.matmul %454, %455, %cst_140 {dimension_numbers = #tpu.dot_dimension_numbers<[1], [0], [0], [1], [0, 0, 1, 1], [], []>} : vector<8x8xbf16>, vector<8x8xbf16>, vector<8x8xf32> -> vector<8x8xf32>
    %457 = vector.extract_strided_slice %431 {offsets = [0, 8], sizes = [8, 8], strides = [1, 1]} : vector<8x32xf32> to vector<8x8xf32>
    %458 = arith.truncf %457 : vector<8x8xf32> to vector<8x8xbf16>
    %459 = vector.extract_strided_slice %432 {offsets = [0, 8], sizes = [8, 8], strides = [1, 1]} : vector<8x32xf32> to vector<8x8xf32>
    %460 = arith.truncf %459 : vector<8x8xf32> to vector<8x8xbf16>
    "tpu.trace_start"() <{level = 10 : i32, message = "qd,kd->qk"}> : () -> ()
    %cst_141 = arith.constant dense<0.000000e+00> : vector<8x8xf32>
    %461 = tpu.matmul %458, %460, %cst_141 {dimension_numbers = #tpu.dot_dimension_numbers<[1], [1], [0], [0], [0, 0, 1, 0], [], []>} : vector<8x8xbf16>, vector<8x8xbf16>, vector<8x8xf32> -> vector<8x8xf32>
    "tpu.trace_stop"() : () -> ()
    %cst_142 = arith.constant 0.353553385 : f32
    %462 = vector.broadcast %cst_142 : f32 to vector<8x8xf32>
    %463 = arith.mulf %461, %462 : vector<8x8xf32>
    %464 = vector.broadcast %37 : vector<1x8xf32> to vector<8x8xf32>
    %465 = arith.addf %463, %464 : vector<8x8xf32>
    %cst_143 = arith.constant dense<0xFF800000> : vector<8xf32>
    %466 = vector.multi_reduction <maximumf>, %465, %cst_143 [1] : vector<8x8xf32> to vector<8xf32>
    %467 = vector.shape_cast %466 : vector<8xf32> to vector<8x1xf32>
    %468 = vector.broadcast %467 : vector<8x1xf32> to vector<8x8xf32>
    %469 = arith.subf %465, %468 : vector<8x8xf32>
    %470 = math.exp %469 : vector<8x8xf32>
    %cst_144 = arith.constant dense<0.000000e+00> : vector<8xf32>
    %471 = vector.multi_reduction <add>, %470, %cst_144 [1] : vector<8x8xf32> to vector<8xf32>
    %472 = vector.shape_cast %471 : vector<8xf32> to vector<8x1xf32>
    %473 = tpu.reciprocal %472 {approx = true} : vector<8x1xf32> -> vector<8x1xf32>
    %474 = vector.broadcast %473 : vector<8x1xf32> to vector<8x8xf32>
    %475 = arith.mulf %470, %474 : vector<8x8xf32>
    %476 = arith.truncf %475 : vector<8x8xf32> to vector<8x8xbf16>
    %477 = vector.extract_strided_slice %434 {offsets = [0, 8], sizes = [8, 8], strides = [1, 1]} : vector<8x32xbf16> to vector<8x8xbf16>
    %cst_145 = arith.constant dense<0.000000e+00> : vector<8x8xf32>
    %478 = tpu.matmul %476, %477, %cst_145 {dimension_numbers = #tpu.dot_dimension_numbers<[1], [0], [0], [1], [0, 0, 1, 1], [], []>} : vector<8x8xbf16>, vector<8x8xbf16>, vector<8x8xf32> -> vector<8x8xf32>
    %479 = vector.extract_strided_slice %431 {offsets = [0, 16], sizes = [8, 8], strides = [1, 1]} : vector<8x32xf32> to vector<8x8xf32>
    %480 = arith.truncf %479 : vector<8x8xf32> to vector<8x8xbf16>
    %481 = vector.extract_strided_slice %432 {offsets = [0, 16], sizes = [8, 8], strides = [1, 1]} : vector<8x32xf32> to vector<8x8xf32>
    %482 = arith.truncf %481 : vector<8x8xf32> to vector<8x8xbf16>
    "tpu.trace_start"() <{level = 10 : i32, message = "qd,kd->qk"}> : () -> ()
    %cst_146 = arith.constant dense<0.000000e+00> : vector<8x8xf32>
    %483 = tpu.matmul %480, %482, %cst_146 {dimension_numbers = #tpu.dot_dimension_numbers<[1], [1], [0], [0], [0, 0, 1, 0], [], []>} : vector<8x8xbf16>, vector<8x8xbf16>, vector<8x8xf32> -> vector<8x8xf32>
    "tpu.trace_stop"() : () -> ()
    %cst_147 = arith.constant 0.353553385 : f32
    %484 = vector.broadcast %cst_147 : f32 to vector<8x8xf32>
    %485 = arith.mulf %483, %484 : vector<8x8xf32>
    %486 = vector.broadcast %37 : vector<1x8xf32> to vector<8x8xf32>
    %487 = arith.addf %485, %486 : vector<8x8xf32>
    %cst_148 = arith.constant dense<0xFF800000> : vector<8xf32>
    %488 = vector.multi_reduction <maximumf>, %487, %cst_148 [1] : vector<8x8xf32> to vector<8xf32>
    %489 = vector.shape_cast %488 : vector<8xf32> to vector<8x1xf32>
    %490 = vector.broadcast %489 : vector<8x1xf32> to vector<8x8xf32>
    %491 = arith.subf %487, %490 : vector<8x8xf32>
    %492 = math.exp %491 : vector<8x8xf32>
    %cst_149 = arith.constant dense<0.000000e+00> : vector<8xf32>
    %493 = vector.multi_reduction <add>, %492, %cst_149 [1] : vector<8x8xf32> to vector<8xf32>
    %494 = vector.shape_cast %493 : vector<8xf32> to vector<8x1xf32>
    %495 = tpu.reciprocal %494 {approx = true} : vector<8x1xf32> -> vector<8x1xf32>
    %496 = vector.broadcast %495 : vector<8x1xf32> to vector<8x8xf32>
    %497 = arith.mulf %492, %496 : vector<8x8xf32>
    %498 = arith.truncf %497 : vector<8x8xf32> to vector<8x8xbf16>
    %499 = vector.extract_strided_slice %434 {offsets = [0, 16], sizes = [8, 8], strides = [1, 1]} : vector<8x32xbf16> to vector<8x8xbf16>
    %cst_150 = arith.constant dense<0.000000e+00> : vector<8x8xf32>
    %500 = tpu.matmul %498, %499, %cst_150 {dimension_numbers = #tpu.dot_dimension_numbers<[1], [0], [0], [1], [0, 0, 1, 1], [], []>} : vector<8x8xbf16>, vector<8x8xbf16>, vector<8x8xf32> -> vector<8x8xf32>
    %501 = vector.extract_strided_slice %431 {offsets = [0, 24], sizes = [8, 8], strides = [1, 1]} : vector<8x32xf32> to vector<8x8xf32>
    %502 = arith.truncf %501 : vector<8x8xf32> to vector<8x8xbf16>
    %503 = vector.extract_strided_slice %432 {offsets = [0, 24], sizes = [8, 8], strides = [1, 1]} : vector<8x32xf32> to vector<8x8xf32>
    %504 = arith.truncf %503 : vector<8x8xf32> to vector<8x8xbf16>
    "tpu.trace_start"() <{level = 10 : i32, message = "qd,kd->qk"}> : () -> ()
    %cst_151 = arith.constant dense<0.000000e+00> : vector<8x8xf32>
    %505 = tpu.matmul %502, %504, %cst_151 {dimension_numbers = #tpu.dot_dimension_numbers<[1], [1], [0], [0], [0, 0, 1, 0], [], []>} : vector<8x8xbf16>, vector<8x8xbf16>, vector<8x8xf32> -> vector<8x8xf32>
    "tpu.trace_stop"() : () -> ()
    %cst_152 = arith.constant 0.353553385 : f32
    %506 = vector.broadcast %cst_152 : f32 to vector<8x8xf32>
    %507 = arith.mulf %505, %506 : vector<8x8xf32>
    %508 = vector.broadcast %37 : vector<1x8xf32> to vector<8x8xf32>
    %509 = arith.addf %507, %508 : vector<8x8xf32>
    %cst_153 = arith.constant dense<0xFF800000> : vector<8xf32>
    %510 = vector.multi_reduction <maximumf>, %509, %cst_153 [1] : vector<8x8xf32> to vector<8xf32>
    %511 = vector.shape_cast %510 : vector<8xf32> to vector<8x1xf32>
    %512 = vector.broadcast %511 : vector<8x1xf32> to vector<8x8xf32>
    %513 = arith.subf %509, %512 : vector<8x8xf32>
    %514 = math.exp %513 : vector<8x8xf32>
    %cst_154 = arith.constant dense<0.000000e+00> : vector<8xf32>
    %515 = vector.multi_reduction <add>, %514, %cst_154 [1] : vector<8x8xf32> to vector<8xf32>
    %516 = vector.shape_cast %515 : vector<8xf32> to vector<8x1xf32>
    %517 = tpu.reciprocal %516 {approx = true} : vector<8x1xf32> -> vector<8x1xf32>
    %518 = vector.broadcast %517 : vector<8x1xf32> to vector<8x8xf32>
    %519 = arith.mulf %514, %518 : vector<8x8xf32>
    %520 = arith.truncf %519 : vector<8x8xf32> to vector<8x8xbf16>
    %521 = vector.extract_strided_slice %434 {offsets = [0, 24], sizes = [8, 8], strides = [1, 1]} : vector<8x32xbf16> to vector<8x8xbf16>
    %cst_155 = arith.constant dense<0.000000e+00> : vector<8x8xf32>
    %522 = tpu.matmul %520, %521, %cst_155 {dimension_numbers = #tpu.dot_dimension_numbers<[1], [0], [0], [1], [0, 0, 1, 1], [], []>} : vector<8x8xbf16>, vector<8x8xbf16>, vector<8x8xf32> -> vector<8x8xf32>
    %523 = tpu.concatenate %456, %478, %500, %522 in 1 : vector<8x8xf32>, vector<8x8xf32>, vector<8x8xf32>, vector<8x8xf32> -> vector<8x32xf32>
    %524 = tpu.concatenate %430, %523 in 0 : vector<8x32xf32>, vector<8x32xf32> -> vector<16x32xf32>
    %525 = arith.truncf %524 : vector<16x32xf32> to vector<16x32xbf16>
    %c1_156 = arith.constant 1 : index
    %c0_157 = arith.constant 0 : index
    %c0_158 = arith.constant 0 : index
    %526 = vector.load %arg8[%c1_156, %c0_157, %c0_158] : memref<2x32x32xbf16, #tpu.memory_space<vmem>>, vector<1x32x32xbf16>
    %527 = vector.shape_cast %526 : vector<1x32x32xbf16> to vector<32x32xbf16>
    %cst_159 = arith.constant dense<0.000000e+00> : vector<16x32xf32>
    %528 = tpu.matmul %525, %527, %cst_159 {dimension_numbers = #tpu.dot_dimension_numbers<[1], [0], [0], [1], [0, 0, 1, 1], [], []>} : vector<16x32xbf16>, vector<32x32xbf16>, vector<16x32xf32> -> vector<16x32xf32>
    %c1_160 = arith.constant 1 : index
    %c0_161 = arith.constant 0 : index
    %c0_162 = arith.constant 0 : index
    %529 = vector.load %arg9[%c1_160, %c0_161, %c0_162] : memref<2x1x32xf32, #tpu.memory_space<vmem>>, vector<1x1x32xf32>
    %530 = vector.shape_cast %529 : vector<1x1x32xf32> to vector<1x32xf32>
    %531 = vector.broadcast %530 : vector<1x32xf32> to vector<16x32xf32>
    %532 = arith.addf %528, %531 : vector<16x32xf32>
    %533 = arith.addf %326, %532 : vector<16x32xf32>
    %c1_163 = arith.constant 1 : index
    %c0_164 = arith.constant 0 : index
    %c0_165 = arith.constant 0 : index
    %534 = vector.load %arg10[%c1_163, %c0_164, %c0_165] : memref<2x1x32xf32, #tpu.memory_space<vmem>>, vector<1x1x32xf32>
    %535 = vector.shape_cast %534 : vector<1x1x32xf32> to vector<1x32xf32>
    %c1_166 = arith.constant 1 : index
    %c0_167 = arith.constant 0 : index
    %c0_168 = arith.constant 0 : index
    %536 = vector.load %arg11[%c1_166, %c0_167, %c0_168] : memref<2x1x32xf32, #tpu.memory_space<vmem>>, vector<1x1x32xf32>
    %537 = vector.shape_cast %536 : vector<1x1x32xf32> to vector<1x32xf32>
    %cst_169 = arith.constant dense<0.000000e+00> : vector<16xf32>
    %538 = vector.multi_reduction <add>, %533, %cst_169 [1] : vector<16x32xf32> to vector<16xf32>
    %539 = vector.shape_cast %538 : vector<16xf32> to vector<16x1xf32>
    %cst_170 = arith.constant 3.200000e+01 : f32
    %540 = vector.broadcast %cst_170 : f32 to vector<16x1xf32>
    %541 = arith.divf %539, %540 : vector<16x1xf32>
    %542 = vector.broadcast %541 : vector<16x1xf32> to vector<16x32xf32>
    %543 = arith.subf %533, %542 : vector<16x32xf32>
    %544 = arith.mulf %543, %543 : vector<16x32xf32>
    %cst_171 = arith.constant dense<0.000000e+00> : vector<16xf32>
    %545 = vector.multi_reduction <add>, %544, %cst_171 [1] : vector<16x32xf32> to vector<16xf32>
    %546 = vector.shape_cast %545 : vector<16xf32> to vector<16x1xf32>
    %cst_172 = arith.constant 3.200000e+01 : f32
    %547 = vector.broadcast %cst_172 : f32 to vector<16x1xf32>
    %548 = arith.divf %546, %547 : vector<16x1xf32>
    %549 = vector.broadcast %541 : vector<16x1xf32> to vector<16x32xf32>
    %550 = arith.subf %533, %549 : vector<16x32xf32>
    %cst_173 = arith.constant 9.99999996E-13 : f32
    %551 = vector.broadcast %cst_173 : f32 to vector<16x1xf32>
    %552 = arith.addf %548, %551 : vector<16x1xf32>
    %553 = math.rsqrt %552 : vector<16x1xf32>
    %554 = vector.broadcast %553 : vector<16x1xf32> to vector<16x32xf32>
    %555 = arith.mulf %550, %554 : vector<16x32xf32>
    %556 = vector.broadcast %535 : vector<1x32xf32> to vector<16x32xf32>
    %557 = arith.mulf %555, %556 : vector<16x32xf32>
    %558 = vector.broadcast %537 : vector<1x32xf32> to vector<16x32xf32>
    %559 = arith.addf %557, %558 : vector<16x32xf32>
    %560 = arith.truncf %559 : vector<16x32xf32> to vector<16x32xbf16>
    %c1_174 = arith.constant 1 : index
    %c0_175 = arith.constant 0 : index
    %c0_176 = arith.constant 0 : index
    %561 = vector.load %arg12[%c1_174, %c0_175, %c0_176] : memref<2x32x64xbf16, #tpu.memory_space<vmem>>, vector<1x32x64xbf16>
    %562 = vector.shape_cast %561 : vector<1x32x64xbf16> to vector<32x64xbf16>
    %cst_177 = arith.constant dense<0.000000e+00> : vector<16x64xf32>
    %563 = tpu.matmul %560, %562, %cst_177 {dimension_numbers = #tpu.dot_dimension_numbers<[1], [0], [0], [1], [0, 0, 1, 1], [], []>} : vector<16x32xbf16>, vector<32x64xbf16>, vector<16x64xf32> -> vector<16x64xf32>
    %c1_178 = arith.constant 1 : index
    %c0_179 = arith.constant 0 : index
    %c0_180 = arith.constant 0 : index
    %564 = vector.load %arg13[%c1_178, %c0_179, %c0_180] : memref<2x1x64xf32, #tpu.memory_space<vmem>>, vector<1x1x64xf32>
    %565 = vector.shape_cast %564 : vector<1x1x64xf32> to vector<1x64xf32>
    %566 = vector.broadcast %565 : vector<1x64xf32> to vector<16x64xf32>
    %567 = arith.addf %563, %566 : vector<16x64xf32>
    %cst_181 = arith.constant 5.000000e-01 : f32
    %568 = vector.broadcast %cst_181 : f32 to vector<16x64xf32>
    %569 = arith.mulf %568, %567 : vector<16x64xf32>
    %cst_182 = arith.constant 4.471500e-02 : f32
    %570 = vector.broadcast %cst_182 : f32 to vector<16x64xf32>
    %571 = arith.mulf %570, %567 : vector<16x64xf32>
    %572 = arith.mulf %571, %567 : vector<16x64xf32>
    %573 = arith.mulf %572, %567 : vector<16x64xf32>
    %574 = arith.addf %567, %573 : vector<16x64xf32>
    %cst_183 = arith.constant 0.797884583 : f32
    %575 = vector.broadcast %cst_183 : f32 to vector<16x64xf32>
    %576 = arith.mulf %575, %574 : vector<16x64xf32>
    %577 = math.tanh %576 : vector<16x64xf32>
    %cst_184 = arith.constant 1.000000e+00 : f32
    %578 = vector.broadcast %cst_184 : f32 to vector<16x64xf32>
    %579 = arith.addf %578, %577 : vector<16x64xf32>
    %580 = arith.mulf %569, %579 : vector<16x64xf32>
    %581 = arith.truncf %580 : vector<16x64xf32> to vector<16x64xbf16>
    %c1_185 = arith.constant 1 : index
    %c0_186 = arith.constant 0 : index
    %c0_187 = arith.constant 0 : index
    %582 = vector.load %arg14[%c1_185, %c0_186, %c0_187] : memref<2x64x32xbf16, #tpu.memory_space<vmem>>, vector<1x64x32xbf16>
    %583 = vector.shape_cast %582 : vector<1x64x32xbf16> to vector<64x32xbf16>
    %cst_188 = arith.constant dense<0.000000e+00> : vector<16x32xf32>
    %584 = tpu.matmul %581, %583, %cst_188 {dimension_numbers = #tpu.dot_dimension_numbers<[1], [0], [0], [1], [0, 0, 1, 1], [], []>} : vector<16x64xbf16>, vector<64x32xbf16>, vector<16x32xf32> -> vector<16x32xf32>
    %c1_189 = arith.constant 1 : index
    %c0_190 = arith.constant 0 : index
    %c0_191 = arith.constant 0 : index
    %585 = vector.load %arg15[%c1_189, %c0_190, %c0_191] : memref<2x1x32xf32, #tpu.memory_space<vmem>>, vector<1x1x32xf32>
    %586 = vector.shape_cast %585 : vector<1x1x32xf32> to vector<1x32xf32>
    %587 = vector.broadcast %586 : vector<1x32xf32> to vector<16x32xf32>
    %588 = arith.addf %584, %587 : vector<16x32xf32>
    %589 = arith.addf %559, %588 : vector<16x32xf32>
    %c1_192 = arith.constant 1 : index
    %c0_193 = arith.constant 0 : index
    %c0_194 = arith.constant 0 : index
    %590 = vector.load %arg16[%c1_192, %c0_193, %c0_194] : memref<2x1x32xf32, #tpu.memory_space<vmem>>, vector<1x1x32xf32>
    %591 = vector.shape_cast %590 : vector<1x1x32xf32> to vector<1x32xf32>
    %c1_195 = arith.constant 1 : index
    %c0_196 = arith.constant 0 : index
    %c0_197 = arith.constant 0 : index
    %592 = vector.load %arg17[%c1_195, %c0_196, %c0_197] : memref<2x1x32xf32, #tpu.memory_space<vmem>>, vector<1x1x32xf32>
    %593 = vector.shape_cast %592 : vector<1x1x32xf32> to vector<1x32xf32>
    %cst_198 = arith.constant dense<0.000000e+00> : vector<16xf32>
    %594 = vector.multi_reduction <add>, %589, %cst_198 [1] : vector<16x32xf32> to vector<16xf32>
    %595 = vector.shape_cast %594 : vector<16xf32> to vector<16x1xf32>
    %cst_199 = arith.constant 3.200000e+01 : f32
    %596 = vector.broadcast %cst_199 : f32 to vector<16x1xf32>
    %597 = arith.divf %595, %596 : vector<16x1xf32>
    %598 = vector.broadcast %597 : vector<16x1xf32> to vector<16x32xf32>
    %599 = arith.subf %589, %598 : vector<16x32xf32>
    %600 = arith.mulf %599, %599 : vector<16x32xf32>
    %cst_200 = arith.constant dense<0.000000e+00> : vector<16xf32>
    %601 = vector.multi_reduction <add>, %600, %cst_200 [1] : vector<16x32xf32> to vector<16xf32>
    %602 = vector.shape_cast %601 : vector<16xf32> to vector<16x1xf32>
    %cst_201 = arith.constant 3.200000e+01 : f32
    %603 = vector.broadcast %cst_201 : f32 to vector<16x1xf32>
    %604 = arith.divf %602, %603 : vector<16x1xf32>
    %605 = vector.broadcast %597 : vector<16x1xf32> to vector<16x32xf32>
    %606 = arith.subf %589, %605 : vector<16x32xf32>
    %cst_202 = arith.constant 9.99999996E-13 : f32
    %607 = vector.broadcast %cst_202 : f32 to vector<16x1xf32>
    %608 = arith.addf %604, %607 : vector<16x1xf32>
    %609 = math.rsqrt %608 : vector<16x1xf32>
    %610 = vector.broadcast %609 : vector<16x1xf32> to vector<16x32xf32>
    %611 = arith.mulf %606, %610 : vector<16x32xf32>
    %612 = vector.broadcast %591 : vector<1x32xf32> to vector<16x32xf32>
    %613 = arith.mulf %611, %612 : vector<16x32xf32>
    %614 = vector.broadcast %593 : vector<1x32xf32> to vector<16x32xf32>
    %615 = arith.addf %613, %614 : vector<16x32xf32>
    %616 = vector.extract_strided_slice %615 {offsets = [0, 0], sizes = [1, 32], strides = [1, 1]} : vector<16x32xf32> to vector<1x32xf32>
    %617 = vector.extract_strided_slice %615 {offsets = [8, 0], sizes = [1, 32], strides = [1, 1]} : vector<16x32xf32> to vector<1x32xf32>
    %618 = tpu.concatenate %616, %617 in 0 : vector<1x32xf32>, vector<1x32xf32> -> vector<2x32xf32>
    %619 = arith.truncf %618 : vector<2x32xf32> to vector<2x32xbf16>
    %c0_203 = arith.constant 0 : index
    %c0_204 = arith.constant 0 : index
    %620 = vector.load %arg18[%c0_203, %c0_204] : memref<32x128xbf16, #tpu.memory_space<vmem>>, vector<32x128xbf16>
    %cst_205 = arith.constant dense<0.000000e+00> : vector<2x128xf32>
    %621 = tpu.matmul %619, %620, %cst_205 {dimension_numbers = #tpu.dot_dimension_numbers<[1], [0], [0], [1], [0, 0, 1, 1], [], []>} : vector<2x32xbf16>, vector<32x128xbf16>, vector<2x128xf32> -> vector<2x128xf32>
    %c0_206 = arith.constant 0 : index
    %c0_207 = arith.constant 0 : index
    %622 = vector.load %arg19[%c0_206, %c0_207] : memref<1x128xf32, #tpu.memory_space<vmem>>, vector<1x128xf32>
    %623 = vector.broadcast %622 : vector<1x128xf32> to vector<2x128xf32>
    %624 = arith.addf %621, %623 : vector<2x128xf32>
    %c0_208 = arith.constant 0 : index
    %c0_209 = arith.constant 0 : index
    %625 = vector.load %arg20[%c0_208, %c0_209] : memref<2x128xf32, #tpu.memory_space<vmem>>, vector<2x128xf32>
    tpu.vector_store %arg20[%c0_208, %c0_209], %624 {strides = array<i32>} : memref<2x128xf32, #tpu.memory_space<vmem>>, vector<2x128xf32>,
    return
  }
}

</mosaic_0001>

<bundles_post_ra>
// kernel: text_only_model.1
= control target key start
LH: loop header
LB: loop body
LE: loop exit
PB: predicated region body
PF: predicated region fallthrough
CT: control target
= control target key end

     0   :  { %s4584_s0 = inlined_call_operand.vmem [shape: s32[16,1], index: 0, kind: input, shape index: {}]   ;;  %s4585_s1 = inlined_call_operand.vmem [shape: f32[2,8], index: 1, kind: input, shape index: {}]   ;;  %s4586_s2 = inlined_call_operand.vmem [shape: bf16[100,32], index: 2, kind: input, shape index: {}]   ;;  %s4587_s3 = inlined_call_operand.vmem [shape: f32[16,32], index: 3, kind: input, shape index: {}]   ;;  %s4588_s4 = inlined_call_operand.hbm [shape: f32[1,32], index: 4, kind: input, shape index: {}]   ;;  %s4589_s5 = inlined_call_operand.hbm [shape: f32[1,32], index: 5, kind: input, shape index: {}]   ;;  %s4590_s6 = inlined_call_operand.vmem [shape: bf16[2,32,96], index: 6, kind: input, shape index: {}]   ;;  %s4591_s7 = inlined_call_operand.vmem [shape: f32[2,1,96], index: 7, kind: input, shape index: {}]   ;;  %s4592_s8 = inlined_call_operand.vmem [shape: bf16[2,32,32], index: 8, kind: input, shape index: {}]   ;;  %s4593_s9 = inlined_call_operand.vmem [shape: f32[2,1,32], index: 9, kind: input, shape index: {}]   ;;  %s4594_s10 = inlined_call_operand.vmem [shape: f32[2,1,32], index: 10, kind: input, shape index: {}]   ;;  %s4595_s11 = inlined_call_operand.vmem [shape: f32[2,1,32], index: 11, kind: input, shape index: {}]   ;;  %s4596_s12 = inlined_call_operand.vmem [shape: bf16[2,32,64], index: 12, kind: input, shape index: {}]   ;;  %s4597_s13 = inlined_call_operand.vmem [shape: f32[2,1,64], index: 13, kind: input, shape index: {}]   ;;  %s4598_s14 = inlined_call_operand.vmem [shape: bf16[2,64,32], index: 14, kind: input, shape index: {}]   ;;  %s4599_s15 = inlined_call_operand.vmem [shape: f32[2,1,32], index: 15, kind: input, shape index: {}]   ;;  %s4600_s16 = inlined_call_operand.vmem [shape: f32[2,1,32], index: 16, kind: input, shape index: {}]   ;;  %s4601_s17 = inlined_call_operand.vmem [shape: f32[2,1,32], index: 17, kind: input, shape index: {}]   ;;  %s4602_s18 = inlined_call_operand.vmem [shape: bf16[32,128], index: 18, kind: input, shape index: {}]   ;;  %s4603_s19 = inlined_call_operand.hbm [shape: f32[1,128], index: 19, kind: input, shape index: {}]   ;;  %s4604_s20 = inlined_call_operand.hbm [shape: f32[2,128], index: 20, kind: output, shape index: {}]  }
   0x1   :  { %4615 = sst [smem:[#allocation12_spill]] %s4584_s0 }
   0x2   :  { %4616 = sst [smem:[#allocation13_spill]] %s4585_s1 }
   0x3   :  { %4617 = sst [smem:[#allocation14_spill]] %s4586_s2 }
   0x4   :  { %4618 = sst [smem:[#allocation15_spill]] %s4587_s3 }
   0x5   :  { %4619 = sst [smem:[#allocation16_spill]] %s4588_s4 }
   0x6   :  { %25 = vsyncpa [#allocation3], 0 }
   0x7   :  { %26 = vsyncpa [#allocation6], 0 }
   0x8   :  { %27 = vsyncpa [#allocation4], 0  ;;  %s3803_s1 = smov [#allocation5]   ;;  %s3804_s23 = smov [#allocation2]  }
   0x9   :  { %s52_s22 = sshll.u32 %s3803_s1, 4  ;;  %s42_s24 = sshll.u32 %s3804_s23, 4  ;;  %s53_s22 = int_to_ptr.vmem [resolvable:$true] %s52_s22  ;;  %s43_s24 = int_to_ptr.vmem [resolvable:$true] %s42_s24 }
   0xa   :  { %s3725_s2 = scalar_lea.vmem %s53_s22, 16  ;;  %s3729_s25 = scalar_lea.vmem %s53_s22, 32 }
   0xb   :  { %p3726_p0 = scmp.ne.s32.totalorder %s53_s22, %s3725_s2  ;;  %p3730_p1 = scmp.lt.s32.totalorder %s53_s22, %s53_s22 }
   0xc   :  { %p3731_p2 = scmp.lt.s32.totalorder %s3729_s25, %s3725_s2 }
   0xe   :  { %p3732_p3 = por %p3731_p2, %p3730_p1 }
  0x10   :  { %p3733_p4 = pnand %p3732_p3, %p3726_p0 }
  0x12   :  { %3736 = shalt.err (!%p3733_p4)
}
  0x13   :  { %55 = dma.hbm_to_vmem [thread:$0]  %s4589_s5, 16, %s53_s22, [#allocation6]  }
  0x14   :  { %s3745_s27 = scalar_lea.vmem %s43_s24, 16  ;;  %s3749_s28 = scalar_lea.vmem %s43_s24, 32 }
  0x15   :  { %p3746_p5 = scmp.ne.s32.totalorder %s43_s24, %s3745_s27  ;;  %p3750_p6 = scmp.lt.s32.totalorder %s43_s24, %s43_s24 }
  0x16   :  { %p3751_p7 = scmp.lt.s32.totalorder %s3749_s28, %s3745_s27 }
  0x18   :  { %p3752_p8 = por %p3751_p7, %p3750_p6 }
  0x1a   :  { %p3753_p9 = pnand %p3752_p8, %p3746_p5 }
  0x1c   :  { %3756 = shalt.err (!%p3753_p9)
}
  0x1d   :  { %s4620_s30 = sld [smem:[#allocation16_spill]]  ;;  %s3805_s0 = smov [#allocation7]  }
  0x1e   :  { %s88_s21 = sshll.u32 %s3805_s0, 4  ;;  %s89_s21 = int_to_ptr.vmem [resolvable:$true] %s88_s21 }
  0x1f   :  { %s3765_s1 = scalar_lea.vmem %s89_s21, 16  ;;  %s3769_s23 = scalar_lea.vmem %s89_s21, 32 }
  0x20   :  { %p3766_p10 = scmp.ne.s32.totalorder %s89_s21, %s3765_s1  ;;  %p3770_p11 = scmp.lt.s32.totalorder %s89_s21, %s89_s21 }
  0x21   :  { %p3771_p12 = scmp.lt.s32.totalorder %s3769_s23, %s3765_s1 }
  0x23   :  { %45 = dma.hbm_to_vmem [thread:$0]  %s4620_s30, 16, %s43_s24, [#allocation3]  }
  0x24   :  { %p3772_p13 = por %p3771_p12, %p3770_p11 }
  0x26   :  { %p3773_p0 = pnand %p3772_p13, %p3766_p10 }
  0x28   :  { %3776 = shalt.err (!%p3773_p0)
}
  0x29   :  { %91 = dma.hbm_to_vmem [thread:$0]  %s4603_s19, 16, %s89_s21, [#allocation6]  }
  0x2a   :  { %3797 = dma.done.wait [#allocation3], 16  }
  0x2b   :  { %3798 = vsyncadd [#allocation3], 4294967280 }
  0x2c   :  { %3799 = dma.done.wait [#allocation6], 32  }
  0x2d   :  { %3800 = vsyncadd [#allocation6], 4294967264  ;;  %v3806_v0 = vmov 0   ;;  %v3807_v1 = vmov 0.0   ;;  %v104_v2 = vlaneseq  ;;  %s4621_s25 = sld [smem:[#allocation12_spill]]  ;;  %vm177_vm0 = vcmask 1041408  }
  0x2e   :  { %3565 = vset.pattern.permute.xlu0 %v3806_v0  ;;  %3254 = vmatprep.subr.bf16.mxu0 %v3807_v1  ;;  %s4622_s28 = sld [smem:[#allocation14_spill]]  ;;  %vm3808_vm1 = vmmov 0   ;;  %vm173_vm4 = vcmask 818176   ;;  %vm224_vm5 = vcmask 261120   ;;  %v3603_v43 = vld [vmem:[%s4590_s6 + $0x8] sm:$0xff]   ;;  %v3604_v44 = vld [vmem:[%s4590_s6] sm:$0xff]  }
  0x2f   :  { %3272 = vmatprep.subr.bf16.mxu1 %v3807_v1  ;;  %v3940_v3 = vshrl.u32 %v104_v2, 7  ;;  %s4623_s21 = sld [smem:[#allocation13_spill]]  ;;  %3268 = vmatprep.mubr.msk.bf16.mxu0 %vm3808_vm1, %v3807_v1  ;;  %v105_v17 = vand.u32 127, %v104_v2  ;;  %v3041_v53 = vld [vmem:[#allocation2] ss:$0 sm:$0xff]  ;;  %s3809_s24 = smov 64  }
  0x30   :  { %3276 = vmatprep.mubr.msk.bf16.mxu1 %vm3808_vm1, %v3807_v1  ;;  %s4624_s4 = sld [smem:[#allocation15_spill]]  ;;  %3273 = vmatpush3.bf16.msra.mxu1 %v3603_v43  ;;  %v3042_v57 = vld [vmem:[#allocation5] ss:$0 sm:$0xff]  ;;  %v3043_v62 = vld [vmem:[%s4591_s7] ss:$0 sm:$0xff]  ;;  %s3810_s2 = smov 96  }
  0x31   :  { %v861_v5 = vsub.s32 1, %v3940_v3  ;;  %3274 = vmatprep.subr.bf16.mxu1 %v3807_v1  ;;  %vm341_vm6 = vcmask 64512   ;;  %vm411_vm7 = vcmask 1043456   ;;  %s3812_s19 = smov 112   ;;  %s3813_s3 = smov 104   ;;  %vm804_vm8 = vcmask 130048  }
  0x32   :  { %s3814_s26 = smov 88   ;;  %s3815_s27 = smov 80   ;;  %vm806_vm9 = vcmask 195584   ;;  %vm1515_vm10 = vcmask 523264   ;;  %vm2945_vm11 = vcmask 1040384  }
  0x33   :  { %v102_v4 = vld [vmem:[%s4621_s25] sm:$0xff]  ;;  %v103_v6 = vld [vmem:[%s4621_s25 + $0x8] sm:$0xff]  ;;  %s3811_s25 = smov 120   ;;  %s3818_s29 = smov 56  }
  0x34   :  { %107 = vperm.xlu0 %3565, %v102_v4   ;;  %v3596_v7 = vld [vmem:[%s4622_s28 + $0x30] ss:$0 sps:$4 sm:$0x33]   ;;  %v3597_v9 = vld [vmem:[%s4622_s28 + $0x28] sm:$0xff]   ;;  %v3598_v12 = vld [vmem:[%s4622_s28 + $0x20] sm:$0xff]   ;;  %3275 = vmatpush3.bf16.msra.mxu1 %v3604_v44  ;;  %s4611_s30 = smov 40  }
  0x35   :  { %v179_v8 = vsel %vm177_vm0, %v3596_v7, 0  ;;  %v3959_v10 = vld [vmem:[%s4623_s21] sm:$0x3]  ;;  %v3599_v13 = vld [vmem:[%s4622_s28 + $0x18] sm:$0xff]   ;;  %v3600_v14 = vld [vmem:[%s4622_s28 + $0x10] sm:$0xff]   ;;  %3280 = vmatprep.subr.bf16.mxu1 %v3807_v1  ;;  %s4610_s1 = smov 8  }
  0x36   :  { %3255 = vmatpush3.bf16.msra.mxu0 %v179_v8  ;;  %v3962_v11 = vrot.slane %v3959_v10, %v861_v5  ;;  %v3601_v15 = vld [vmem:[%s4622_s28 + $0x8] sm:$0xff]   ;;  %v3602_v16 = vld [vmem:[%s4622_s28] sm:$0xff]   ;;  %s3816_s28 = smov 72   ;;  %s4609_s22 = smov 16  }
  0x37   :  { %3256 = vmatprep.subr.bf16.mxu0 %v3807_v1  ;;  %v132_v23 = vld [vmem:[%s4624_s4] sm:$0xff]  ;;  %v133_v27 = vld [vmem:[%s4624_s4 + $0x8] sm:$0xff]  ;;  %s4613_s4 = smov 48   ;;  %s4608_s0 = smov 24  }
  0x38   :  { %110 = vperm.xlu0 %3565, %v103_v6  }
  0x3a   :  { %3257 = vmatpush3.bf16.msra.mxu0 %v3597_v9 }
  0x3b   :  { %3258 = vmatprep.subr.bf16.mxu0 %v3807_v1 }
  0x3e   :  { %3259 = vmatpush3.bf16.msra.mxu0 %v3598_v12 }
  0x3f   :  { %3260 = vmatprep.subr.bf16.mxu0 %v3807_v1 }
  0x42   :  { %3261 = vmatpush3.bf16.msra.mxu0 %v3599_v13 }
  0x43   :  { %3262 = vmatprep.subr.bf16.mxu0 %v3807_v1 }
  0x46   :  { %3263 = vmatpush3.bf16.msra.mxu0 %v3600_v14  ;;  %v391_v14 = vsub.s32 0, %v3940_v3 }
  0x47   :  { %3264 = vmatprep.subr.bf16.mxu0 %v3807_v1 }
  0x4a   :  { %3265 = vmatpush3.bf16.msra.mxu0 %v3601_v15  ;;  %v4039_v15 = vrot.slane %v3959_v10, %v391_v14 }
  0x4b   :  { %3266 = vmatprep.subr.bf16.mxu0 %v3807_v1 }
  0x4e   :  { %3267 = vmatpush3.bf16.msra.mxu0 %v3602_v16 }
  0x4f   :  { %3298 = vmatprep.subr.bf16.mxu0 %v3807_v1 }
  0xaf   :  { %v108_v18 = vpop.permute.xlu0 %107 }
  0xb0   :  { %vm112_vm2 = vcmp.eq.s32.totalorder %v108_v18, %v105_v17 }
  0xb1   :  { %v3031_v20 = vsel %vm112_vm2, 1.0, %v3807_v1 }
  0xb3   :  { %v111_v19 = vpop.permute.xlu0 %110 }
  0xb4   :  { %vm113_vm3 = vcmp.eq.s32.totalorder %v111_v19, %v105_v17 }
  0xb5   :  { %v3032_v21 = vsel %vm113_vm3, 1.0, %v3807_v1 }
  0xb6   :  { %v118_v22 = vpack.c.bf16 %v3032_v21, %v3031_v20 }
  0xb8   :  { %3269 = vmatmul.mubr.msk.bf16.vlgmr.msra.gmra.mxu0 %vm173_vm4, %v118_v22 }
  0xb9   :  { %3300 = vmatprep.mubr.msk.bf16.mxu0 %vm3808_vm1, %v3807_v1 }
 0x178   :  { %v215_v24 = vpop.f32.mrf.mxu0 }
 0x179   :  { %v216_v25 = vadd.f32 %v215_v24, %v132_v23 }
 0x17a   :  { %v3270_v26 = vpop.f32.mrf.mxu0 }
 0x17b   :  { %v225_v28 = vsel %vm224_vm5, %v216_v25, 0.0 }
 0x17c   :  { %226 = vadd.xlane.f32.xlu1 %v225_v28  ;;  %v218_v29 = vpop.f32.mrf.mxu0 }
 0x17d   :  { %v219_v30 = vadd.f32 %v218_v29, %v133_v27 }
 0x17e   :  { %v3271_v31 = vpop.f32.mrf.mxu0 }
 0x17f   :  { %v228_v32 = vsel %vm224_vm5, %v219_v30, 0.0 }
 0x180   :  { %229 = vadd.xlane.f32.xlu1 %v228_v32 }
 0x205   :  { %v227_v33 = vpop.xlane.xlu1 %226 }
 0x206   :  { %v232_v34 = vmul.f32 0.03125, %v227_v33 }
 0x208   :  { %v234_v35 = vsub.f32 %v216_v25, %v232_v34 }
 0x209   :  { %v230_v36 = vpop.xlane.xlu1 %229 }
 0x20a   :  { %v233_v37 = vmul.f32 0.03125, %v230_v36  ;;  %v236_v38 = vmul.f32 %v234_v35, %v234_v35 }
 0x20c   :  { %v235_v39 = vsub.f32 %v219_v30, %v233_v37  ;;  %v238_v40 = vsel %vm224_vm5, %v236_v38, 0.0 }
 0x20d   :  { %239 = vadd.xlane.f32.xlu0 %v238_v40 }
 0x20e   :  { %v237_v41 = vmul.f32 %v235_v39, %v235_v39 }
 0x210   :  { %v241_v42 = vsel %vm224_vm5, %v237_v41, 0.0 }
 0x211   :  { %242 = vadd.xlane.f32.xlu1 %v241_v42 }
 0x296   :  { %v240_v45 = vpop.xlane.xlu0 %239 }
 0x297   :  { %v244_v46 = vmul.f32 0.03125, %v240_v45 }
 0x299   :  { %v246_v47 = vadd.f32 1e-12, %v244_v46 }
 0x29a   :  { %v243_v48 = vpop.xlane.xlu1 %242 }
 0x29b   :  { %3625 = vrsqrt.f32 %v246_v47  ;;  %v245_v49 = vmul.f32 0.03125, %v243_v48 }
 0x29d   :  { %v247_v50 = vadd.f32 1e-12, %v245_v49 }
 0x29f   :  { %3627 = vrsqrt.f32 %v247_v50 }
 0x2a8   :  { %v3626_v51 = vpop.eup %3625 }
 0x2a9   :  { %v250_v52 = vmul.f32 %v3626_v51, %v234_v35 }
 0x2ab   :  { %v258_v56 = vmul.f32 %v3041_v53, %v250_v52 }
 0x2ac   :  { %v3628_v54 = vpop.eup %3627 }
 0x2ad   :  { %v251_v55 = vmul.f32 %v3628_v54, %v235_v39  ;;  %v4011_v59 = vadd.f32 %v3042_v57, %v258_v56 }
 0x2af   :  { %v259_v58 = vmul.f32 %v3041_v53, %v251_v55 }
 0x2b1   :  { %v4013_v60 = vadd.f32 %v3042_v57, %v259_v58 }
 0x2b3   :  { %v269_v61 = vpack.c.bf16 %v4013_v60, %v4011_v59 }
 0x2b5   :  { %3277 = vmatmul.mubr.msk.bf16.vlgmr.msra.gmra.mxu1 %vm224_vm5, %v269_v61 }
 0x2b6   :  { %3282 = vmatprep.mubr.msk.bf16.mxu1 %vm3808_vm1, %v3807_v1 }
 0x375   :  { %v330_v63 = vpop.f32.mrf.mxu1 }
 0x376   :  { %v331_v0 = vadd.f32 %v3043_v62, %v330_v63 }
 0x377   :  { %v3278_v2 = vpop.f32.mrf.mxu1 }
 0x378   :  { %v4023_v4 = vpack.c.bf16 %v331_v0, %v331_v0 }
 0x379   :  { %v333_v5 = vpop.f32.mrf.mxu1 }
 0x37a   :  { %v334_v6 = vadd.f32 %v3043_v62, %v333_v5  ;;  %406 = vrot.lane.b32.xlu0 %v4023_v4, %s3809_s24  ;;  %339 = vrot.lane.b32.xlu1 %v4023_v4, %s3810_s2 }
 0x37b   :  { %v3279_v7 = vpop.f32.mrf.mxu1 }
 0x37c   :  { %v4045_v23 = vpack.c.bf16 %v334_v6, %v334_v6 }
 0x3ec   :  { %v340_v8 = vpop.permute.xlu1 %339  ;;  %v407_v12 = vpop.permute.xlu0 %406 }
 0x3ed   :  { %v346_v9 = vsel %vm341_vm6, %v340_v8, 0  ;;  %v413_v13 = vsel %vm411_vm7, %v407_v12, 0 }
 0x3ee   :  { %3281 = vmatpush3.bf16.xpose.msra.mxu1 %v346_v9 }
 0x3ef   :  { %3286 = vmatprep.subr.bf16.mxu1 %v3807_v1 }
 0x3f5   :  { %3283 = vmatmul.mubr.msk.bf16.vlgmr.msra.gmra.mxu1 %vm341_vm6, %v4023_v4 }
 0x3f6   :  { %3287 = vmatpush3.bf16.msra.mxu1 %v413_v13  ;;  %3288 = vmatprep.mubr.msk.bf16.mxu1 %vm3808_vm1, %v3807_v1 }
 0x3f7   :  { %3292 = vmatprep.subr.bf16.mxu1 %v3807_v1 }
 0x4b5   :  { %v382_v16 = vpop.f32.mrf.mxu1 }
 0x4b6   :  { %v388_v17 = vmul.f32 0.35355338, %v382_v16 }
 0x4b7   :  { %v3284_v18 = vpop.f32.mrf.mxu1 }
 0x4b8   :  { %v393_v19 = vadd.f32 %v4039_v15, %v388_v17 }
 0x4b9   :  { %v385_v20 = vpop.f32.mrf.mxu1 }
 0x4ba   :  { %v394_v21 = vsel %vm341_vm6, %v393_v19, -inf }
 0x4bb   :  { %395 = vmax.xlane.f32.xlu1 %v394_v21  ;;  %v3285_v22 = vpop.f32.mrf.mxu1 }
 0x4cc   :  { %455 = vrot.lane.b32.xlu1 %v4023_v4, %s3811_s25 }
 0x4d0   :  { %810 = vrot.lane.b32.xlu1 %v4045_v23, %s3810_s2 }
 0x4d4   :  { %924 = vrot.lane.b32.xlu1 %v4045_v23, %s3811_s25 }
 0x4d8   :  { %1036 = vrot.lane.b32.xlu1 %v4045_v23, %s3812_s19 }
 0x4dc   :  { %1148 = vrot.lane.b32.xlu1 %v4045_v23, %s3813_s3 }
 0x544   :  { %v396_v3 = vpop.xlane.xlu1 %395 }
 0x545   :  { %v397_v10 = vsub.f32 %v393_v19, %v396_v3 }
 0x547   :  { %v398_v24 = vmul.f32 1.442695, %v397_v10 }
 0x548   :  { %v456_v34 = vpop.permute.xlu1 %455 }
 0x549   :  { %3629 = vpow2.f32 %v398_v24 }
 0x54c   :  { %v811_v39 = vpop.permute.xlu1 %810 }
 0x54d   :  { %v816_v41 = vsel %vm341_vm6, %v811_v39, 0 }
 0x550   :  { %v925_v45 = vpop.permute.xlu1 %924 }
 0x554   :  { %v1037_v48 = vpop.permute.xlu1 %1036 }
 0x556   :  { %v3630_v25 = vpop.eup %3629 }
 0x557   :  { %v400_v26 = vsel %vm341_vm6, %v3630_v25, 0.0 }
 0x558   :  { %401 = vadd.xlane.f32.xlu0 %v400_v26  ;;  %v1149_v50 = vpop.permute.xlu1 %1148 }
 0x56e   :  { %457 = vrot.lane.b32.xlu0 %v4023_v4, %s3814_s26 }
 0x572   :  { %569 = vrot.lane.b32.xlu0 %v4023_v4, %s3815_s27 }
 0x576   :  { %567 = vrot.lane.b32.xlu0 %v4023_v4, %s3812_s19 }
 0x57a   :  { %681 = vrot.lane.b32.xlu0 %v4023_v4, %s3816_s28 }
 0x57e   :  { %679 = vrot.lane.b32.xlu0 %v4023_v4, %s3813_s3 }
 0x582   :  { %926 = vrot.lane.b32.xlu0 %v4045_v23, %s3814_s26 }
 0x586   :  { %1038 = vrot.lane.b32.xlu0 %v4045_v23, %s3815_s27 }
 0x58a   :  { %1150 = vrot.lane.b32.xlu0 %v4045_v23, %s3816_s28 }
 0x5e1   :  { %v402_v27 = vpop.xlane.xlu0 %401 }
 0x5e2   :  { %3631 = vrcp.f32 %v402_v27 }
 0x5e5   :  { %v458_v29 = vpop.permute.xlu0 %457 }
 0x5e6   :  { %v463_v32 = vsel %vm341_vm6, %v458_v29, 0 }
 0x5e9   :  { %v570_v33 = vpop.permute.xlu0 %569 }
 0x5ea   :  { %v575_v36 = vsel %vm341_vm6, %v570_v33, 0 }
 0x5ed   :  { %v568_v35 = vpop.permute.xlu0 %567 }
 0x5ef   :  { %v3632_v28 = vpop.eup %3631 }
 0x5f0   :  { %v404_v30 = vmul.f32 %v3632_v28, %v3630_v25 }
 0x5f1   :  { %v682_v37 = vpop.permute.xlu0 %681 }
 0x5f2   :  { %v405_v31 = vpack.c.bf16 %v404_v30, %v404_v30  ;;  %v687_v38 = vsel %vm341_vm6, %v682_v37, 0 }
 0x5f4   :  { %3289 = vmatmul.mubr.msk.bf16.vlgmr.msra.gmra.mxu1 %vm341_vm6, %v405_v31 }
 0x5f5   :  { %3293 = vmatpush3.bf16.xpose.msra.mxu1 %v463_v32  ;;  %3294 = vmatprep.mubr.msk.bf16.mxu1 %vm3808_vm1, %v3807_v1  ;;  %v680_v40 = vpop.permute.xlu0 %679 }
 0x5f6   :  { %3304 = vmatprep.subr.bf16.mxu1 %v3807_v1 }
 0x5f9   :  { %v927_v42 = vpop.permute.xlu0 %926 }
 0x5fa   :  { %v932_v43 = vsel %vm341_vm6, %v927_v42, 0 }
 0x5fc   :  { %3295 = vmatmul.mubr.msk.bf16.vlgmr.msra.gmra.mxu1 %vm341_vm6, %v456_v34 }
 0x5fd   :  { %3305 = vmatpush3.bf16.xpose.msra.mxu1 %v575_v36  ;;  %3306 = vmatprep.mubr.msk.bf16.mxu1 %vm3808_vm1, %v3807_v1  ;;  %v1039_v44 = vpop.permute.xlu0 %1038 }
 0x5fe   :  { %3316 = vmatprep.subr.bf16.mxu1 %v3807_v1  ;;  %v1044_v46 = vsel %vm341_vm6, %v1039_v44, 0 }
 0x601   :  { %v1151_v47 = vpop.permute.xlu0 %1150 }
 0x602   :  { %v1156_v49 = vsel %vm341_vm6, %v1151_v47, 0 }
 0x604   :  { %3307 = vmatmul.mubr.msk.bf16.vlgmr.msra.gmra.mxu1 %vm341_vm6, %v568_v35 }
 0x605   :  { %3317 = vmatpush3.bf16.xpose.msra.mxu1 %v687_v38  ;;  %3318 = vmatprep.mubr.msk.bf16.mxu1 %vm3808_vm1, %v3807_v1 }
 0x606   :  { %3328 = vmatprep.subr.bf16.mxu1 %v3807_v1 }
 0x60c   :  { %3319 = vmatmul.mubr.msk.bf16.vlgmr.msra.gmra.mxu1 %vm341_vm6, %v680_v40 }
 0x60d   :  { %3329 = vmatpush3.bf16.xpose.msra.mxu1 %v816_v41  ;;  %3330 = vmatprep.mubr.msk.bf16.mxu1 %vm3808_vm1, %v3807_v1 }
 0x60e   :  { %3340 = vmatprep.subr.bf16.mxu1 %v3807_v1 }
 0x614   :  { %3331 = vmatmul.mubr.msk.bf16.vlgmr.msra.gmra.mxu1 %vm341_vm6, %v4045_v23 }
 0x615   :  { %3341 = vmatpush3.bf16.xpose.msra.mxu1 %v932_v43  ;;  %3342 = vmatprep.mubr.msk.bf16.mxu1 %vm3808_vm1, %v3807_v1 }
 0x616   :  { %3352 = vmatprep.subr.bf16.mxu1 %v3807_v1 }
 0x61c   :  { %3343 = vmatmul.mubr.msk.bf16.vlgmr.msra.gmra.mxu1 %vm341_vm6, %v925_v45 }
 0x61d   :  { %3353 = vmatpush3.bf16.xpose.msra.mxu1 %v1044_v46  ;;  %3354 = vmatprep.mubr.msk.bf16.mxu1 %vm3808_vm1, %v3807_v1 }
 0x61e   :  { %3364 = vmatprep.subr.bf16.mxu1 %v3807_v1 }
 0x624   :  { %3355 = vmatmul.mubr.msk.bf16.vlgmr.msra.gmra.mxu1 %vm341_vm6, %v1037_v48 }
 0x625   :  { %3365 = vmatpush3.bf16.xpose.msra.mxu1 %v1156_v49  ;;  %3366 = vmatprep.mubr.msk.bf16.mxu1 %vm3808_vm1, %v3807_v1 }
 0x626   :  { %3376 = vmatprep.subr.bf16.mxu1 %v3807_v1 }
 0x62c   :  { %3367 = vmatmul.mubr.msk.bf16.vlgmr.msra.gmra.mxu1 %vm341_vm6, %v1149_v50 }
 0x62d   :  { %3380 = vmatprep.mubr.msk.bf16.mxu1 %vm3808_vm1, %v3807_v1 }
 0x6b4   :  { %v4111_v51 = vpop.f32.mrf.mxu1 }
 0x6b6   :  { %v3290_v52 = vpop.f32.mrf.mxu1 }
 0x6b8   :  { %v452_v53 = vpop.f32.mrf.mxu1 }
 0x6ba   :  { %v3291_v54 = vpop.f32.mrf.mxu1 }
 0x6bc   :  { %v499_v55 = vpop.f32.mrf.mxu1 }
 0x6bd   :  { %v505_v56 = vmul.f32 0.35355338, %v499_v55 }
 0x6be   :  { %v3296_v57 = vpop.f32.mrf.mxu1 }
 0x6bf   :  { %v506_v58 = vadd.f32 %v505_v56, %v4039_v15 }
 0x6c0   :  { %v502_v61 = vpop.f32.mrf.mxu1 }
 0x6c1   :  { %v507_v62 = vsel %vm341_vm6, %v506_v58, -inf }
 0x6c2   :  { %508 = vmax.xlane.f32.xlu0 %v507_v62  ;;  %v3297_v63 = vpop.f32.mrf.mxu1 }
 0x6c4   :  { %v611_v0 = vpop.f32.mrf.mxu1 }
 0x6c5   :  { %v617_v2 = vmul.f32 0.35355338, %v611_v0 }
 0x6c6   :  { %v3308_v5 = vpop.f32.mrf.mxu1 }
 0x6c7   :  { %v618_v6 = vadd.f32 %v617_v2, %v4039_v15 }
 0x6c8   :  { %v614_v7 = vpop.f32.mrf.mxu1 }
 0x6c9   :  { %v619_v8 = vsel %vm341_vm6, %v618_v6, -inf }
 0x6ca   :  { %620 = vmax.xlane.f32.xlu1 %v619_v8  ;;  %v3309_v9 = vpop.f32.mrf.mxu1 }
 0x6cc   :  { %v723_v12 = vpop.f32.mrf.mxu1 }
 0x6cd   :  { %v729_v13 = vmul.f32 0.35355338, %v723_v12 }
 0x6ce   :  { %v3320_v14 = vpop.f32.mrf.mxu1 }
 0x6cf   :  { %v730_v16 = vadd.f32 %v729_v13, %v4039_v15 }
 0x6d0   :  { %v726_v17 = vpop.f32.mrf.mxu1 }
 0x6d1   :  { %v731_v18 = vsel %vm341_vm6, %v730_v16, -inf }
 0x6d2   :  { %732 = vmax.xlane.f32.xlu0 %v731_v18  ;;  %v3321_v19 = vpop.f32.mrf.mxu1 }
 0x6d4   :  { %v852_v20 = vpop.f32.mrf.mxu1 }
 0x6d5   :  { %v858_v21 = vmul.f32 0.35355338, %v852_v20 }
 0x6d6   :  { %v3332_v22 = vpop.f32.mrf.mxu1 }
 0x6d7   :  { %v4120_v3 = vadd.f32 %v3962_v11, %v858_v21 }
 0x6d8   :  { %v855_v10 = vpop.f32.mrf.mxu1 }
 0x6d9   :  { %v864_v24 = vsel %vm341_vm6, %v4120_v3, -inf }
 0x6da   :  { %865 = vmax.xlane.f32.xlu0 %v864_v24  ;;  %v3333_v25 = vpop.f32.mrf.mxu1 }
 0x6dc   :  { %v968_v26 = vpop.f32.mrf.mxu1 }
 0x6dd   :  { %v974_v27 = vmul.f32 0.35355338, %v968_v26 }
 0x6de   :  { %v3344_v28 = vpop.f32.mrf.mxu1 }
 0x6df   :  { %v975_v29 = vadd.f32 %v974_v27, %v3962_v11 }
 0x6e0   :  { %v971_v30 = vpop.f32.mrf.mxu1 }
 0x6e1   :  { %v976_v31 = vsel %vm341_vm6, %v975_v29, -inf }
 0x6e2   :  { %977 = vmax.xlane.f32.xlu1 %v976_v31  ;;  %v3345_v32 = vpop.f32.mrf.mxu1 }
 0x6e4   :  { %v1080_v33 = vpop.f32.mrf.mxu1 }
 0x6e5   :  { %v1086_v34 = vmul.f32 0.35355338, %v1080_v33 }
 0x6e6   :  { %v3356_v35 = vpop.f32.mrf.mxu1 }
 0x6e7   :  { %v1087_v36 = vadd.f32 %v1086_v34, %v3962_v11 }
 0x6e8   :  { %v1083_v37 = vpop.f32.mrf.mxu1 }
 0x6e9   :  { %v1088_v38 = vsel %vm341_vm6, %v1087_v36, -inf }
 0x6ea   :  { %1089 = vmax.xlane.f32.xlu0 %v1088_v38  ;;  %v3357_v39 = vpop.f32.mrf.mxu1 }
 0x6ec   :  { %v1192_v40 = vpop.f32.mrf.mxu1 }
 0x6ed   :  { %v1198_v44 = vmul.f32 0.35355338, %v1192_v40 }
 0x6ee   :  { %v3368_v41 = vpop.f32.mrf.mxu1 }
 0x6ef   :  { %v1199_v45 = vadd.f32 %v1198_v44, %v3962_v11 }
 0x6f0   :  { %v1195_v42 = vpop.f32.mrf.mxu1 }
 0x6f1   :  { %v1200_v46 = vsel %vm341_vm6, %v1199_v45, -inf }
 0x6f2   :  { %v3369_v43 = vpop.f32.mrf.mxu1 }
 0x6f3   :  { %631 = vrot.lane.b32.xlu1 %v4023_v4, %s4613_s4 }
 0x700   :  { %519 = vrot.lane.b32.xlu0 %v4023_v4, %s3818_s29 }
 0x717   :  { %1201 = vmax.xlane.f32.xlu1 %v1200_v46 }
 0x74b   :  { %v509_v47 = vpop.xlane.xlu0 %508 }
 0x74c   :  { %v510_v48 = vsub.f32 %v506_v58, %v509_v47 }
 0x74e   :  { %v511_v49 = vmul.f32 1.442695, %v510_v48 }
 0x750   :  { %3633 = vpow2.f32 %v511_v49 }
 0x753   :  { %v621_v50 = vpop.xlane.xlu1 %620 }
 0x754   :  { %v622_v52 = vsub.f32 %v618_v6, %v621_v50 }
 0x756   :  { %v623_v53 = vmul.f32 1.442695, %v622_v52 }
 0x758   :  { %3635 = vpow2.f32 %v623_v53 }
 0x75b   :  { %v733_v54 = vpop.xlane.xlu0 %732 }
 0x75c   :  { %v734_v55 = vsub.f32 %v730_v16, %v733_v54 }
 0x75d   :  { %v3634_v56 = vpop.eup %3633 }
 0x75e   :  { %v735_v57 = vmul.f32 1.442695, %v734_v55  ;;  %v513_v61 = vsel %vm341_vm6, %v3634_v56, 0.0 }
 0x75f   :  { %514 = vadd.xlane.f32.xlu0 %v513_v61 }
 0x760   :  { %3637 = vpow2.f32 %v735_v57 }
 0x763   :  { %v866_v2 = vpop.xlane.xlu0 %865 }
 0x764   :  { %v867_v8 = vsub.f32 %v4120_v3, %v866_v2 }
 0x765   :  { %v3636_v62 = vpop.eup %3635 }
 0x766   :  { %v625_v63 = vsel %vm341_vm6, %v3636_v62, 0.0  ;;  %v868_v12 = vmul.f32 1.442695, %v867_v8 }
 0x767   :  { %626 = vadd.xlane.f32.xlu1 %v625_v63 }
 0x768   :  { %3639 = vpow2.f32 %v868_v12 }
 0x76b   :  { %v978_v9 = vpop.xlane.xlu1 %977 }
 0x76c   :  { %v979_v13 = vsub.f32 %v975_v29, %v978_v9 }
 0x76d   :  { %v4136_v0 = vpop.eup %3637 }
 0x76e   :  { %v737_v58 = vsel %vm341_vm6, %v4136_v0, 0.0  ;;  %v980_v14 = vmul.f32 1.442695, %v979_v13 }
 0x76f   :  { %738 = vadd.xlane.f32.xlu0 %v737_v58  ;;  %v632_v20 = vpop.permute.xlu1 %631 }
 0x770   :  { %3641 = vpow2.f32 %v980_v14  ;;  %v637_v34 = vsel %vm411_vm7, %v632_v20, 0 }
 0x773   :  { %v1090_v5 = vpop.xlane.xlu0 %1089 }
 0x774   :  { %v1091_v16 = vsub.f32 %v1087_v36, %v1090_v5 }
 0x775   :  { %v3640_v18 = vpop.eup %3639 }
 0x776   :  { %v1092_v17 = vmul.f32 1.442695, %v1091_v16 }
 0x777   :  { %v520_v6 = vpop.permute.xlu0 %519 }
 0x778   :  { %v525_v7 = vsel %vm411_vm7, %v520_v6, 0  ;;  %743 = vrot.lane.b32.xlu1 %v4023_v4, %s4611_s30  ;;  %3643 = vpow2.f32 %v1092_v17  ;;  %v870_v4 = vsel %vm341_vm6, %v3640_v18, 0.0 }
 0x779   :  { %3299 = vmatpush3.bf16.msra.mxu0 %v525_v7 }
 0x77a   :  { %3310 = vmatprep.subr.bf16.mxu0 %v3807_v1 }
 0x77d   :  { %v4148_v19 = vpop.eup %3641 }
 0x77e   :  { %v982_v21 = vsel %vm341_vm6, %v4148_v19, 0.0 }
 0x785   :  { %876 = vrot.lane.b32.xlu0 %v4045_v23, %s3809_s24  ;;  %v4152_v22 = vpop.eup %3643 }
 0x786   :  { %v1094_v25 = vsel %vm341_vm6, %v4152_v22, 0.0 }
 0x79c   :  { %871 = vadd.xlane.f32.xlu1 %v870_v4 }
 0x7a0   :  { %983 = vadd.xlane.f32.xlu1 %v982_v21  ;;  %v1202_v3 = vpop.xlane.xlu1 %1201 }
 0x7a1   :  { %v1203_v10 = vsub.f32 %v1199_v45, %v1202_v3 }
 0x7a3   :  { %v1204_v24 = vmul.f32 1.442695, %v1203_v10 }
 0x7a4   :  { %1095 = vadd.xlane.f32.xlu0 %v1094_v25 }
 0x7a5   :  { %3645 = vpow2.f32 %v1204_v24 }
 0x7b2   :  { %v4156_v26 = vpop.eup %3645 }
 0x7b3   :  { %v1206_v27 = vsel %vm341_vm6, %v4156_v26, 0.0 }
 0x7b4   :  { %1207 = vadd.xlane.f32.xlu1 %v1206_v27 }
 0x7ba   :  { %1100 = vrot.lane.b32.xlu0 %v4045_v23, %s4613_s4 }
 0x7be   :  { %1212 = vrot.lane.b32.xlu0 %v4045_v23, %s4611_s30 }
 0x7c5   :  { %988 = vrot.lane.b32.xlu1 %v4045_v23, %s3818_s29 }
 0x7e8   :  { %v515_v28 = vpop.xlane.xlu0 %514 }
 0x7e9   :  { %3647 = vrcp.f32 %v515_v28 }
 0x7f0   :  { %v627_v29 = vpop.xlane.xlu1 %626 }
 0x7f1   :  { %3649 = vrcp.f32 %v627_v29 }
 0x7f4   :  { %v744_v36 = vpop.permute.xlu1 %743 }
 0x7f5   :  { %v749_v38 = vsel %vm411_vm7, %v744_v36, 0 }
 0x7f6   :  { %v3648_v30 = vpop.eup %3647 }
 0x7f7   :  { %v517_v31 = vmul.f32 %v3648_v30, %v3634_v56 }
 0x7f8   :  { %v739_v32 = vpop.xlane.xlu0 %738 }
 0x7f9   :  { %3651 = vrcp.f32 %v739_v32  ;;  %v518_v33 = vpack.c.bf16 %v517_v31, %v517_v31  ;;  %v3606_v31 = vld [vmem:[%s4592_s8] sm:$0xff]  }
 0x7fb   :  { %3301 = vmatmul.mubr.msk.bf16.vlgmr.msra.gmra.mxu0 %vm341_vm6, %v518_v33 }
 0x7fc   :  { %3311 = vmatpush3.bf16.msra.mxu0 %v637_v34  ;;  %3312 = vmatprep.mubr.msk.bf16.mxu0 %vm3808_vm1, %v3807_v1  ;;  %v877_v41 = vpop.permute.xlu0 %876 }
 0x7fd   :  { %3322 = vmatprep.subr.bf16.mxu0 %v3807_v1  ;;  %v882_v43 = vsel %vm411_vm7, %v877_v41, 0 }
 0x7fe   :  { %v3650_v23 = vpop.eup %3649 }
 0x7ff   :  { %v629_v35 = vmul.f32 %v3650_v23, %v3636_v62 }
 0x801   :  { %v630_v37 = vpack.c.bf16 %v629_v35, %v629_v35 }
 0x803   :  { %3313 = vmatmul.mubr.msk.bf16.vlgmr.msra.gmra.mxu0 %vm341_vm6, %v630_v37 }
 0x804   :  { %3323 = vmatpush3.bf16.msra.mxu0 %v749_v38  ;;  %3324 = vmatprep.mubr.msk.bf16.mxu0 %vm3808_vm1, %v3807_v1 }
 0x805   :  { %3334 = vmatprep.subr.bf16.mxu0 %v3807_v1 }
 0x806   :  { %v3652_v39 = vpop.eup %3651 }
 0x807   :  { %v741_v40 = vmul.f32 %v3652_v39, %v4136_v0 }
 0x809   :  { %v742_v42 = vpack.c.bf16 %v741_v40, %v741_v40 }
 0x80b   :  { %3325 = vmatmul.mubr.msk.bf16.vlgmr.msra.gmra.mxu0 %vm341_vm6, %v742_v42 }
 0x80c   :  { %3335 = vmatpush3.bf16.msra.mxu0 %v882_v43  ;;  %3336 = vmatprep.mubr.msk.bf16.mxu0 %vm3808_vm1, %v3807_v1 }
 0x80d   :  { %3346 = vmatprep.subr.bf16.mxu0 %v3807_v1 }
 0x825   :  { %v872_v44 = vpop.xlane.xlu1 %871 }
 0x826   :  { %3653 = vrcp.f32 %v872_v44 }
 0x829   :  { %v984_v45 = vpop.xlane.xlu1 %983 }
 0x82a   :  { %3655 = vrcp.f32 %v984_v45 }
 0x82d   :  { %v1096_v48 = vpop.xlane.xlu0 %1095 }
 0x82e   :  { %3657 = vrcp.f32 %v1096_v48 }
 0x831   :  { %v1101_v56 = vpop.permute.xlu0 %1100 }
 0x832   :  { %v1106_v62 = vsel %vm411_vm7, %v1101_v56, 0 }
 0x833   :  { %v3654_v46 = vpop.eup %3653 }
 0x834   :  { %v874_v47 = vmul.f32 %v3654_v46, %v3640_v18 }
 0x835   :  { %v1213_v0 = vpop.permute.xlu0 %1212 }
 0x836   :  { %v875_v49 = vpack.c.bf16 %v874_v47, %v874_v47  ;;  %v1218_v5 = vsel %vm411_vm7, %v1213_v0, 0 }
 0x837   :  { %v3656_v50 = vpop.eup %3655 }
 0x838   :  { %3337 = vmatmul.mubr.msk.bf16.vlgmr.msra.gmra.mxu0 %vm341_vm6, %v875_v49  ;;  %v986_v53 = vmul.f32 %v3656_v50, %v4148_v19 }
 0x839   :  { %3348 = vmatprep.mubr.msk.bf16.mxu0 %vm3808_vm1, %v3807_v1 }
 0x83a   :  { %v987_v57 = vpack.c.bf16 %v986_v53, %v986_v53 }
 0x83b   :  { %v3658_v61 = vpop.eup %3657 }
 0x83c   :  { %v1098_v63 = vmul.f32 %v3658_v61, %v4152_v22 }
 0x83d   :  { %v1208_v52 = vpop.xlane.xlu1 %1207 }
 0x83e   :  { %3659 = vrcp.f32 %v1208_v52  ;;  %v1099_v58 = vpack.c.bf16 %v1098_v63, %v1098_v63 }
 0x841   :  { %v989_v54 = vpop.permute.xlu1 %988 }
 0x842   :  { %v994_v55 = vsel %vm411_vm7, %v989_v54, 0 }
 0x843   :  { %3347 = vmatpush3.bf16.msra.mxu0 %v994_v55 }
 0x844   :  { %3358 = vmatprep.subr.bf16.mxu0 %v3807_v1 }
 0x846   :  { %3349 = vmatmul.mubr.msk.bf16.vlgmr.msra.gmra.mxu0 %vm341_vm6, %v987_v57 }
 0x847   :  { %3359 = vmatpush3.bf16.msra.mxu0 %v1106_v62  ;;  %3360 = vmatprep.mubr.msk.bf16.mxu0 %vm3808_vm1, %v3807_v1 }
 0x848   :  { %3370 = vmatprep.subr.bf16.mxu0 %v3807_v1 }
 0x84b   :  { %v3660_v2 = vpop.eup %3659 }
 0x84c   :  { %v1210_v6 = vmul.f32 %v3660_v2, %v4156_v26  ;;  %v3605_v26 = vld [vmem:[%s4592_s8 + $0x8] sm:$0xff]  }
 0x84d   :  { %3377 = vmatpush3.bf16.msra.mxu1 %v3605_v26 }
 0x84e   :  { %3361 = vmatmul.mubr.msk.bf16.vlgmr.msra.gmra.mxu0 %vm341_vm6, %v1099_v58  ;;  %v1211_v7 = vpack.c.bf16 %v1210_v6, %v1210_v6  ;;  %3378 = vmatprep.subr.bf16.mxu1 %v3807_v1 }
 0x84f   :  { %3371 = vmatpush3.bf16.msra.mxu0 %v1218_v5  ;;  %3372 = vmatprep.mubr.msk.bf16.mxu0 %vm3808_vm1, %v3807_v1 }
 0x850   :  { %3384 = vmatprep.subr.bf16.mxu0 %v3807_v1 }
 0x851   :  { %3379 = vmatpush3.bf16.msra.mxu1 %v3606_v31 }
 0x852   :  { %3392 = vmatprep.subr.bf16.mxu1 %v3807_v1 }
 0x856   :  { %3373 = vmatmul.mubr.msk.bf16.vlgmr.msra.gmra.mxu0 %vm341_vm6, %v1211_v7 }
 0x857   :  { %3388 = vmatprep.mubr.msk.bf16.mxu0 %vm3808_vm1, %v3807_v1 }
 0x8bb   :  { %v561_v8 = vpop.f32.mrf.mxu0 }
 0x8bd   :  { %v3302_v9 = vpop.f32.mrf.mxu0 }
 0x8bf   :  { %v564_v12 = vpop.f32.mrf.mxu0 }
 0x8c1   :  { %v3303_v13 = vpop.f32.mrf.mxu0 }
 0x8c3   :  { %v673_v14 = vpop.f32.mrf.mxu0 }
 0x8c5   :  { %v3314_v16 = vpop.f32.mrf.mxu0 }
 0x8c7   :  { %v676_v17 = vpop.f32.mrf.mxu0 }
 0x8c9   :  { %v3315_v18 = vpop.f32.mrf.mxu0 }
 0x8cb   :  { %v785_v4 = vpop.f32.mrf.mxu0 }
 0x8cd   :  { %v3326_v19 = vpop.f32.mrf.mxu0 }
 0x8cf   :  { %v788_v20 = vpop.f32.mrf.mxu0 }
 0x8d0   :  { %v3608_v20 = vld [vmem:[%s4596_s12] sm:$0xff]  }
 0x8d1   :  { %v3327_v21 = vpop.f32.mrf.mxu0 }
 0x8f8   :  { %v918_v22 = vpop.f32.mrf.mxu0 }
 0x8fa   :  { %v3338_v3 = vpop.f32.mrf.mxu0 }
 0x8fc   :  { %v921_v10 = vpop.f32.mrf.mxu0 }
 0x8fe   :  { %v3339_v24 = vpop.f32.mrf.mxu0 }
 0x906   :  { %v1030_v25 = vpop.f32.mrf.mxu0 }
 0x907   :  { %v3566_v27 = vpack.i.bf16 %v1030_v25, %v561_v8 }
 0x908   :  { %v3350_v28 = vpop.f32.mrf.mxu0 }
 0x909   :  { %3567 = vrot.lane.b32.xlu1 %v3566_v27, %s4610_s1  ;;  %v3067_v28 = vld [vmem:[%s4594_s10] ss:$0 sm:$0xff] }
 0x90a   :  { %v1033_v29 = vpop.f32.mrf.mxu0 }
 0x90c   :  { %v3351_v30 = vpop.f32.mrf.mxu0 }
 0x90e   :  { %v1142_v32 = vpop.f32.mrf.mxu0 }
 0x90f   :  { %v3571_v33 = vpack.i.bf16 %v1142_v32, %v673_v14  ;;  %v3068_v32 = vld [vmem:[%s4595_s11] ss:$0 sm:$0xff] }
 0x910   :  { %v3362_v34 = vpop.f32.mrf.mxu0 }
 0x911   :  { %3572 = vrot.lane.b32.xlu0 %v3571_v33, %s4609_s22 }
 0x912   :  { %v1145_v23 = vpop.f32.mrf.mxu0 }
 0x914   :  { %v3363_v35 = vpop.f32.mrf.mxu0 }
 0x916   :  { %v1254_v36 = vpop.f32.mrf.mxu0 }
 0x917   :  { %v3576_v37 = vpack.i.bf16 %v1254_v36, %v785_v4  ;;  %v3609_v36 = vld [vmem:[%s4598_s14 + $0x18] sm:$0xff]  }
 0x918   :  { %v3374_v38 = vpop.f32.mrf.mxu0 }
 0x919   :  { %3577 = vrot.lane.b32.xlu1 %v3576_v37, %s4608_s0  ;;  %v3610_v37 = vld [vmem:[%s4598_s14 + $0x10] sm:$0xff]   ;;  %v3611_v38 = vld [vmem:[%s4598_s14 + $0x8] sm:$0xff]  }
 0x91a   :  { %v1257_v39 = vpop.f32.mrf.mxu0 }
 0x91b   :  { %v3612_v39 = vld [vmem:[%s4598_s14] sm:$0xff]  }
 0x91c   :  { %v3375_v40 = vpop.f32.mrf.mxu0 }
 0x91d   :  { %v3069_v40 = vld [vmem:[%s4597_s13] ss:$0 sm:$0xff] }
 0x97b   :  { %v3568_v41 = vpop.permute.xlu1 %3567 }
 0x97c   :  { %v3570_v43 = vunpack.i.h.bf16 %v3568_v41  ;;  %v3569_v44 = vunpack.i.l.bf16 %v3568_v41 }
 0x97e   :  { %v1272_v48 = vsel %vm341_vm6, %v918_v22, %v3570_v43  ;;  %v803_v49 = vsel %vm341_vm6, %v4111_v51, %v3569_v44  ;;  %v3063_v51 = vld [vmem:[%s4593_s9] ss:$0 sm:$0xff] }
 0x983   :  { %v3573_v42 = vpop.permute.xlu0 %3572 }
 0x984   :  { %v3575_v45 = vunpack.i.h.bf16 %v3573_v42  ;;  %v3574_v46 = vunpack.i.l.bf16 %v3573_v42 }
 0x986   :  { %v1273_v53 = vsel %vm804_vm8, %v1272_v48, %v3575_v45  ;;  %v805_v54 = vsel %vm804_vm8, %v803_v49, %v3574_v46 }
 0x98b   :  { %v3578_v47 = vpop.permute.xlu1 %3577 }
 0x98c   :  { %v3580_v50 = vunpack.i.h.bf16 %v3578_v47  ;;  %v3579_v52 = vunpack.i.l.bf16 %v3578_v47 }
 0x98e   :  { %v1274_v55 = vsel %vm806_vm9, %v1273_v53, %v3580_v50  ;;  %v807_v56 = vsel %vm806_vm9, %v805_v54, %v3579_v52 }
 0x98f   :  { %v1275_v57 = vpack.c.bf16 %v1274_v55, %v807_v56 }
 0x991   :  { %3381 = vmatmul.mubr.msk.bf16.vlgmr.msra.gmra.mxu1 %vm224_vm5, %v1275_v57 }
 0x992   :  { %3400 = vmatprep.mubr.msk.bf16.mxu1 %vm3808_vm1, %v3807_v1  ;;  %3393 = vmatpush3.bf16.msra.mxu1 %v3609_v36  ;;  %v3079_v36 = vld [vmem:[%s4600_s16] ss:$0 sm:$0xff] }
 0x993   :  { %3394 = vmatprep.subr.bf16.mxu1 %v3807_v1 }
 0x996   :  { %3395 = vmatpush3.bf16.msra.mxu1 %v3610_v37 }
 0x997   :  { %3396 = vmatprep.subr.bf16.mxu1 %v3807_v1 }
 0x99a   :  { %3397 = vmatpush3.bf16.msra.mxu1 %v3611_v38 }
 0x99b   :  { %3398 = vmatprep.subr.bf16.mxu1 %v3807_v1 }
 0x99e   :  { %3399 = vmatpush3.bf16.msra.mxu1 %v3612_v39 }
 0x99f   :  { %3418 = vmatprep.subr.bf16.mxu1 %v3807_v1 }
 0xa51   :  { %v1336_v61 = vpop.f32.mrf.mxu1 }
 0xa52   :  { %v1337_v62 = vadd.f32 %v3063_v51, %v1336_v61 }
 0xa53   :  { %v3382_v63 = vpop.f32.mrf.mxu1 }
 0xa54   :  { %v1343_v0 = vadd.f32 %v1337_v62, %v4011_v59 }
 0xa55   :  { %v1339_v58 = vpop.f32.mrf.mxu1 }
 0xa56   :  { %v1340_v2 = vadd.f32 %v3063_v51, %v1339_v58  ;;  %v1347_v5 = vsel %vm224_vm5, %v1343_v0, 0.0 }
 0xa57   :  { %1348 = vadd.xlane.f32.xlu0 %v1347_v5  ;;  %v3383_v6 = vpop.f32.mrf.mxu1 }
 0xa58   :  { %v1344_v7 = vadd.f32 %v1340_v2, %v4013_v60  ;;  %v3607_v60 = vld [vmem:[%s4596_s12 + $0x8] sm:$0xff]  }
 0xa59   :  { %3385 = vmatpush3.bf16.msra.mxu0 %v3607_v60 }
 0xa5a   :  { %v1350_v8 = vsel %vm224_vm5, %v1344_v7, 0.0  ;;  %3386 = vmatprep.subr.bf16.mxu0 %v3807_v1 }
 0xa5b   :  { %1351 = vadd.xlane.f32.xlu1 %v1350_v8 }
 0xa5d   :  { %3387 = vmatpush3.bf16.msra.mxu0 %v3608_v20 }
 0xa5e   :  { %3404 = vmatprep.subr.bf16.mxu0 %v3807_v1 }
 0xae0   :  { %v1349_v9 = vpop.xlane.xlu0 %1348 }
 0xae1   :  { %v1353_v12 = vmul.f32 0.03125, %v1349_v9 }
 0xae3   :  { %v1355_v13 = vsub.f32 %v1343_v0, %v1353_v12 }
 0xae4   :  { %v1352_v14 = vpop.xlane.xlu1 %1351 }
 0xae5   :  { %v1354_v16 = vmul.f32 0.03125, %v1352_v14  ;;  %v1357_v17 = vmul.f32 %v1355_v13, %v1355_v13 }
 0xae7   :  { %v1356_v18 = vsub.f32 %v1344_v7, %v1354_v16  ;;  %v1359_v59 = vsel %vm224_vm5, %v1357_v17, 0.0  ;;  %v3073_v7 = vld [vmem:[%s4599_s15] ss:$0 sm:$0xff] }
 0xae8   :  { %1360 = vadd.xlane.f32.xlu0 %v1359_v59 }
 0xae9   :  { %v1358_v4 = vmul.f32 %v1356_v18, %v1356_v18 }
 0xaeb   :  { %v1362_v19 = vsel %vm224_vm5, %v1358_v4, 0.0 }
 0xaec   :  { %1363 = vadd.xlane.f32.xlu0 %v1362_v19 }
 0xb71   :  { %v1361_v21 = vpop.xlane.xlu0 %1360 }
 0xb72   :  { %v1365_v22 = vmul.f32 0.03125, %v1361_v21 }
 0xb74   :  { %v1367_v3 = vadd.f32 1e-12, %v1365_v22 }
 0xb75   :  { %v1364_v10 = vpop.xlane.xlu0 %1363 }
 0xb76   :  { %3661 = vrsqrt.f32 %v1367_v3  ;;  %v1366_v24 = vmul.f32 0.03125, %v1364_v10 }
 0xb78   :  { %v1368_v25 = vadd.f32 1e-12, %v1366_v24 }
 0xb7a   :  { %3663 = vrsqrt.f32 %v1368_v25 }
 0xb83   :  { %v3662_v26 = vpop.eup %3661 }
 0xb84   :  { %v1371_v27 = vmul.f32 %v3662_v26, %v1355_v13 }
 0xb86   :  { %v1379_v31 = vmul.f32 %v3067_v28, %v1371_v27  ;;  %v3613_v27 = vld [vmem:[%s4590_s6 + $0x18] sm:$0xff]  }
 0xb87   :  { %v3664_v29 = vpop.eup %3663 }
 0xb88   :  { %v1372_v30 = vmul.f32 %v3664_v29, %v1356_v18  ;;  %v1387_v34 = vadd.f32 %v3068_v32, %v1379_v31 }
 0xb8a   :  { %v1380_v33 = vmul.f32 %v3067_v28, %v1372_v30  ;;  %v3614_v28 = vld [vmem:[%s4590_s6 + $0x10] sm:$0xff]  }
 0xb8c   :  { %v1388_v23 = vadd.f32 %v3068_v32, %v1380_v33 }
 0xb8e   :  { %v1389_v35 = vpack.c.bf16 %v1388_v23, %v1387_v34 }
 0xb90   :  { %3389 = vmatmul.mubr.msk.bf16.vlgmr.msra.gmra.mxu0 %vm224_vm5, %v1389_v35 }
 0xb91   :  { %3408 = vmatprep.mubr.msk.bf16.mxu0 %vm3808_vm1, %v3807_v1  ;;  %3405 = vmatpush3.bf16.msra.mxu0 %v3613_v27 }
 0xb92   :  { %3406 = vmatprep.subr.bf16.mxu0 %v3807_v1 }
 0xb95   :  { %3407 = vmatpush3.bf16.msra.mxu0 %v3614_v28 }
 0xb96   :  { %3412 = vmatprep.subr.bf16.mxu0 %v3807_v1 }
 0xc50   :  { %v1450_v41 = vpop.f32.mrf.mxu0 }
 0xc51   :  { %v1451_v42 = vadd.f32 %v3069_v40, %v1450_v41 }
 0xc52   :  { %v3390_v43 = vpop.f32.mrf.mxu0 }
 0xc53   :  { %v1459_v44 = vmul.f32 0.044715, %v1451_v42  ;;  %v1457_v63 = vmul.f32 0.5, %v1451_v42 }
 0xc54   :  { %v1453_v45 = vpop.f32.mrf.mxu0 }
 0xc55   :  { %v1461_v46 = vmul.f32 %v1459_v44, %v1451_v42  ;;  %v1454_v47 = vadd.f32 %v3069_v40, %v1453_v45  ;;  %v3080_v40 = vld [vmem:[%s4601_s17] ss:$0 sm:$0xff]  ;;  %v3086_v45 = vld [vmem:[%s4591_s7 + $0x1] ss:$0 sm:$0xff]  ;;  %s4625_s7 = smov 48  }
 0xc56   :  { %v3391_v48 = vpop.f32.mrf.mxu0 }
 0xc57   :  { %v1463_v49 = vmul.f32 %v1461_v46, %v1451_v42  ;;  %v1460_v50 = vmul.f32 0.044715, %v1454_v47  ;;  %v1458_v0 = vmul.f32 0.5, %v1454_v47 }
 0xc59   :  { %v1465_v52 = vadd.f32 %v1463_v49, %v1451_v42  ;;  %v1462_v53 = vmul.f32 %v1460_v50, %v1454_v47 }
 0xc5b   :  { %v1467_v54 = vmul.f32 0.7978846, %v1465_v52  ;;  %v1464_v55 = vmul.f32 %v1462_v53, %v1454_v47 }
 0xc5d   :  { %3665 = vtanh.f32 %v1467_v54  ;;  %v1466_v56 = vadd.f32 %v1464_v55, %v1454_v47 }
 0xc5f   :  { %v1468_v57 = vmul.f32 0.7978846, %v1466_v56 }
 0xc61   :  { %3667 = vtanh.f32 %v1468_v57 }
 0xc6a   :  { %v3666_v51 = vpop.eup %3665 }
 0xc6b   :  { %v1471_v61 = vadd.f32 1.0, %v3666_v51 }
 0xc6d   :  { %v1473_v2 = vmul.f32 %v1471_v61, %v1457_v63 }
 0xc6e   :  { %v3668_v62 = vpop.eup %3667 }
 0xc6f   :  { %v1472_v58 = vadd.f32 1.0, %v3668_v62 }
 0xc71   :  { %v1474_v5 = vmul.f32 %v1472_v58, %v1458_v0 }
 0xc73   :  { %v1475_v6 = vpack.c.bf16 %v1474_v5, %v1473_v2 }
 0xc75   :  { %3401 = vmatmul.mubr.msk.bf16.vlgmr.msra.gmra.mxu1 %vm1515_vm10, %v1475_v6 }
 0xc76   :  { %3420 = vmatprep.mubr.msk.bf16.mxu1 %vm3808_vm1, %v3807_v1 }
 0xd35   :  { %v1553_v8 = vpop.f32.mrf.mxu1 }
 0xd36   :  { %v1554_v9 = vadd.f32 %v3073_v7, %v1553_v8 }
 0xd37   :  { %v3402_v12 = vpop.f32.mrf.mxu1 }
 0xd38   :  { %v1560_v13 = vadd.f32 %v1554_v9, %v1387_v34 }
 0xd39   :  { %v1556_v14 = vpop.f32.mrf.mxu1 }
 0xd3a   :  { %v1557_v16 = vadd.f32 %v3073_v7, %v1556_v14  ;;  %v1564_v17 = vsel %vm224_vm5, %v1560_v13, 0.0 }
 0xd3b   :  { %1565 = vadd.xlane.f32.xlu1 %v1564_v17  ;;  %v3403_v18 = vpop.f32.mrf.mxu1 }
 0xd3c   :  { %v1561_v59 = vadd.f32 %v1557_v16, %v1388_v23 }
 0xd3e   :  { %v1567_v4 = vsel %vm224_vm5, %v1561_v59, 0.0 }
 0xd3f   :  { %1568 = vadd.xlane.f32.xlu0 %v1567_v4 }
 0xdc4   :  { %v1566_v19 = vpop.xlane.xlu1 %1565 }
 0xdc5   :  { %v1570_v60 = vmul.f32 0.03125, %v1566_v19 }
 0xdc7   :  { %v1572_v20 = vsub.f32 %v1560_v13, %v1570_v60 }
 0xdc8   :  { %v1569_v21 = vpop.xlane.xlu0 %1568 }
 0xdc9   :  { %v1571_v22 = vmul.f32 0.03125, %v1569_v21  ;;  %v1574_v3 = vmul.f32 %v1572_v20, %v1572_v20 }
 0xdcb   :  { %v1573_v10 = vsub.f32 %v1561_v59, %v1571_v22  ;;  %v1576_v24 = vsel %vm224_vm5, %v1574_v3, 0.0 }
 0xdcc   :  { %1577 = vadd.xlane.f32.xlu1 %v1576_v24 }
 0xdcd   :  { %v1575_v25 = vmul.f32 %v1573_v10, %v1573_v10 }
 0xdcf   :  { %v1579_v26 = vsel %vm224_vm5, %v1575_v25, 0.0 }
 0xdd0   :  { %1580 = vadd.xlane.f32.xlu0 %v1579_v26 }
 0xe55   :  { %v1578_v29 = vpop.xlane.xlu1 %1577 }
 0xe56   :  { %v1582_v30 = vmul.f32 0.03125, %v1578_v29 }
 0xe58   :  { %v1584_v31 = vadd.f32 1e-12, %v1582_v30 }
 0xe59   :  { %v1581_v32 = vpop.xlane.xlu0 %1580 }
 0xe5a   :  { %3669 = vrsqrt.f32 %v1584_v31  ;;  %v1583_v33 = vmul.f32 0.03125, %v1581_v32 }
 0xe5c   :  { %v1585_v34 = vadd.f32 1e-12, %v1583_v33 }
 0xe5e   :  { %3671 = vrsqrt.f32 %v1585_v34 }
 0xe67   :  { %v3670_v23 = vpop.eup %3669 }
 0xe68   :  { %v1588_v35 = vmul.f32 %v3670_v23, %v1572_v20 }
 0xe6a   :  { %v1596_v39 = vmul.f32 %v3079_v36, %v1588_v35 }
 0xe6b   :  { %v3672_v37 = vpop.eup %3671 }
 0xe6c   :  { %v1589_v38 = vmul.f32 %v3672_v37, %v1573_v10  ;;  %v4293_v42 = vadd.f32 %v3080_v40, %v1596_v39 }
 0xe6e   :  { %v1597_v41 = vmul.f32 %v3079_v36, %v1589_v38 }
 0xe70   :  { %v4295_v43 = vadd.f32 %v3080_v40, %v1597_v41 }
 0xe72   :  { %v1606_v44 = vpack.c.bf16 %v4295_v43, %v4293_v42 }
 0xe74   :  { %3409 = vmatmul.mubr.msk.bf16.vlgmr.msra.gmra.mxu0 %vm224_vm5, %v1606_v44 }
 0xe75   :  { %3414 = vmatprep.mubr.msk.bf16.mxu0 %vm3808_vm1, %v3807_v1 }
 0xf34   :  { %v1669_v46 = vpop.f32.mrf.mxu0 }
 0xf35   :  { %v1670_v47 = vadd.f32 %v3086_v45, %v1669_v46 }
 0xf36   :  { %v3410_v48 = vpop.f32.mrf.mxu0 }
 0xf37   :  { %v4305_v49 = vpack.c.bf16 %v1670_v47, %v1670_v47 }
 0xf38   :  { %v1672_v50 = vpop.f32.mrf.mxu0 }
 0xf39   :  { %1790 = vrot.lane.b32.xlu0 %v4305_v49, %s3814_s26  ;;  %1678 = vrot.lane.b32.xlu1 %v4305_v49, %s3810_s2  ;;  %v1673_v53 = vadd.f32 %v3086_v45, %v1672_v50 }
 0xf3a   :  { %v3411_v52 = vpop.f32.mrf.mxu0 }
 0xf3b   :  { %v4319_v54 = vpack.c.bf16 %v1673_v53, %v1673_v53 }
 0xf3d   :  { %1900 = vrot.lane.b32.xlu0 %v4305_v49, %s3812_s19  ;;  %1788 = vrot.lane.b32.xlu1 %v4305_v49, %s3811_s25 }
 0xf41   :  { %2012 = vrot.lane.b32.xlu0 %v4305_v49, %s3813_s3  ;;  %1902 = vrot.lane.b32.xlu1 %v4305_v49, %s3815_s27 }
 0xf45   :  { %2014 = vrot.lane.b32.xlu1 %v4305_v49, %s3816_s28  ;;  %2253 = vrot.lane.b32.xlu0 %v4319_v54, %s3814_s26 }
 0xf49   :  { %2365 = vrot.lane.b32.xlu0 %v4319_v54, %s3815_s27  ;;  %2141 = vrot.lane.b32.xlu1 %v4319_v54, %s3810_s2  ;;  %s4626_s2 = smov 40   ;;  %s4628_s27 = smov 16  }
 0xf4d   :  { %2477 = vrot.lane.b32.xlu0 %v4319_v54, %s3816_s28  ;;  %2251 = vrot.lane.b32.xlu1 %v4319_v54, %s3811_s25  ;;  %s4629_s28 = smov 24  }
 0xf51   :  { %2363 = vrot.lane.b32.xlu1 %v4319_v54, %s3812_s19  ;;  %s4627_s19 = smov 8  }
 0xf55   :  { %2475 = vrot.lane.b32.xlu1 %v4319_v54, %s3813_s3 }
 0xfab   :  { %v1679_v55 = vpop.permute.xlu1 %1678  ;;  %v1791_v57 = vpop.permute.xlu0 %1790 }
 0xfac   :  { %v1684_v56 = vsel %vm341_vm6, %v1679_v55, 0  ;;  %v1796_v61 = vsel %vm341_vm6, %v1791_v57, 0 }
 0xfad   :  { %3413 = vmatpush3.bf16.xpose.msra.mxu0 %v1684_v56 }
 0xfae   :  { %3424 = vmatprep.subr.bf16.mxu0 %v3807_v1 }
 0xfaf   :  { %v1789_v51 = vpop.permute.xlu1 %1788  ;;  %v1901_v58 = vpop.permute.xlu0 %1900 }
 0xfb3   :  { %v1903_v62 = vpop.permute.xlu1 %1902  ;;  %v2013_v6 = vpop.permute.xlu0 %2012 }
 0xfb4   :  { %3415 = vmatmul.mubr.msk.bf16.vlgmr.msra.gmra.mxu0 %vm341_vm6, %v4305_v49  ;;  %v1908_v63 = vsel %vm341_vm6, %v1903_v62, 0 }
 0xfb5   :  { %3425 = vmatpush3.bf16.xpose.msra.mxu0 %v1796_v61  ;;  %3426 = vmatprep.mubr.msk.bf16.mxu0 %vm3808_vm1, %v3807_v1 }
 0xfb6   :  { %3436 = vmatprep.subr.bf16.mxu0 %v3807_v1 }
 0xfb7   :  { %v2015_v0 = vpop.permute.xlu1 %2014  ;;  %v2254_v8 = vpop.permute.xlu0 %2253 }
 0xfb8   :  { %v2020_v2 = vsel %vm341_vm6, %v2015_v0, 0  ;;  %v2259_v9 = vsel %vm341_vm6, %v2254_v8, 0 }
 0xfbb   :  { %v2142_v5 = vpop.permute.xlu1 %2141  ;;  %v2366_v12 = vpop.permute.xlu0 %2365 }
 0xfbc   :  { %3427 = vmatmul.mubr.msk.bf16.vlgmr.msra.gmra.mxu0 %vm341_vm6, %v1789_v51  ;;  %v2147_v7 = vsel %vm341_vm6, %v2142_v5, 0  ;;  %v2371_v14 = vsel %vm341_vm6, %v2366_v12, 0 }
 0xfbd   :  { %3437 = vmatpush3.bf16.xpose.msra.mxu0 %v1908_v63  ;;  %3438 = vmatprep.mubr.msk.bf16.mxu0 %vm3808_vm1, %v3807_v1 }
 0xfbe   :  { %3448 = vmatprep.subr.bf16.mxu0 %v3807_v1 }
 0xfbf   :  { %v2252_v13 = vpop.permute.xlu1 %2251  ;;  %v2478_v16 = vpop.permute.xlu0 %2477 }
 0xfc0   :  { %v2483_v18 = vsel %vm341_vm6, %v2478_v16, 0 }
 0xfc3   :  { %v2364_v17 = vpop.permute.xlu1 %2363 }
 0xfc4   :  { %3439 = vmatmul.mubr.msk.bf16.vlgmr.msra.gmra.mxu0 %vm341_vm6, %v1901_v58 }
 0xfc5   :  { %3449 = vmatpush3.bf16.xpose.msra.mxu0 %v2020_v2  ;;  %3450 = vmatprep.mubr.msk.bf16.mxu0 %vm3808_vm1, %v3807_v1 }
 0xfc6   :  { %3460 = vmatprep.subr.bf16.mxu0 %v3807_v1 }
 0xfc7   :  { %v2476_v59 = vpop.permute.xlu1 %2475 }
 0xfcc   :  { %3451 = vmatmul.mubr.msk.bf16.vlgmr.msra.gmra.mxu0 %vm341_vm6, %v2013_v6 }
 0xfcd   :  { %3461 = vmatpush3.bf16.xpose.msra.mxu0 %v2147_v7  ;;  %3462 = vmatprep.mubr.msk.bf16.mxu0 %vm3808_vm1, %v3807_v1 }
 0xfce   :  { %3472 = vmatprep.subr.bf16.mxu0 %v3807_v1 }
 0xfd4   :  { %3463 = vmatmul.mubr.msk.bf16.vlgmr.msra.gmra.mxu0 %vm341_vm6, %v4319_v54 }
 0xfd5   :  { %3473 = vmatpush3.bf16.xpose.msra.mxu0 %v2259_v9  ;;  %3474 = vmatprep.mubr.msk.bf16.mxu0 %vm3808_vm1, %v3807_v1 }
 0xfd6   :  { %3484 = vmatprep.subr.bf16.mxu0 %v3807_v1 }
 0xfdc   :  { %3475 = vmatmul.mubr.msk.bf16.vlgmr.msra.gmra.mxu0 %vm341_vm6, %v2252_v13 }
 0xfdd   :  { %3485 = vmatpush3.bf16.xpose.msra.mxu0 %v2371_v14  ;;  %3486 = vmatprep.mubr.msk.bf16.mxu0 %vm3808_vm1, %v3807_v1 }
 0xfde   :  { %3496 = vmatprep.subr.bf16.mxu0 %v3807_v1 }
 0xfe4   :  { %3487 = vmatmul.mubr.msk.bf16.vlgmr.msra.gmra.mxu0 %vm341_vm6, %v2364_v17 }
 0xfe5   :  { %3497 = vmatpush3.bf16.xpose.msra.mxu0 %v2483_v18  ;;  %3498 = vmatprep.mubr.msk.bf16.mxu0 %vm3808_vm1, %v3807_v1 }
 0xfe6   :  { %3508 = vmatprep.subr.bf16.mxu0 %v3807_v1 }
 0xfec   :  { %3499 = vmatmul.mubr.msk.bf16.vlgmr.msra.gmra.mxu0 %vm341_vm6, %v2476_v59 }
 0xfed   :  { %3512 = vmatprep.mubr.msk.bf16.mxu0 %vm3808_vm1, %v3807_v1 }
0x1074   :  { %v1720_v4 = vpop.f32.mrf.mxu0 }
0x1075   :  { %v1726_v19 = vmul.f32 0.35355338, %v1720_v4 }
0x1076   :  { %v3416_v60 = vpop.f32.mrf.mxu0 }
0x1077   :  { %v4380_v20 = vadd.f32 %v1726_v19, %v4039_v15 }
0x1078   :  { %v1723_v21 = vpop.f32.mrf.mxu0 }
0x1079   :  { %v1728_v22 = vsel %vm341_vm6, %v4380_v20, -inf }
0x107a   :  { %1729 = vmax.xlane.f32.xlu0 %v1728_v22  ;;  %v3417_v3 = vpop.f32.mrf.mxu0 }
0x107c   :  { %v1832_v10 = vpop.f32.mrf.mxu0 }
0x107d   :  { %v1838_v24 = vmul.f32 0.35355338, %v1832_v10 }
0x107e   :  { %v3428_v25 = vpop.f32.mrf.mxu0 }
0x107f   :  { %v1839_v26 = vadd.f32 %v1838_v24, %v4039_v15 }
0x1080   :  { %v1835_v27 = vpop.f32.mrf.mxu0 }
0x1081   :  { %v1840_v28 = vsel %vm341_vm6, %v1839_v26, -inf }
0x1082   :  { %1841 = vmax.xlane.f32.xlu1 %v1840_v28  ;;  %v3429_v29 = vpop.f32.mrf.mxu0 }
0x1084   :  { %v1944_v30 = vpop.f32.mrf.mxu0 }
0x1085   :  { %v1950_v31 = vmul.f32 0.35355338, %v1944_v30 }
0x1086   :  { %v3440_v32 = vpop.f32.mrf.mxu0 }
0x1087   :  { %v1951_v33 = vadd.f32 %v1950_v31, %v4039_v15 }
0x1088   :  { %v1947_v34 = vpop.f32.mrf.mxu0 }
0x1089   :  { %v1952_v23 = vsel %vm341_vm6, %v1951_v33, -inf }
0x108a   :  { %1953 = vmax.xlane.f32.xlu0 %v1952_v23  ;;  %v3441_v35 = vpop.f32.mrf.mxu0 }
0x108c   :  { %v2056_v36 = vpop.f32.mrf.mxu0 }
0x108d   :  { %v2062_v37 = vmul.f32 0.35355338, %v2056_v36 }
0x108e   :  { %v3452_v38 = vpop.f32.mrf.mxu0 }
0x108f   :  { %v4389_v39 = vadd.f32 %v2062_v37, %v4039_v15 }
0x1090   :  { %v2059_v40 = vpop.f32.mrf.mxu0 }
0x1091   :  { %v2064_v41 = vsel %vm341_vm6, %v4389_v39, -inf }
0x1092   :  { %2065 = vmax.xlane.f32.xlu0 %v2064_v41  ;;  %v3453_v44 = vpop.f32.mrf.mxu0 }
0x1094   :  { %v2183_v45 = vpop.f32.mrf.mxu0 }
0x1095   :  { %v2189_v46 = vmul.f32 0.35355338, %v2183_v45 }
0x1096   :  { %v3464_v47 = vpop.f32.mrf.mxu0 }
0x1097   :  { %v4394_v48 = vadd.f32 %v2189_v46, %v3962_v11 }
0x1098   :  { %v2186_v50 = vpop.f32.mrf.mxu0 }
0x1099   :  { %v2191_v52 = vsel %vm341_vm6, %v4394_v48, -inf }
0x109a   :  { %2192 = vmax.xlane.f32.xlu1 %v2191_v52  ;;  %v3465_v53 = vpop.f32.mrf.mxu0 }
0x109c   :  { %v2295_v15 = vpop.f32.mrf.mxu0 }
0x109d   :  { %v2301_v55 = vmul.f32 0.35355338, %v2295_v15 }
0x109e   :  { %v3476_v56 = vpop.f32.mrf.mxu0 }
0x109f   :  { %v2302_v57 = vadd.f32 %v2301_v55, %v3962_v11 }
0x10a0   :  { %v2298_v51 = vpop.f32.mrf.mxu0 }
0x10a1   :  { %v2303_v61 = vsel %vm341_vm6, %v2302_v57, -inf }
0x10a2   :  { %2304 = vmax.xlane.f32.xlu0 %v2303_v61  ;;  %v3477_v62 = vpop.f32.mrf.mxu0 }
0x10a4   :  { %v2407_v63 = vpop.f32.mrf.mxu0 }
0x10a5   :  { %v2413_v0 = vmul.f32 0.35355338, %v2407_v63 }
0x10a6   :  { %v3488_v58 = vpop.f32.mrf.mxu0 }
0x10a7   :  { %v2414_v2 = vadd.f32 %v2413_v0, %v3962_v11 }
0x10a8   :  { %v2410_v5 = vpop.f32.mrf.mxu0 }
0x10a9   :  { %v2415_v6 = vsel %vm341_vm6, %v2414_v2, -inf }
0x10aa   :  { %2416 = vmax.xlane.f32.xlu1 %v2415_v6  ;;  %v3489_v7 = vpop.f32.mrf.mxu0 }
0x10ac   :  { %v2519_v8 = vpop.f32.mrf.mxu0 }
0x10ad   :  { %v2525_v14 = vmul.f32 0.35355338, %v2519_v8 }
0x10ae   :  { %v3500_v9 = vpop.f32.mrf.mxu0 }
0x10af   :  { %v2526_v16 = vadd.f32 %v2525_v14, %v3962_v11 }
0x10b0   :  { %v2522_v12 = vpop.f32.mrf.mxu0 }
0x10b1   :  { %v2527_v17 = vsel %vm341_vm6, %v2526_v16, -inf }
0x10b2   :  { %v3501_v13 = vpop.f32.mrf.mxu0 }
0x10b8   :  { %1852 = vrot.lane.b32.xlu0 %v4305_v49, %s3818_s29 }
0x10bb   :  { %1740 = vrot.lane.b32.xlu1 %v4305_v49, %s3809_s24 }
0x10d7   :  { %2528 = vmax.xlane.f32.xlu0 %v2527_v17 }
0x1103   :  { %v1730_v18 = vpop.xlane.xlu0 %1729 }
0x1104   :  { %v1731_v59 = vsub.f32 %v4380_v20, %v1730_v18 }
0x1106   :  { %v1732_v4 = vmul.f32 1.442695, %v1731_v59 }
0x1108   :  { %3673 = vpow2.f32 %v1732_v4 }
0x110b   :  { %v1842_v19 = vpop.xlane.xlu1 %1841 }
0x110c   :  { %v1843_v60 = vsub.f32 %v1839_v26, %v1842_v19 }
0x110e   :  { %v1844_v21 = vmul.f32 1.442695, %v1843_v60 }
0x1110   :  { %3675 = vpow2.f32 %v1844_v21 }
0x1113   :  { %v1954_v22 = vpop.xlane.xlu0 %1953 }
0x1114   :  { %v1955_v3 = vsub.f32 %v1951_v33, %v1954_v22 }
0x1115   :  { %v3674_v10 = vpop.eup %3673 }
0x1116   :  { %v1956_v24 = vmul.f32 1.442695, %v1955_v3  ;;  %v1734_v25 = vsel %vm341_vm6, %v3674_v10, 0.0 }
0x1117   :  { %1735 = vadd.xlane.f32.xlu1 %v1734_v25 }
0x1118   :  { %3677 = vpow2.f32 %v1956_v24 }
0x111b   :  { %v2066_v31 = vpop.xlane.xlu0 %2065 }
0x111c   :  { %v2067_v33 = vsub.f32 %v4389_v39, %v2066_v31 }
0x111d   :  { %v4410_v11 = vpop.eup %3675 }
0x111e   :  { %v1846_v27 = vsel %vm341_vm6, %v4410_v11, 0.0  ;;  %v2068_v34 = vmul.f32 1.442695, %v2067_v33 }
0x111f   :  { %1847 = vadd.xlane.f32.xlu0 %v1846_v27 }
0x1120   :  { %3679 = vpow2.f32 %v2068_v34 }
0x1123   :  { %v2193_v28 = vpop.xlane.xlu1 %2192 }
0x1124   :  { %v2194_v23 = vsub.f32 %v4394_v48, %v2193_v28 }
0x1125   :  { %v4414_v20 = vpop.eup %3677 }
0x1126   :  { %v1958_v26 = vsel %vm341_vm6, %v4414_v20, 0.0  ;;  %v2195_v37 = vmul.f32 1.442695, %v2194_v23 }
0x1127   :  { %1959 = vadd.xlane.f32.xlu1 %v1958_v26 }
0x1128   :  { %3681 = vpow2.f32 %v2195_v37 }
0x112b   :  { %v2305_v35 = vpop.xlane.xlu0 %2304 }
0x112c   :  { %v2306_v36 = vsub.f32 %v2302_v57, %v2305_v35 }
0x112d   :  { %v3680_v44 = vpop.eup %3679 }
0x112e   :  { %v2307_v40 = vmul.f32 1.442695, %v2306_v36 }
0x112f   :  { %v1853_v52 = vpop.permute.xlu0 %1852 }
0x1130   :  { %3683 = vpow2.f32 %v2307_v40 }
0x1133   :  { %v2417_v29 = vpop.xlane.xlu1 %2416 }
0x1134   :  { %v2418_v38 = vsub.f32 %v2414_v2, %v2417_v29  ;;  %v1858_v2 = vsel %vm411_vm7, %v1853_v52, 0 }
0x1135   :  { %1964 = vrot.lane.b32.xlu0 %v4305_v49, %s4625_s7  ;;  %v4427_v45 = vpop.eup %3681 }
0x1136   :  { %v2419_v41 = vmul.f32 1.442695, %v2418_v38  ;;  %v2197_v46 = vsel %vm341_vm6, %v4427_v45, 0.0 }
0x1137   :  { %v1741_v30 = vpop.permute.xlu1 %1740 }
0x1138   :  { %v1746_v32 = vsel %vm411_vm7, %v1741_v30, 0  ;;  %2076 = vrot.lane.b32.xlu1 %v4305_v49, %s4626_s2  ;;  %3685 = vpow2.f32 %v2419_v41  ;;  %v2070_v49 = vsel %vm341_vm6, %v3680_v44, 0.0 }
0x1139   :  { %3419 = vmatpush3.bf16.msra.mxu1 %v1746_v32 }
0x113a   :  { %3430 = vmatprep.subr.bf16.mxu1 %v3807_v1 }
0x113d   :  { %v4429_v39 = vpop.eup %3683 }
0x113e   :  { %v2309_v48 = vsel %vm341_vm6, %v4429_v39, 0.0 }
0x1145   :  { %v4433_v47 = vpop.eup %3685 }
0x1146   :  { %v2421_v50 = vsel %vm341_vm6, %v4433_v47, 0.0 }
0x1154   :  { %2071 = vadd.xlane.f32.xlu0 %v2070_v49 }
0x1158   :  { %2198 = vadd.xlane.f32.xlu0 %v2197_v46 }
0x115c   :  { %2310 = vadd.xlane.f32.xlu1 %v2309_v48  ;;  %2422 = vadd.xlane.f32.xlu0 %v2421_v50 }
0x1160   :  { %v2529_v53 = vpop.xlane.xlu0 %2528 }
0x1161   :  { %v2530_v15 = vsub.f32 %v2526_v16, %v2529_v53 }
0x1163   :  { %v2531_v55 = vmul.f32 1.442695, %v2530_v15 }
0x1165   :  { %3687 = vpow2.f32 %v2531_v55 }
0x116d   :  { %2315 = vrot.lane.b32.xlu1 %v4319_v54, %s3818_s29 }
0x1171   :  { %2427 = vrot.lane.b32.xlu1 %v4319_v54, %s4625_s7 }
0x1172   :  { %v4443_v56 = vpop.eup %3687 }
0x1173   :  { %v2533_v57 = vsel %vm341_vm6, %v4443_v56, 0.0 }
0x1174   :  { %2534 = vadd.xlane.f32.xlu0 %v2533_v57 }
0x1175   :  { %2539 = vrot.lane.b32.xlu1 %v4319_v54, %s4626_s2 }
0x118a   :  { %2203 = vrot.lane.b32.xlu0 %v4319_v54, %s3809_s24 }
0x11a0   :  { %v1736_v51 = vpop.xlane.xlu1 %1735 }
0x11a1   :  { %3689 = vrcp.f32 %v1736_v51 }
0x11a8   :  { %v1848_v61 = vpop.xlane.xlu0 %1847 }
0x11a9   :  { %3691 = vrcp.f32 %v1848_v61 }
0x11ac   :  { %v1965_v6 = vpop.permute.xlu0 %1964 }
0x11ad   :  { %v1970_v8 = vsel %vm411_vm7, %v1965_v6, 0 }
0x11ae   :  { %v3690_v62 = vpop.eup %3689 }
0x11af   :  { %v1738_v63 = vmul.f32 %v3690_v62, %v3674_v10 }
0x11b0   :  { %v1960_v0 = vpop.xlane.xlu1 %1959 }
0x11b1   :  { %3693 = vrcp.f32 %v1960_v0  ;;  %v1739_v58 = vpack.c.bf16 %v1738_v63, %v1738_v63 }
0x11b3   :  { %3421 = vmatmul.mubr.msk.bf16.vlgmr.msra.gmra.mxu1 %vm341_vm6, %v1739_v58  ;;  %v3615_v58 = vld [vmem:[%s4592_s8 + $0x18] sm:$0xff]  }
0x11b4   :  { %3431 = vmatpush3.bf16.msra.mxu1 %v1858_v2  ;;  %3432 = vmatprep.mubr.msk.bf16.mxu1 %vm3808_vm1, %v3807_v1  ;;  %v2077_v13 = vpop.permute.xlu1 %2076 }
0x11b5   :  { %3442 = vmatprep.subr.bf16.mxu1 %v3807_v1  ;;  %v2082_v16 = vsel %vm411_vm7, %v2077_v13, 0  ;;  %3509 = vmatpush3.bf16.msra.mxu0 %v3615_v58  ;;  %v3117_v58 = vld [vmem:[%s4594_s10 + $0x1] ss:$0 sm:$0xff] }
0x11b6   :  { %v3692_v54 = vpop.eup %3691  ;;  %3510 = vmatprep.subr.bf16.mxu0 %v3807_v1 }
0x11b7   :  { %v1850_v5 = vmul.f32 %v3692_v54, %v4410_v11 }
0x11b9   :  { %v1851_v7 = vpack.c.bf16 %v1850_v5, %v1850_v5 }
0x11bb   :  { %3433 = vmatmul.mubr.msk.bf16.vlgmr.msra.gmra.mxu1 %vm341_vm6, %v1851_v7  ;;  %v3616_v7 = vld [vmem:[%s4592_s8 + $0x10] sm:$0xff]  }
0x11bc   :  { %3443 = vmatpush3.bf16.msra.mxu1 %v1970_v8  ;;  %3444 = vmatprep.mubr.msk.bf16.mxu1 %vm3808_vm1, %v3807_v1 }
0x11bd   :  { %3454 = vmatprep.subr.bf16.mxu1 %v3807_v1  ;;  %3511 = vmatpush3.bf16.msra.mxu0 %v3616_v7 }
0x11be   :  { %v3694_v9 = vpop.eup %3693  ;;  %3524 = vmatprep.subr.bf16.mxu0 %v3807_v1 }
0x11bf   :  { %v1962_v12 = vmul.f32 %v3694_v9, %v4414_v20 }
0x11c1   :  { %v1963_v14 = vpack.c.bf16 %v1962_v12, %v1962_v12 }
0x11c3   :  { %3445 = vmatmul.mubr.msk.bf16.vlgmr.msra.gmra.mxu1 %vm341_vm6, %v1963_v14 }
0x11c4   :  { %3455 = vmatpush3.bf16.msra.mxu1 %v2082_v16  ;;  %3456 = vmatprep.mubr.msk.bf16.mxu1 %vm3808_vm1, %v3807_v1 }
0x11c5   :  { %3466 = vmatprep.subr.bf16.mxu1 %v3807_v1 }
0x11dd   :  { %v2072_v17 = vpop.xlane.xlu0 %2071 }
0x11de   :  { %3695 = vrcp.f32 %v2072_v17 }
0x11e1   :  { %v2199_v4 = vpop.xlane.xlu0 %2198 }
0x11e2   :  { %3697 = vrcp.f32 %v2199_v4 }
0x11e5   :  { %v2311_v60 = vpop.xlane.xlu1 %2310  ;;  %v2423_v21 = vpop.xlane.xlu0 %2422 }
0x11e6   :  { %3699 = vrcp.f32 %v2311_v60 }
0x11e7   :  { %3701 = vrcp.f32 %v2423_v21 }
0x11e9   :  { %v2316_v11 = vpop.permute.xlu1 %2315 }
0x11ea   :  { %v2321_v26 = vsel %vm411_vm7, %v2316_v11, 0 }
0x11eb   :  { %v3696_v18 = vpop.eup %3695 }
0x11ec   :  { %v2074_v59 = vmul.f32 %v3696_v18, %v3680_v44 }
0x11ed   :  { %v2428_v29 = vpop.permute.xlu1 %2427 }
0x11ee   :  { %v2075_v19 = vpack.c.bf16 %v2074_v59, %v2074_v59  ;;  %v2433_v32 = vsel %vm411_vm7, %v2428_v29, 0 }
0x11ef   :  { %v3698_v22 = vpop.eup %3697 }
0x11f0   :  { %3457 = vmatmul.mubr.msk.bf16.vlgmr.msra.gmra.mxu1 %vm341_vm6, %v2075_v19  ;;  %v2201_v10 = vmul.f32 %v3698_v22, %v4427_v45 }
0x11f1   :  { %3468 = vmatprep.mubr.msk.bf16.mxu1 %vm3808_vm1, %v3807_v1  ;;  %v2540_v34 = vpop.permute.xlu1 %2539 }
0x11f2   :  { %v2202_v27 = vpack.c.bf16 %v2201_v10, %v2201_v10  ;;  %v2545_v36 = vsel %vm411_vm7, %v2540_v34, 0 }
0x11f3   :  { %v3700_v20 = vpop.eup %3699 }
0x11f4   :  { %v2313_v28 = vmul.f32 %v3700_v20, %v4429_v39  ;;  %v3702_v31 = vpop.eup %3701 }
0x11f5   :  { %v2425_v33 = vmul.f32 %v3702_v31, %v4433_v47 }
0x11f6   :  { %v2314_v30 = vpack.c.bf16 %v2313_v28, %v2313_v28 }
0x11f7   :  { %v2426_v23 = vpack.c.bf16 %v2425_v33, %v2425_v33 }
0x11fd   :  { %v2535_v3 = vpop.xlane.xlu0 %2534 }
0x11fe   :  { %3703 = vrcp.f32 %v2535_v3 }
0x1201   :  { %v2204_v24 = vpop.permute.xlu0 %2203 }
0x1202   :  { %v2209_v25 = vsel %vm411_vm7, %v2204_v24, 0 }
0x1203   :  { %3467 = vmatpush3.bf16.msra.mxu1 %v2209_v25 }
0x1204   :  { %3478 = vmatprep.subr.bf16.mxu1 %v3807_v1 }
0x1206   :  { %3469 = vmatmul.mubr.msk.bf16.vlgmr.msra.gmra.mxu1 %vm341_vm6, %v2202_v27 }
0x1207   :  { %3479 = vmatpush3.bf16.msra.mxu1 %v2321_v26  ;;  %3480 = vmatprep.mubr.msk.bf16.mxu1 %vm3808_vm1, %v3807_v1 }
0x1208   :  { %3490 = vmatprep.subr.bf16.mxu1 %v3807_v1 }
0x120b   :  { %v3704_v35 = vpop.eup %3703 }
0x120c   :  { %v2537_v37 = vmul.f32 %v3704_v35, %v4443_v56 }
0x120e   :  { %3481 = vmatmul.mubr.msk.bf16.vlgmr.msra.gmra.mxu1 %vm341_vm6, %v2314_v30  ;;  %v2538_v38 = vpack.c.bf16 %v2537_v37, %v2537_v37 }
0x120f   :  { %3491 = vmatpush3.bf16.msra.mxu1 %v2433_v32  ;;  %3492 = vmatprep.mubr.msk.bf16.mxu1 %vm3808_vm1, %v3807_v1  ;;  %v3111_v32 = vld [vmem:[%s4593_s9 + $0x1] ss:$0 sm:$0xff]  ;;  %s3823_s9 = smov [#allocation8]  }
0x1210   :  { %3502 = vmatprep.subr.bf16.mxu1 %v3807_v1  ;;  %s3021_s21 = sshll.u32 %s3823_s9, 4  ;;  %s3022_s21 = int_to_ptr.vmem [resolvable:$true] %s3021_s21 }
0x1211   :  { %p3782_p2 = scmp.lt.s32.totalorder %s3022_s21, %s3022_s21 }
0x1216   :  { %3493 = vmatmul.mubr.msk.bf16.vlgmr.msra.gmra.mxu1 %vm341_vm6, %v2426_v23 }
0x1217   :  { %3503 = vmatpush3.bf16.msra.mxu1 %v2545_v36  ;;  %3504 = vmatprep.mubr.msk.bf16.mxu1 %vm3808_vm1, %v3807_v1 }
0x1218   :  { %3516 = vmatprep.subr.bf16.mxu1 %v3807_v1 }
0x121e   :  { %3505 = vmatmul.mubr.msk.bf16.vlgmr.msra.gmra.mxu1 %vm341_vm6, %v2538_v38 }
0x121f   :  { %3520 = vmatprep.mubr.msk.bf16.mxu1 %vm3808_vm1, %v3807_v1 }
0x1273   :  { %v1782_v40 = vpop.f32.mrf.mxu1 }
0x1275   :  { %v3422_v41 = vpop.f32.mrf.mxu1 }
0x1277   :  { %v1785_v44 = vpop.f32.mrf.mxu1 }
0x1279   :  { %v3423_v49 = vpop.f32.mrf.mxu1 }
0x127b   :  { %v1894_v45 = vpop.f32.mrf.mxu1 }
0x127d   :  { %v3434_v39 = vpop.f32.mrf.mxu1 }
0x127f   :  { %v1897_v46 = vpop.f32.mrf.mxu1 }
0x1281   :  { %v3435_v47 = vpop.f32.mrf.mxu1 }
0x1283   :  { %v2006_v48 = vpop.f32.mrf.mxu1 }
0x1285   :  { %v3446_v50 = vpop.f32.mrf.mxu1 }
0x1287   :  { %v2009_v52 = vpop.f32.mrf.mxu1 }
0x1289   :  { %v3447_v53 = vpop.f32.mrf.mxu1 }
0x12b0   :  { %v2118_v15 = vpop.f32.mrf.mxu1 }
0x12b2   :  { %v3458_v55 = vpop.f32.mrf.mxu1 }
0x12b4   :  { %v2121_v56 = vpop.f32.mrf.mxu1 }
0x12b6   :  { %v3459_v57 = vpop.f32.mrf.mxu1 }
0x12c6   :  { %v2245_v51 = vpop.f32.mrf.mxu1 }
0x12c8   :  { %v3470_v61 = vpop.f32.mrf.mxu1 }
0x12ca   :  { %v2248_v62 = vpop.f32.mrf.mxu1 }
0x12cc   :  { %v3471_v63 = vpop.f32.mrf.mxu1 }
0x12ce   :  { %v2357_v0 = vpop.f32.mrf.mxu1 }
0x12cf   :  { %v3581_v2 = vpack.i.bf16 %v2357_v0, %v1894_v45 }
0x12d0   :  { %v3482_v54 = vpop.f32.mrf.mxu1 }
0x12d1   :  { %3582 = vrot.lane.b32.xlu1 %v3581_v2, %s4627_s19 }
0x12d2   :  { %v2360_v5 = vpop.f32.mrf.mxu1 }
0x12d4   :  { %v3483_v6 = vpop.f32.mrf.mxu1 }
0x12d5   :  { %v3118_v6 = vld [vmem:[%s4595_s11 + $0x1] ss:$0 sm:$0xff] }
0x12d6   :  { %v2469_v8 = vpop.f32.mrf.mxu1 }
0x12d7   :  { %v3586_v9 = vpack.i.bf16 %v2469_v8, %v2006_v48 }
0x12d8   :  { %v3494_v12 = vpop.f32.mrf.mxu1 }
0x12d9   :  { %3587 = vrot.lane.b32.xlu1 %v3586_v9, %s4628_s27 }
0x12da   :  { %v2472_v13 = vpop.f32.mrf.mxu1 }
0x12db   :  { %v3619_v13 = vld [vmem:[%s4598_s14 + $0x38] sm:$0xff]  }
0x12dc   :  { %v3495_v14 = vpop.f32.mrf.mxu1 }
0x12dd   :  { %v3620_v14 = vld [vmem:[%s4598_s14 + $0x30] sm:$0xff]  }
0x12de   :  { %v2581_v16 = vpop.f32.mrf.mxu1 }
0x12df   :  { %v3591_v17 = vpack.i.bf16 %v2581_v16, %v2118_v15  ;;  %v3618_v15 = vld [vmem:[%s4596_s12 + $0x10] sm:$0xff]   ;;  %v3621_v16 = vld [vmem:[%s4598_s14 + $0x28] sm:$0xff]  }
0x12e0   :  { %v3506_v18 = vpop.f32.mrf.mxu1 }
0x12e1   :  { %3592 = vrot.lane.b32.xlu0 %v3591_v17, %s4629_s28  ;;  %v3622_v17 = vld [vmem:[%s4598_s14 + $0x20] sm:$0xff]  }
0x12e2   :  { %v2584_v59 = vpop.f32.mrf.mxu1  ;;  %v3124_v18 = vld [vmem:[%s4597_s13 + $0x1] ss:$0 sm:$0xff] }
0x12e4   :  { %v3507_v4 = vpop.f32.mrf.mxu1 }
0x1343   :  { %v3583_v19 = vpop.permute.xlu1 %3582 }
0x1344   :  { %v3585_v21 = vunpack.i.h.bf16 %v3583_v19  ;;  %v3584_v22 = vunpack.i.l.bf16 %v3583_v19 }
0x1346   :  { %v2599_v25 = vsel %vm341_vm6, %v2245_v51, %v3585_v21  ;;  %v2136_v11 = vsel %vm341_vm6, %v1782_v40, %v3584_v22 }
0x134b   :  { %v3588_v60 = vpop.permute.xlu1 %3587 }
0x134c   :  { %v3590_v3 = vunpack.i.h.bf16 %v3588_v60  ;;  %v3589_v10 = vunpack.i.l.bf16 %v3588_v60 }
0x134e   :  { %v2600_v26 = vsel %vm804_vm8, %v2599_v25, %v3590_v3  ;;  %v2137_v28 = vsel %vm804_vm8, %v2136_v11, %v3589_v10 }
0x1353   :  { %v3593_v24 = vpop.permute.xlu0 %3592 }
0x1354   :  { %v3595_v27 = vunpack.i.h.bf16 %v3593_v24  ;;  %v3594_v20 = vunpack.i.l.bf16 %v3593_v24 }
0x1356   :  { %v2601_v29 = vsel %vm806_vm9, %v2600_v26, %v3595_v27  ;;  %v2138_v30 = vsel %vm806_vm9, %v2137_v28, %v3594_v20 }
0x1357   :  { %v2602_v31 = vpack.c.bf16 %v2601_v29, %v2138_v30 }
0x1359   :  { %3513 = vmatmul.mubr.msk.bf16.vlgmr.msra.gmra.mxu0 %vm224_vm5, %v2602_v31 }
0x135a   :  { %3532 = vmatprep.mubr.msk.bf16.mxu0 %vm3808_vm1, %v3807_v1  ;;  %3525 = vmatpush3.bf16.msra.mxu0 %v3619_v13 }
0x135b   :  { %3526 = vmatprep.subr.bf16.mxu0 %v3807_v1 }
0x135e   :  { %3527 = vmatpush3.bf16.msra.mxu0 %v3620_v14 }
0x135f   :  { %3528 = vmatprep.subr.bf16.mxu0 %v3807_v1 }
0x1362   :  { %3529 = vmatpush3.bf16.msra.mxu0 %v3621_v16 }
0x1363   :  { %3530 = vmatprep.subr.bf16.mxu0 %v3807_v1 }
0x1366   :  { %3531 = vmatpush3.bf16.msra.mxu0 %v3622_v17 }
0x1419   :  { %v2665_v33 = vpop.f32.mrf.mxu0 }
0x141a   :  { %v2666_v34 = vadd.f32 %v3111_v32, %v2665_v33 }
0x141b   :  { %v3514_v23 = vpop.f32.mrf.mxu0 }
0x141c   :  { %v2672_v35 = vadd.f32 %v2666_v34, %v4293_v42 }
0x141d   :  { %v2668_v36 = vpop.f32.mrf.mxu0 }
0x141e   :  { %v2669_v37 = vadd.f32 %v3111_v32, %v2668_v36  ;;  %v2678_v38 = vsel %vm224_vm5, %v2672_v35, 0.0 }
0x141f   :  { %2679 = vadd.xlane.f32.xlu1 %v2678_v38  ;;  %v3515_v40 = vpop.f32.mrf.mxu0  ;;  %v3137_v38 = vld [vmem:[%s4599_s15 + $0x1] ss:$0 sm:$0xff] }
0x1420   :  { %v2673_v41 = vadd.f32 %v2669_v37, %v4295_v43  ;;  %v3617_v43 = vld [vmem:[%s4596_s12 + $0x18] sm:$0xff]  }
0x1421   :  { %3517 = vmatpush3.bf16.msra.mxu1 %v3617_v43 }
0x1422   :  { %v2681_v44 = vsel %vm224_vm5, %v2673_v41, 0.0  ;;  %3518 = vmatprep.subr.bf16.mxu1 %v3807_v1 }
0x1423   :  { %2682 = vadd.xlane.f32.xlu0 %v2681_v44 }
0x1425   :  { %3519 = vmatpush3.bf16.msra.mxu1 %v3618_v15 }
0x1426   :  { %3536 = vmatprep.subr.bf16.mxu1 %v3807_v1 }
0x14a8   :  { %v2680_v49 = vpop.xlane.xlu1 %2679 }
0x14a9   :  { %v2684_v45 = vmul.f32 0.03125, %v2680_v49 }
0x14ab   :  { %v2686_v39 = vsub.f32 %v2672_v35, %v2684_v45 }
0x14ac   :  { %v2683_v46 = vpop.xlane.xlu0 %2682 }
0x14ad   :  { %v2685_v47 = vmul.f32 0.03125, %v2683_v46  ;;  %v2688_v48 = vmul.f32 %v2686_v39, %v2686_v39 }
0x14af   :  { %v2687_v50 = vsub.f32 %v2673_v41, %v2685_v47  ;;  %v2690_v42 = vsel %vm224_vm5, %v2688_v48, 0.0 }
0x14b0   :  { %2691 = vadd.xlane.f32.xlu0 %v2690_v42 }
0x14b1   :  { %v2689_v52 = vmul.f32 %v2687_v50, %v2687_v50 }
0x14b3   :  { %v2693_v53 = vsel %vm224_vm5, %v2689_v52, 0.0 }
0x14b4   :  { %2694 = vadd.xlane.f32.xlu1 %v2693_v53 }
0x1539   :  { %v2692_v55 = vpop.xlane.xlu0 %2691 }
0x153a   :  { %v2696_v56 = vmul.f32 0.03125, %v2692_v55 }
0x153c   :  { %v2698_v57 = vadd.f32 1e-12, %v2696_v56 }
0x153d   :  { %v2695_v51 = vpop.xlane.xlu1 %2694 }
0x153e   :  { %3705 = vrsqrt.f32 %v2698_v57  ;;  %v2697_v61 = vmul.f32 0.03125, %v2695_v51 }
0x1540   :  { %v2699_v62 = vadd.f32 1e-12, %v2697_v61 }
0x1542   :  { %3707 = vrsqrt.f32 %v2699_v62  ;;  %v3623_v62 = vld [vmem:[%s4602_s18 + $0x8] sm:$0xff]  }
0x154b   :  { %v3706_v63 = vpop.eup %3705 }
0x154c   :  { %v2702_v0 = vmul.f32 %v3706_v63, %v2686_v39  ;;  %v3624_v63 = vld [vmem:[%s4602_s18] sm:$0xff]  }
0x154e   :  { %v2710_v5 = vmul.f32 %v3117_v58, %v2702_v0 }
0x154f   :  { %v3708_v2 = vpop.eup %3707 }
0x1550   :  { %v2703_v54 = vmul.f32 %v3708_v2, %v2687_v50  ;;  %v2718_v8 = vadd.f32 %v3118_v6, %v2710_v5 }
0x1552   :  { %v2711_v7 = vmul.f32 %v3117_v58, %v2703_v54 }
0x1554   :  { %v2719_v9 = vadd.f32 %v3118_v6, %v2711_v7 }
0x1556   :  { %v2720_v12 = vpack.c.bf16 %v2719_v9, %v2718_v8 }
0x1558   :  { %3521 = vmatmul.mubr.msk.bf16.vlgmr.msra.gmra.mxu1 %vm224_vm5, %v2720_v12  ;;  %v3145_v12 = vld [vmem:[%s4600_s16 + $0x1] ss:$0 sm:$0xff]  ;;  %s3777_s16 = scalar_lea.vmem %s3022_s21, 32 }
0x1559   :  { %3540 = vmatprep.mubr.msk.bf16.mxu1 %vm3808_vm1, %v3807_v1  ;;  %3537 = vmatpush3.bf16.msra.mxu1 %v3623_v62  ;;  %p3778_p1 = scmp.ne.s32.totalorder %s3022_s21, %s3777_s16  ;;  %p3783_p3 = scmp.lt.s32.totalorder %s3777_s16, %s3777_s16 }
0x155a   :  { %3538 = vmatprep.subr.bf16.mxu1 %v3807_v1  ;;  %v3146_v1 = vld [vmem:[%s4601_s17 + $0x1] ss:$0 sm:$0xff] }
0x155b   :  { %p3784_p4 = por %p3783_p3, %p3782_p2 }
0x155d   :  { %3539 = vmatpush3.bf16.msra.mxu1 %v3624_v63  ;;  %p3785_p5 = pnand %p3784_p4, %p3778_p1 }
0x1618   :  { %v2783_v59 = vpop.f32.mrf.mxu1 }
0x1619   :  { %v2784_v4 = vadd.f32 %v3124_v18, %v2783_v59 }
0x161a   :  { %v3522_v19 = vpop.f32.mrf.mxu1 }
0x161b   :  { %v2792_v60 = vmul.f32 0.044715, %v2784_v4  ;;  %v2790_v33 = vmul.f32 0.5, %v2784_v4 }
0x161c   :  { %v2786_v21 = vpop.f32.mrf.mxu1 }
0x161d   :  { %v2794_v22 = vmul.f32 %v2792_v60, %v2784_v4  ;;  %v2787_v3 = vadd.f32 %v3124_v18, %v2786_v21  ;;  %v3147_v60 = vld [vmem:[#allocation7] ss:$0 sm:$0xff] }
0x161e   :  { %v3523_v10 = vpop.f32.mrf.mxu1 }
0x161f   :  { %v2796_v24 = vmul.f32 %v2794_v22, %v2784_v4  ;;  %v2793_v25 = vmul.f32 0.044715, %v2787_v3  ;;  %v2791_v34 = vmul.f32 0.5, %v2787_v3 }
0x1621   :  { %v2798_v11 = vadd.f32 %v2796_v24, %v2784_v4  ;;  %v2795_v27 = vmul.f32 %v2793_v25, %v2787_v3 }
0x1623   :  { %v2800_v20 = vmul.f32 0.7978846, %v2798_v11  ;;  %v2797_v26 = vmul.f32 %v2795_v27, %v2787_v3 }
0x1625   :  { %3709 = vtanh.f32 %v2800_v20  ;;  %v2799_v28 = vadd.f32 %v2797_v26, %v2787_v3 }
0x1627   :  { %v2801_v29 = vmul.f32 0.7978846, %v2799_v28 }
0x1629   :  { %3711 = vtanh.f32 %v2801_v29 }
0x1632   :  { %v3710_v30 = vpop.eup %3709 }
0x1633   :  { %v2804_v31 = vadd.f32 1.0, %v3710_v30 }
0x1635   :  { %v2806_v35 = vmul.f32 %v2804_v31, %v2790_v33 }
0x1636   :  { %v3712_v32 = vpop.eup %3711 }
0x1637   :  { %v2805_v23 = vadd.f32 1.0, %v3712_v32 }
0x1639   :  { %v2807_v36 = vmul.f32 %v2805_v23, %v2791_v34 }
0x163b   :  { %v2808_v37 = vpack.c.bf16 %v2807_v36, %v2806_v35 }
0x163d   :  { %3533 = vmatmul.mubr.msk.bf16.vlgmr.msra.gmra.mxu0 %vm1515_vm10, %v2808_v37 }
0x16fd   :  { %v2887_v40 = vpop.f32.mrf.mxu0 }
0x16fe   :  { %v2888_v41 = vadd.f32 %v3137_v38, %v2887_v40 }
0x16ff   :  { %v3534_v44 = vpop.f32.mrf.mxu0 }
0x1700   :  { %v2894_v49 = vadd.f32 %v2888_v41, %v2718_v8 }
0x1701   :  { %v2890_v45 = vpop.f32.mrf.mxu0 }
0x1702   :  { %v2891_v39 = vadd.f32 %v3137_v38, %v2890_v45  ;;  %v2900_v46 = vsel %vm224_vm5, %v2894_v49, 0.0 }
0x1703   :  { %2901 = vadd.xlane.f32.xlu1 %v2900_v46  ;;  %v3535_v47 = vpop.f32.mrf.mxu0 }
0x1704   :  { %v2895_v48 = vadd.f32 %v2891_v39, %v2719_v9 }
0x1706   :  { %v2903_v50 = vsel %vm224_vm5, %v2895_v48, 0.0 }
0x1707   :  { %2904 = vadd.xlane.f32.xlu0 %v2903_v50 }
0x178c   :  { %v2902_v42 = vpop.xlane.xlu1 %2901 }
0x178d   :  { %v2906_v52 = vmul.f32 0.03125, %v2902_v42 }
0x178f   :  { %v2908_v53 = vsub.f32 %v2894_v49, %v2906_v52 }
0x1790   :  { %v2905_v43 = vpop.xlane.xlu0 %2904 }
0x1791   :  { %v2907_v15 = vmul.f32 0.03125, %v2905_v43  ;;  %v2910_v55 = vmul.f32 %v2908_v53, %v2908_v53 }
0x1793   :  { %v2909_v56 = vsub.f32 %v2895_v48, %v2907_v15  ;;  %v2912_v57 = vsel %vm224_vm5, %v2910_v55, 0.0 }
0x1794   :  { %2913 = vadd.xlane.f32.xlu1 %v2912_v57 }
0x1795   :  { %v2911_v51 = vmul.f32 %v2909_v56, %v2909_v56 }
0x1797   :  { %v2915_v61 = vsel %vm224_vm5, %v2911_v51, 0.0 }
0x1798   :  { %2916 = vadd.xlane.f32.xlu0 %v2915_v61 }
0x181d   :  { %v2914_v0 = vpop.xlane.xlu1 %2913 }
0x181e   :  { %v2918_v58 = vmul.f32 0.03125, %v2914_v0 }
0x1820   :  { %v2920_v2 = vadd.f32 1e-12, %v2918_v58 }
0x1821   :  { %v2917_v54 = vpop.xlane.xlu0 %2916 }
0x1822   :  { %3713 = vrsqrt.f32 %v2920_v2  ;;  %v2919_v5 = vmul.f32 0.03125, %v2917_v54 }
0x1824   :  { %v2921_v6 = vadd.f32 1e-12, %v2919_v5 }
0x1826   :  { %3715 = vrsqrt.f32 %v2921_v6 }
0x182f   :  { %v3714_v7 = vpop.eup %3713 }
0x1830   :  { %v2924_v8 = vmul.f32 %v3714_v7, %v2908_v53 }
0x1832   :  { %v2932_v14 = vmul.f32 %v3145_v12, %v2924_v8 }
0x1833   :  { %v3716_v9 = vpop.eup %3715 }
0x1834   :  { %v2925_v13 = vmul.f32 %v3716_v9, %v2909_v56  ;;  %v2940_v18 = vadd.f32 %v3146_v1, %v2932_v14 }
0x1836   :  { %v2933_v16 = vmul.f32 %v3145_v12, %v2925_v13 }
0x1838   :  { %v2941_v17 = vadd.f32 %v3146_v1, %v2933_v16 }
0x183a   :  { %v2943_v59 = vrot.slane %v2941_v17, 7 }
0x183c   :  { %v2946_v4 = vsel %vm2945_vm11, %v2940_v18, %v2943_v59 }
0x183d   :  { %v2947_v19 = vpack.c.bf16 %v2946_v4, %v2946_v4 }
0x183f   :  { %3541 = vmatmul.mubr.msk.bf16.vlgmr.msra.gmra.mxu1 %vm224_vm5, %v2947_v19 }
0x18ff   :  { %v3008_v21 = vpop.f32.mrf.mxu1 }
0x1900   :  { %v3009_v22 = vadd.f32 %v3147_v60, %v3008_v21 }
0x1901   :  { %v3542_v3 = vpop.f32.mrf.mxu1 }
0x1902   :  { %3014 = vst [vmem:[#allocation8] sm:$0x3] %v3009_v22 }
0x1903   :  { %v3011_v10 = vpop.f32.mrf.mxu1 }
0x1904   :  { %3788 = shalt.err (!%p3785_p5)
}
0x1905   :  { %3024 = dma.vmem_to_hbm [thread:$0]  %s3022_s21, 32, %s4604_s20, [#allocation4]   ;;  %v3543_v24 = vpop.f32.mrf.mxu1 }
0x1906   :  { %3801 = dma.done.wait [#allocation4], 32  }
0x1907   :  { %3802 = vsyncadd [#allocation4], 4294967264 }
0x1908   :  { %3028 = vsyncpa [#allocation3], 1 }
0x1909   :  { %3029 = vsyncpa [#allocation6], 1 }
0x190a   :  { %3030 = vsyncpa [#allocation4], 1 }

</bundles_post_ra>
